<compile_context>
chip_gen: v5e
topology: v5e:2x2
jax: 0.10.0
libtpu: 0.0.40
codegen_flags: <defaults>
</compile_context>

<pallas_src>
import math
import functools

import jax
import jax.numpy as jnp
from jax.experimental import pallas as pl
from jax.experimental.pallas import tpu as pltpu

LANE = 128  # lane-dense output slab width for the fused head logits


# ----------------------------------------------------------------------------
# Pallas kernel
# ----------------------------------------------------------------------------

def _layer_norm(x, w, b, eps=1e-5):
    mu = jnp.mean(x, axis=-1, keepdims=True)
    var = jnp.mean((x - mu) ** 2, axis=-1, keepdims=True)
    return (x - mu) * jax.lax.rsqrt(var + eps) * w + b


def transformer_net_kernel(x_ref, spk_ref,
                           wqkv_ref, bqkv_ref, wo_ref, bo_ref,
                           ln1w_ref, ln1b_ref, w1_ref, b1_ref,
                           w2_ref, b2_ref, ln2w_ref, ln2b_ref,
                           spk_w_ref, spk_b_ref,
                           hw1_ref, hb1_ref, hw2_ref, hb2_ref,
                           out_ref, *,
                           batch, seq_pad, seq_real, n_heads, n_logits):
    """Whole TransformerNet forward: encoder stack + speaker MLP + fused heads."""
    f32 = jnp.float32
    bf16 = jnp.bfloat16
    n_layers = wqkv_ref.shape[0]
    D = x_ref.shape[-1]
    dh = D // n_heads
    scale = 1.0 / math.sqrt(dh)

    # Key-padding mask: padded key positions get a large negative score.
    key_idx = jax.lax.broadcasted_iota(jnp.int32, (1, seq_pad), 1)
    key_mask = jnp.where(key_idx < seq_real, 0.0, -1e9).astype(f32)   # (1, Sp)

    x = x_ref[...].astype(f32)                                        # (B*Sp, D)

    for l in range(n_layers):                                         # static, L is tiny
        # Fused QKV projection: bf16 operands, fp32 accumulation.
        qkv = (jnp.dot(x.astype(bf16), wqkv_ref[l],
                       preferred_element_type=f32) + bqkv_ref[l])     # (B*Sp, 3D)
        q3 = qkv[:, :D].reshape(batch, seq_pad, D)                    # (B, Sp, D)
        k3 = qkv[:, D:2 * D].reshape(batch, seq_pad, D)
        v3 = qkv[:, 2 * D:].reshape(batch, seq_pad, D)

        # Batched (over batch dim) attention; small static per-head loop.
        ctx_heads = []
        for h in range(n_heads):
            sl = slice(h * dh, (h + 1) * dh)
            q = q3[:, :, sl].astype(bf16)                             # (B, Sp, dh)
            k = k3[:, :, sl].astype(bf16)
            v = v3[:, :, sl].astype(bf16)
            s = jnp.einsum('bqd,bkd->bqk', q, k,
                           preferred_element_type=f32) * scale        # (B, Sp, Sp)
            s = s + key_mask                                           # mask padded keys
            s = s - jnp.max(s, axis=-1, keepdims=True)
            p = jnp.exp(s)
            p = p * pl.reciprocal(jnp.sum(p, axis=-1, keepdims=True), approx=True)
            ctx_heads.append(jnp.einsum('bqk,bkd->bqd', p.astype(bf16), v,
                                        preferred_element_type=f32))  # (B, Sp, dh)
        # Concatenate heads in registers (no VMEM scratch round trip).
        ctx = jnp.concatenate(ctx_heads, axis=-1).reshape(batch * seq_pad, D)

        attn = (jnp.dot(ctx.astype(bf16), wo_ref[l],
                        preferred_element_type=f32) + bo_ref[l])

        # Post-norm residual + ReLU feed-forward + LayerNorm (norm_first=False).
        x1 = _layer_norm(x + attn, ln1w_ref[l], ln1b_ref[l])
        h1 = jnp.maximum(
            jnp.dot(x1.astype(bf16), w1_ref[l], preferred_element_type=f32)
            + b1_ref[l], 0.0)
        ff = (jnp.dot(h1.astype(bf16), w2_ref[l], preferred_element_type=f32)
              + b2_ref[l])
        x = _layer_norm(x1 + ff, ln2w_ref[l], ln2b_ref[l])

    # CLS rows: stride seq_pad (multiple of 8) -> sublane-aligned gather.
    cls = x.reshape(batch, seq_pad, D)[:, 0, :]                       # (B, D)

    # Speaker MLP.
    spk = jnp.maximum(
        jnp.dot(spk_ref[...].astype(bf16), spk_w_ref[...],
                preferred_element_type=f32) + spk_b_ref[...], 0.0)    # (B, spk_dim)
    feat = jnp.concatenate([cls, spk], axis=-1)                       # (B, D+spk_dim)

    # Fused emotion+sentiment heads: W1 columns concatenated, W2 block-diagonal.
    hh = jnp.maximum(
        jnp.dot(feat.astype(bf16), hw1_ref[...],
                preferred_element_type=f32) + hb1_ref[...], 0.0)      # (B, 2*hidden)
    logits = (jnp.dot(hh.astype(bf16), hw2_ref[...],
                      preferred_element_type=f32) + hb2_ref[...])     # (B, n_logits)

    # Single lane-dense (B, 128) store; sliced back into emo / sen in JAX.
    pad = jnp.zeros((batch, out_ref.shape[-1] - n_logits), f32)
    out_ref[...] = jnp.concatenate([logits, pad], axis=-1).astype(out_ref.dtype)


# ----------------------------------------------------------------------------
# Wrapper (JAX glue + single pallas_call)
# ----------------------------------------------------------------------------

def transformer_net_forward(params, x_utterance, x_speaker, n_heads, n_classes):
    B, S = x_utterance.shape
    D = params['embedding'].shape[1]
    S1 = S + 1
    S_pad = ((S1 + 7) // 8) * 8                                       # sublane-align

    # Embedding lookup + CLS token + sinusoidal positional encoding.
    emb = jnp.take(params['embedding'], x_utterance, axis=0)          # (B, S, D)
    cls_tok = jnp.broadcast_to(params['cls_token'], (B, 1, D))
    x = jnp.concatenate([cls_tok, emb], axis=1) + params['pe'][None, :S1, :]
    x = jnp.pad(x, ((0, 0), (0, S_pad - S1), (0, 0)))                 # (B, Sp, D)
    x2d = x.reshape(B * S_pad, D).astype(jnp.float32)

    n_emo, n_sen = n_classes
    n_logits = n_emo + n_sen

    args = (x2d, x_speaker,
            params['wqkv'], params['bqkv'], params['wo'], params['bo'],
            params['ln1w'], params['ln1b'], params['w1'], params['b1'],
            params['w2'], params['b2'], params['ln2w'], params['ln2b'],
            params['spk_w'], params['spk_b'],
            params['head_w1'], params['head_b1'],
            params['head_w2'], params['head_b2'])

    def full(a):
        nd = a.ndim
        return pl.BlockSpec(a.shape, lambda i, _nd=nd: (0,) * _nd)

    out = pl.pallas_call(
        functools.partial(transformer_net_kernel, batch=B, seq_pad=S_pad,
                          seq_real=S1, n_heads=n_heads, n_logits=n_logits),
        grid=(1,),
        in_specs=[full(a) for a in args],
        out_specs=pl.BlockSpec((B, LANE), lambda i: (0, 0)),
        out_shape=jax.ShapeDtypeStruct((B, LANE), jnp.float32),
        compiler_params=pltpu.CompilerParams(
            dimension_semantics=("arbitrary",),
            vmem_limit_bytes=32 * 1024 * 1024),
    )(*args)

    return out[:, :n_emo], out[:, n_emo:n_logits]


# ----------------------------------------------------------------------------
# Parameters (deterministic, synthetic — shapes match the PyTorch module)
# ----------------------------------------------------------------------------

def make_pos_encoding(d_model, max_len):
    position = jnp.arange(max_len, dtype=jnp.float32)[:, None]
    div_term = jnp.exp(jnp.arange(0, d_model, 2, dtype=jnp.float32)
                       * (-math.log(10000.0) / d_model))
    pe = jnp.zeros((max_len, d_model), jnp.float32)
    pe = pe.at[:, 0::2].set(jnp.sin(position * div_term))
    pe = pe.at[:, 1::2].set(jnp.cos(position * div_term))
    return pe


def init_params(key, vocab_size, d_model, n_speakers, n_classes, n_heads,
                n_layers, hidden_size, max_len=100):
    spk_dim = hidden_size // 4
    feat_dim = d_model + spk_dim
    n_emo, n_sen = n_classes
    bf16 = jnp.bfloat16

    def nrm(k, shape, scale=0.05, dtype=jnp.float32):
        return (scale * jax.random.normal(k, shape, jnp.float32)).astype(dtype)

    keys = jax.random.split(key, 16)
    L = n_layers

    # Fused classifier heads: W1 columns = [emotion | sentiment];
    # W2 block-diagonal so both heads run as one matmul chain (same math as two
    # independent nn.Sequential heads).
    emo_w2 = 0.05 * jax.random.normal(keys[9], (hidden_size, n_emo), jnp.float32)
    sen_w2 = 0.05 * jax.random.normal(keys[11], (hidden_size, n_sen), jnp.float32)
    head_w2 = jnp.zeros((2 * hidden_size, n_emo + n_sen), jnp.float32)
    head_w2 = head_w2.at[:hidden_size, :n_emo].set(emo_w2)
    head_w2 = head_w2.at[hidden_size:, n_emo:].set(sen_w2)

    params = {
        'embedding': nrm(keys[0], (vocab_size, d_model), 0.1),
        'cls_token': nrm(keys[1], (1, 1, d_model), 0.1),
        'pe': make_pos_encoding(d_model, max_len),
        # Transformer encoder stack — weights stacked on a leading layer axis.
        # wqkv columns are [Wq | Wk | Wv], each head-contiguous (dh-wide chunks),
        # matching nn.MultiheadAttention's in_proj layout semantics.  Matmul
        # weights are stored bf16 (MXU-native), biases / LN params fp32.
        'wqkv': nrm(keys[2], (L, d_model, 3 * d_model), dtype=bf16),
        'bqkv': nrm(keys[3], (L, 1, 3 * d_model)),
        'wo': nrm(keys[4], (L, d_model, d_model), dtype=bf16),
        'bo': jnp.zeros((L, 1, d_model), jnp.float32),
        'ln1w': jnp.ones((L, 1, d_model), jnp.float32),
        'ln1b': jnp.zeros((L, 1, d_model), jnp.float32),
        'w1': nrm(keys[5], (L, d_model, hidden_size), dtype=bf16),
        'b1': jnp.zeros((L, 1, hidden_size), jnp.float32),
        'w2': nrm(keys[6], (L, hidden_size, d_model), dtype=bf16),
        'b2': jnp.zeros((L, 1, d_model), jnp.float32),
        'ln2w': jnp.ones((L, 1, d_model), jnp.float32),
        'ln2b': jnp.zeros((L, 1, d_model), jnp.float32),
        # Speaker MLP.
        'spk_w': nrm(keys[7], (n_speakers, spk_dim), dtype=bf16),
        'spk_b': jnp.zeros((1, spk_dim), jnp.float32),
        # Fused classification heads.
        'head_w1': jnp.concatenate(
            [0.05 * jax.random.normal(keys[8], (feat_dim, hidden_size), jnp.float32),
             0.05 * jax.random.normal(keys[10], (feat_dim, hidden_size), jnp.float32)],
            axis=-1).astype(bf16),
        'head_b1': jnp.zeros((1, 2 * hidden_size), jnp.float32),
        'head_w2': head_w2.astype(bf16),
        'head_b2': jnp.zeros((1, n_emo + n_sen), jnp.float32),
    }
    return params


# ----------------------------------------------------------------------------
# Demo
# ----------------------------------------------------------------------------

if __name__ == "__main__":
    vocab_size = 50
    embedding_dim = 32
    n_speakers = 4
    n_classes = [7, 3]           # [Emotion, Sentiment]
    n_heads = 4
    n_layers = 2
    hidden_size = 32
    B, S = 2, 8

    key = jax.random.PRNGKey(0)
    k_ids, k_spk, k_par = jax.random.split(key, 3)
    x_utterance = jax.random.randint(k_ids, (B, S), 0, vocab_size, dtype=jnp.int32)
    x_speaker = jax.random.normal(k_spk, (B, n_speakers), jnp.float32)

    params = init_params(k_par, vocab_size, embedding_dim, n_speakers,
                         n_classes, n_heads, n_layers, hidden_size)

    fwd = jax.jit(functools.partial(transformer_net_forward,
                                    n_heads=n_heads, n_classes=tuple(n_classes)))
    out_emotion, out_sentiment = fwd(params, x_utterance, x_speaker)
    jax.block_until_ready((out_emotion, out_sentiment))

    assert out_emotion.shape == (B, n_classes[0])
    assert out_sentiment.shape == (B, n_classes[1])
    assert bool(jnp.all(jnp.isfinite(out_emotion)))
    assert bool(jnp.all(jnp.isfinite(out_sentiment)))
    print("KERNEL_OK")
</pallas_src>

<mosaic_0001>
module attributes {stable_mosaic.version = 11 : i64} {
  func.func @transformer_net_kernel(%arg0: i32, %arg1: memref<32x32xf32, #tpu.memory_space<vmem>>, %arg2: memref<2x4xf32, #tpu.memory_space<vmem>>, %arg3: memref<2x32x96xbf16, #tpu.memory_space<vmem>>, %arg4: memref<2x1x96xf32, #tpu.memory_space<vmem>>, %arg5: memref<2x32x32xbf16, #tpu.memory_space<vmem>>, %arg6: memref<2x1x32xf32, #tpu.memory_space<vmem>>, %arg7: memref<2x1x32xf32, #tpu.memory_space<vmem>>, %arg8: memref<2x1x32xf32, #tpu.memory_space<vmem>>, %arg9: memref<2x32x32xbf16, #tpu.memory_space<vmem>>, %arg10: memref<2x1x32xf32, #tpu.memory_space<vmem>>, %arg11: memref<2x32x32xbf16, #tpu.memory_space<vmem>>, %arg12: memref<2x1x32xf32, #tpu.memory_space<vmem>>, %arg13: memref<2x1x32xf32, #tpu.memory_space<vmem>>, %arg14: memref<2x1x32xf32, #tpu.memory_space<vmem>>, %arg15: memref<4x8xbf16, #tpu.memory_space<vmem>>, %arg16: memref<1x8xf32, #tpu.memory_space<vmem>>, %arg17: memref<40x64xbf16, #tpu.memory_space<vmem>>, %arg18: memref<1x64xf32, #tpu.memory_space<vmem>>, %arg19: memref<64x10xbf16, #tpu.memory_space<vmem>>, %arg20: memref<1x10xf32, #tpu.memory_space<vmem>>, %arg21: memref<2x128xf32, #tpu.memory_space<vmem>>) attributes {dimension_semantics = [#tpu.dimension_semantics<arbitrary>], iteration_bounds = array<i64: 1>, scalar_prefetch = 0 : i64, scratch_operands = 0 : i64, tpu.core_type = #tpu.core_type<tc>, window_params = [{pipeline_mode = #tpu.pipeline_mode<synchronous>, transform_indices = @transform_0, window_bounds = array<i64: 32, 32>}, {pipeline_mode = #tpu.pipeline_mode<synchronous>, transform_indices = @transform_1, window_bounds = array<i64: 2, 4>}, {pipeline_mode = #tpu.pipeline_mode<synchronous>, transform_indices = @transform_2, window_bounds = array<i64: 2, 32, 96>}, {pipeline_mode = #tpu.pipeline_mode<synchronous>, transform_indices = @transform_3, window_bounds = array<i64: 2, 1, 96>}, {pipeline_mode = #tpu.pipeline_mode<synchronous>, transform_indices = @transform_4, window_bounds = array<i64: 2, 32, 32>}, {pipeline_mode = #tpu.pipeline_mode<synchronous>, transform_indices = @transform_5, window_bounds = array<i64: 2, 1, 32>}, {pipeline_mode = #tpu.pipeline_mode<synchronous>, transform_indices = @transform_6, window_bounds = array<i64: 2, 1, 32>}, {pipeline_mode = #tpu.pipeline_mode<synchronous>, transform_indices = @transform_7, window_bounds = array<i64: 2, 1, 32>}, {pipeline_mode = #tpu.pipeline_mode<synchronous>, transform_indices = @transform_8, window_bounds = array<i64: 2, 32, 32>}, {pipeline_mode = #tpu.pipeline_mode<synchronous>, transform_indices = @transform_9, window_bounds = array<i64: 2, 1, 32>}, {pipeline_mode = #tpu.pipeline_mode<synchronous>, transform_indices = @transform_10, window_bounds = array<i64: 2, 32, 32>}, {pipeline_mode = #tpu.pipeline_mode<synchronous>, transform_indices = @transform_11, window_bounds = array<i64: 2, 1, 32>}, {pipeline_mode = #tpu.pipeline_mode<synchronous>, transform_indices = @transform_12, window_bounds = array<i64: 2, 1, 32>}, {pipeline_mode = #tpu.pipeline_mode<synchronous>, transform_indices = @transform_13, window_bounds = array<i64: 2, 1, 32>}, {pipeline_mode = #tpu.pipeline_mode<synchronous>, transform_indices = @transform_14, window_bounds = array<i64: 4, 8>}, {pipeline_mode = #tpu.pipeline_mode<synchronous>, transform_indices = @transform_15, window_bounds = array<i64: 1, 8>}, {pipeline_mode = #tpu.pipeline_mode<synchronous>, transform_indices = @transform_16, window_bounds = array<i64: 40, 64>}, {pipeline_mode = #tpu.pipeline_mode<synchronous>, transform_indices = @transform_17, window_bounds = array<i64: 1, 64>}, {pipeline_mode = #tpu.pipeline_mode<synchronous>, transform_indices = @transform_18, window_bounds = array<i64: 64, 10>}, {pipeline_mode = #tpu.pipeline_mode<synchronous>, transform_indices = @transform_19, window_bounds = array<i64: 1, 10>}, {pipeline_mode = #tpu.pipeline_mode<synchronous>, transform_indices = @transform_20, window_bounds = array<i64: 2, 128>}]} {
    %0 = tpu.iota {dimensions = array<i32: 1>} : vector<1x16xi32>
    %c9_i32 = arith.constant 9 : i32
    %1 = vector.broadcast %c9_i32 : i32 to vector<1x16xi32>
    %2 = arith.cmpi slt, %0, %1 : vector<1x16xi32>
    %cst = arith.constant 0.000000e+00 : f32
    %cst_0 = arith.constant -1.000000e+09 : f32
    %3 = vector.broadcast %cst : f32 to vector<1x16xf32>
    %4 = vector.broadcast %cst_0 : f32 to vector<1x16xf32>
    %5 = arith.select %2, %3, %4 : vector<1x16xi1>, vector<1x16xf32>
    %c0 = arith.constant 0 : index
    %c0_1 = arith.constant 0 : index
    %6 = vector.load %arg1[%c0, %c0_1] : memref<32x32xf32, #tpu.memory_space<vmem>>, vector<32x32xf32>
    %7 = arith.truncf %6 : vector<32x32xf32> to vector<32x32xbf16>
    %c0_2 = arith.constant 0 : index
    %c0_3 = arith.constant 0 : index
    %c0_4 = arith.constant 0 : index
    %8 = vector.load %arg3[%c0_2, %c0_3, %c0_4] : memref<2x32x96xbf16, #tpu.memory_space<vmem>>, vector<1x32x96xbf16>
    %9 = vector.shape_cast %8 : vector<1x32x96xbf16> to vector<32x96xbf16>
    %cst_5 = arith.constant dense<0.000000e+00> : vector<32x96xf32>
    %10 = tpu.matmul %7, %9, %cst_5 {dimension_numbers = #tpu.dot_dimension_numbers<[1], [0], [0], [1], [0, 0, 1, 1], [], []>} : vector<32x32xbf16>, vector<32x96xbf16>, vector<32x96xf32> -> vector<32x96xf32>
    %c0_6 = arith.constant 0 : index
    %c0_7 = arith.constant 0 : index
    %c0_8 = arith.constant 0 : index
    %11 = vector.load %arg4[%c0_6, %c0_7, %c0_8] : memref<2x1x96xf32, #tpu.memory_space<vmem>>, vector<1x1x96xf32>
    %12 = vector.shape_cast %11 : vector<1x1x96xf32> to vector<1x96xf32>
    %13 = vector.broadcast %12 : vector<1x96xf32> to vector<32x96xf32>
    %14 = arith.addf %10, %13 : vector<32x96xf32>
    %15 = vector.extract_strided_slice %14 {offsets = [0, 0], sizes = [32, 32], strides = [1, 1]} : vector<32x96xf32> to vector<32x32xf32>
    %16 = vector.shape_cast %15 : vector<32x32xf32> to vector<2x16x32xf32>
    %17 = vector.extract_strided_slice %14 {offsets = [0, 32], sizes = [32, 32], strides = [1, 1]} : vector<32x96xf32> to vector<32x32xf32>
    %18 = vector.shape_cast %17 : vector<32x32xf32> to vector<2x16x32xf32>
    %19 = vector.extract_strided_slice %14 {offsets = [0, 64], sizes = [32, 32], strides = [1, 1]} : vector<32x96xf32> to vector<32x32xf32>
    %20 = vector.shape_cast %19 : vector<32x32xf32> to vector<2x16x32xf32>
    %21 = vector.extract_strided_slice %16 {offsets = [0, 0, 0], sizes = [2, 16, 8], strides = [1, 1, 1]} : vector<2x16x32xf32> to vector<2x16x8xf32>
    %22 = arith.truncf %21 : vector<2x16x8xf32> to vector<2x16x8xbf16>
    %23 = vector.extract_strided_slice %18 {offsets = [0, 0, 0], sizes = [2, 16, 8], strides = [1, 1, 1]} : vector<2x16x32xf32> to vector<2x16x8xf32>
    %24 = arith.truncf %23 : vector<2x16x8xf32> to vector<2x16x8xbf16>
    %25 = vector.extract_strided_slice %20 {offsets = [0, 0, 0], sizes = [2, 16, 8], strides = [1, 1, 1]} : vector<2x16x32xf32> to vector<2x16x8xf32>
    %26 = arith.truncf %25 : vector<2x16x8xf32> to vector<2x16x8xbf16>
    "tpu.trace_start"() <{level = 10 : i32, message = "bqd,bkd->bqk"}> : () -> ()
    %cst_9 = arith.constant dense<0.000000e+00> : vector<2x16x16xf32>
    %27 = tpu.matmul %22, %24, %cst_9 {dimension_numbers = #tpu.dot_dimension_numbers<[2], [2], [1], [1], [0, 0, 0, 1, 1, 1], [0], [0]>} : vector<2x16x8xbf16>, vector<2x16x8xbf16>, vector<2x16x16xf32> -> vector<2x16x16xf32>
    "tpu.trace_stop"() : () -> ()
    %cst_10 = arith.constant 0.353553385 : f32
    %28 = vector.broadcast %cst_10 : f32 to vector<2x16x16xf32>
    %29 = arith.mulf %27, %28 : vector<2x16x16xf32>
    %30 = vector.shape_cast %5 : vector<1x16xf32> to vector<1x1x16xf32>
    %31 = vector.broadcast %30 : vector<1x1x16xf32> to vector<2x16x16xf32>
    %32 = arith.addf %29, %31 : vector<2x16x16xf32>
    %cst_11 = arith.constant dense<0xFF800000> : vector<2x16xf32>
    %33 = vector.multi_reduction <maximumf>, %32, %cst_11 [2] : vector<2x16x16xf32> to vector<2x16xf32>
    %34 = vector.shape_cast %33 : vector<2x16xf32> to vector<2x16x1xf32>
    %35 = vector.broadcast %34 : vector<2x16x1xf32> to vector<2x16x16xf32>
    %36 = arith.subf %32, %35 : vector<2x16x16xf32>
    %37 = math.exp %36 : vector<2x16x16xf32>
    %cst_12 = arith.constant dense<0.000000e+00> : vector<2x16xf32>
    %38 = vector.multi_reduction <add>, %37, %cst_12 [2] : vector<2x16x16xf32> to vector<2x16xf32>
    %39 = vector.shape_cast %38 : vector<2x16xf32> to vector<2x16x1xf32>
    %40 = tpu.reciprocal %39 {approx = true} : vector<2x16x1xf32> -> vector<2x16x1xf32>
    %41 = vector.broadcast %40 : vector<2x16x1xf32> to vector<2x16x16xf32>
    %42 = arith.mulf %37, %41 : vector<2x16x16xf32>
    %43 = arith.truncf %42 : vector<2x16x16xf32> to vector<2x16x16xbf16>
    "tpu.trace_start"() <{level = 10 : i32, message = "bqk,bkd->bqd"}> : () -> ()
    %cst_13 = arith.constant dense<0.000000e+00> : vector<2x16x8xf32>
    %44 = tpu.matmul %43, %26, %cst_13 {dimension_numbers = #tpu.dot_dimension_numbers<[2], [1], [1], [2], [0, 0, 0, 1, 1, 2], [0], [0]>} : vector<2x16x16xbf16>, vector<2x16x8xbf16>, vector<2x16x8xf32> -> vector<2x16x8xf32>
    "tpu.trace_stop"() : () -> ()
    %45 = vector.extract_strided_slice %16 {offsets = [0, 0, 8], sizes = [2, 16, 8], strides = [1, 1, 1]} : vector<2x16x32xf32> to vector<2x16x8xf32>
    %46 = arith.truncf %45 : vector<2x16x8xf32> to vector<2x16x8xbf16>
    %47 = vector.extract_strided_slice %18 {offsets = [0, 0, 8], sizes = [2, 16, 8], strides = [1, 1, 1]} : vector<2x16x32xf32> to vector<2x16x8xf32>
    %48 = arith.truncf %47 : vector<2x16x8xf32> to vector<2x16x8xbf16>
    %49 = vector.extract_strided_slice %20 {offsets = [0, 0, 8], sizes = [2, 16, 8], strides = [1, 1, 1]} : vector<2x16x32xf32> to vector<2x16x8xf32>
    %50 = arith.truncf %49 : vector<2x16x8xf32> to vector<2x16x8xbf16>
    "tpu.trace_start"() <{level = 10 : i32, message = "bqd,bkd->bqk"}> : () -> ()
    %cst_14 = arith.constant dense<0.000000e+00> : vector<2x16x16xf32>
    %51 = tpu.matmul %46, %48, %cst_14 {dimension_numbers = #tpu.dot_dimension_numbers<[2], [2], [1], [1], [0, 0, 0, 1, 1, 1], [0], [0]>} : vector<2x16x8xbf16>, vector<2x16x8xbf16>, vector<2x16x16xf32> -> vector<2x16x16xf32>
    "tpu.trace_stop"() : () -> ()
    %cst_15 = arith.constant 0.353553385 : f32
    %52 = vector.broadcast %cst_15 : f32 to vector<2x16x16xf32>
    %53 = arith.mulf %51, %52 : vector<2x16x16xf32>
    %54 = vector.shape_cast %5 : vector<1x16xf32> to vector<1x1x16xf32>
    %55 = vector.broadcast %54 : vector<1x1x16xf32> to vector<2x16x16xf32>
    %56 = arith.addf %53, %55 : vector<2x16x16xf32>
    %cst_16 = arith.constant dense<0xFF800000> : vector<2x16xf32>
    %57 = vector.multi_reduction <maximumf>, %56, %cst_16 [2] : vector<2x16x16xf32> to vector<2x16xf32>
    %58 = vector.shape_cast %57 : vector<2x16xf32> to vector<2x16x1xf32>
    %59 = vector.broadcast %58 : vector<2x16x1xf32> to vector<2x16x16xf32>
    %60 = arith.subf %56, %59 : vector<2x16x16xf32>
    %61 = math.exp %60 : vector<2x16x16xf32>
    %cst_17 = arith.constant dense<0.000000e+00> : vector<2x16xf32>
    %62 = vector.multi_reduction <add>, %61, %cst_17 [2] : vector<2x16x16xf32> to vector<2x16xf32>
    %63 = vector.shape_cast %62 : vector<2x16xf32> to vector<2x16x1xf32>
    %64 = tpu.reciprocal %63 {approx = true} : vector<2x16x1xf32> -> vector<2x16x1xf32>
    %65 = vector.broadcast %64 : vector<2x16x1xf32> to vector<2x16x16xf32>
    %66 = arith.mulf %61, %65 : vector<2x16x16xf32>
    %67 = arith.truncf %66 : vector<2x16x16xf32> to vector<2x16x16xbf16>
    "tpu.trace_start"() <{level = 10 : i32, message = "bqk,bkd->bqd"}> : () -> ()
    %cst_18 = arith.constant dense<0.000000e+00> : vector<2x16x8xf32>
    %68 = tpu.matmul %67, %50, %cst_18 {dimension_numbers = #tpu.dot_dimension_numbers<[2], [1], [1], [2], [0, 0, 0, 1, 1, 2], [0], [0]>} : vector<2x16x16xbf16>, vector<2x16x8xbf16>, vector<2x16x8xf32> -> vector<2x16x8xf32>
    "tpu.trace_stop"() : () -> ()
    %69 = vector.extract_strided_slice %16 {offsets = [0, 0, 16], sizes = [2, 16, 8], strides = [1, 1, 1]} : vector<2x16x32xf32> to vector<2x16x8xf32>
    %70 = arith.truncf %69 : vector<2x16x8xf32> to vector<2x16x8xbf16>
    %71 = vector.extract_strided_slice %18 {offsets = [0, 0, 16], sizes = [2, 16, 8], strides = [1, 1, 1]} : vector<2x16x32xf32> to vector<2x16x8xf32>
    %72 = arith.truncf %71 : vector<2x16x8xf32> to vector<2x16x8xbf16>
    %73 = vector.extract_strided_slice %20 {offsets = [0, 0, 16], sizes = [2, 16, 8], strides = [1, 1, 1]} : vector<2x16x32xf32> to vector<2x16x8xf32>
    %74 = arith.truncf %73 : vector<2x16x8xf32> to vector<2x16x8xbf16>
    "tpu.trace_start"() <{level = 10 : i32, message = "bqd,bkd->bqk"}> : () -> ()
    %cst_19 = arith.constant dense<0.000000e+00> : vector<2x16x16xf32>
    %75 = tpu.matmul %70, %72, %cst_19 {dimension_numbers = #tpu.dot_dimension_numbers<[2], [2], [1], [1], [0, 0, 0, 1, 1, 1], [0], [0]>} : vector<2x16x8xbf16>, vector<2x16x8xbf16>, vector<2x16x16xf32> -> vector<2x16x16xf32>
    "tpu.trace_stop"() : () -> ()
    %cst_20 = arith.constant 0.353553385 : f32
    %76 = vector.broadcast %cst_20 : f32 to vector<2x16x16xf32>
    %77 = arith.mulf %75, %76 : vector<2x16x16xf32>
    %78 = vector.shape_cast %5 : vector<1x16xf32> to vector<1x1x16xf32>
    %79 = vector.broadcast %78 : vector<1x1x16xf32> to vector<2x16x16xf32>
    %80 = arith.addf %77, %79 : vector<2x16x16xf32>
    %cst_21 = arith.constant dense<0xFF800000> : vector<2x16xf32>
    %81 = vector.multi_reduction <maximumf>, %80, %cst_21 [2] : vector<2x16x16xf32> to vector<2x16xf32>
    %82 = vector.shape_cast %81 : vector<2x16xf32> to vector<2x16x1xf32>
    %83 = vector.broadcast %82 : vector<2x16x1xf32> to vector<2x16x16xf32>
    %84 = arith.subf %80, %83 : vector<2x16x16xf32>
    %85 = math.exp %84 : vector<2x16x16xf32>
    %cst_22 = arith.constant dense<0.000000e+00> : vector<2x16xf32>
    %86 = vector.multi_reduction <add>, %85, %cst_22 [2] : vector<2x16x16xf32> to vector<2x16xf32>
    %87 = vector.shape_cast %86 : vector<2x16xf32> to vector<2x16x1xf32>
    %88 = tpu.reciprocal %87 {approx = true} : vector<2x16x1xf32> -> vector<2x16x1xf32>
    %89 = vector.broadcast %88 : vector<2x16x1xf32> to vector<2x16x16xf32>
    %90 = arith.mulf %85, %89 : vector<2x16x16xf32>
    %91 = arith.truncf %90 : vector<2x16x16xf32> to vector<2x16x16xbf16>
    "tpu.trace_start"() <{level = 10 : i32, message = "bqk,bkd->bqd"}> : () -> ()
    %cst_23 = arith.constant dense<0.000000e+00> : vector<2x16x8xf32>
    %92 = tpu.matmul %91, %74, %cst_23 {dimension_numbers = #tpu.dot_dimension_numbers<[2], [1], [1], [2], [0, 0, 0, 1, 1, 2], [0], [0]>} : vector<2x16x16xbf16>, vector<2x16x8xbf16>, vector<2x16x8xf32> -> vector<2x16x8xf32>
    "tpu.trace_stop"() : () -> ()
    %93 = vector.extract_strided_slice %16 {offsets = [0, 0, 24], sizes = [2, 16, 8], strides = [1, 1, 1]} : vector<2x16x32xf32> to vector<2x16x8xf32>
    %94 = arith.truncf %93 : vector<2x16x8xf32> to vector<2x16x8xbf16>
    %95 = vector.extract_strided_slice %18 {offsets = [0, 0, 24], sizes = [2, 16, 8], strides = [1, 1, 1]} : vector<2x16x32xf32> to vector<2x16x8xf32>
    %96 = arith.truncf %95 : vector<2x16x8xf32> to vector<2x16x8xbf16>
    %97 = vector.extract_strided_slice %20 {offsets = [0, 0, 24], sizes = [2, 16, 8], strides = [1, 1, 1]} : vector<2x16x32xf32> to vector<2x16x8xf32>
    %98 = arith.truncf %97 : vector<2x16x8xf32> to vector<2x16x8xbf16>
    "tpu.trace_start"() <{level = 10 : i32, message = "bqd,bkd->bqk"}> : () -> ()
    %cst_24 = arith.constant dense<0.000000e+00> : vector<2x16x16xf32>
    %99 = tpu.matmul %94, %96, %cst_24 {dimension_numbers = #tpu.dot_dimension_numbers<[2], [2], [1], [1], [0, 0, 0, 1, 1, 1], [0], [0]>} : vector<2x16x8xbf16>, vector<2x16x8xbf16>, vector<2x16x16xf32> -> vector<2x16x16xf32>
    "tpu.trace_stop"() : () -> ()
    %cst_25 = arith.constant 0.353553385 : f32
    %100 = vector.broadcast %cst_25 : f32 to vector<2x16x16xf32>
    %101 = arith.mulf %99, %100 : vector<2x16x16xf32>
    %102 = vector.shape_cast %5 : vector<1x16xf32> to vector<1x1x16xf32>
    %103 = vector.broadcast %102 : vector<1x1x16xf32> to vector<2x16x16xf32>
    %104 = arith.addf %101, %103 : vector<2x16x16xf32>
    %cst_26 = arith.constant dense<0xFF800000> : vector<2x16xf32>
    %105 = vector.multi_reduction <maximumf>, %104, %cst_26 [2] : vector<2x16x16xf32> to vector<2x16xf32>
    %106 = vector.shape_cast %105 : vector<2x16xf32> to vector<2x16x1xf32>
    %107 = vector.broadcast %106 : vector<2x16x1xf32> to vector<2x16x16xf32>
    %108 = arith.subf %104, %107 : vector<2x16x16xf32>
    %109 = math.exp %108 : vector<2x16x16xf32>
    %cst_27 = arith.constant dense<0.000000e+00> : vector<2x16xf32>
    %110 = vector.multi_reduction <add>, %109, %cst_27 [2] : vector<2x16x16xf32> to vector<2x16xf32>
    %111 = vector.shape_cast %110 : vector<2x16xf32> to vector<2x16x1xf32>
    %112 = tpu.reciprocal %111 {approx = true} : vector<2x16x1xf32> -> vector<2x16x1xf32>
    %113 = vector.broadcast %112 : vector<2x16x1xf32> to vector<2x16x16xf32>
    %114 = arith.mulf %109, %113 : vector<2x16x16xf32>
    %115 = arith.truncf %114 : vector<2x16x16xf32> to vector<2x16x16xbf16>
    "tpu.trace_start"() <{level = 10 : i32, message = "bqk,bkd->bqd"}> : () -> ()
    %cst_28 = arith.constant dense<0.000000e+00> : vector<2x16x8xf32>
    %116 = tpu.matmul %115, %98, %cst_28 {dimension_numbers = #tpu.dot_dimension_numbers<[2], [1], [1], [2], [0, 0, 0, 1, 1, 2], [0], [0]>} : vector<2x16x16xbf16>, vector<2x16x8xbf16>, vector<2x16x8xf32> -> vector<2x16x8xf32>
    "tpu.trace_stop"() : () -> ()
    %117 = tpu.concatenate %44, %68, %92, %116 in 2 : vector<2x16x8xf32>, vector<2x16x8xf32>, vector<2x16x8xf32>, vector<2x16x8xf32> -> vector<2x16x32xf32>
    %118 = vector.shape_cast %117 : vector<2x16x32xf32> to vector<32x32xf32>
    %119 = arith.truncf %118 : vector<32x32xf32> to vector<32x32xbf16>
    %c0_29 = arith.constant 0 : index
    %c0_30 = arith.constant 0 : index
    %c0_31 = arith.constant 0 : index
    %120 = vector.load %arg5[%c0_29, %c0_30, %c0_31] : memref<2x32x32xbf16, #tpu.memory_space<vmem>>, vector<1x32x32xbf16>
    %121 = vector.shape_cast %120 : vector<1x32x32xbf16> to vector<32x32xbf16>
    %cst_32 = arith.constant dense<0.000000e+00> : vector<32x32xf32>
    %122 = tpu.matmul %119, %121, %cst_32 {dimension_numbers = #tpu.dot_dimension_numbers<[1], [0], [0], [1], [0, 0, 1, 1], [], []>} : vector<32x32xbf16>, vector<32x32xbf16>, vector<32x32xf32> -> vector<32x32xf32>
    %c0_33 = arith.constant 0 : index
    %c0_34 = arith.constant 0 : index
    %c0_35 = arith.constant 0 : index
    %123 = vector.load %arg6[%c0_33, %c0_34, %c0_35] : memref<2x1x32xf32, #tpu.memory_space<vmem>>, vector<1x1x32xf32>
    %124 = vector.shape_cast %123 : vector<1x1x32xf32> to vector<1x32xf32>
    %125 = vector.broadcast %124 : vector<1x32xf32> to vector<32x32xf32>
    %126 = arith.addf %122, %125 : vector<32x32xf32>
    %127 = arith.addf %6, %126 : vector<32x32xf32>
    %c0_36 = arith.constant 0 : index
    %c0_37 = arith.constant 0 : index
    %c0_38 = arith.constant 0 : index
    %128 = vector.load %arg7[%c0_36, %c0_37, %c0_38] : memref<2x1x32xf32, #tpu.memory_space<vmem>>, vector<1x1x32xf32>
    %129 = vector.shape_cast %128 : vector<1x1x32xf32> to vector<1x32xf32>
    %c0_39 = arith.constant 0 : index
    %c0_40 = arith.constant 0 : index
    %c0_41 = arith.constant 0 : index
    %130 = vector.load %arg8[%c0_39, %c0_40, %c0_41] : memref<2x1x32xf32, #tpu.memory_space<vmem>>, vector<1x1x32xf32>
    %131 = vector.shape_cast %130 : vector<1x1x32xf32> to vector<1x32xf32>
    %cst_42 = arith.constant dense<0.000000e+00> : vector<32xf32>
    %132 = vector.multi_reduction <add>, %127, %cst_42 [1] : vector<32x32xf32> to vector<32xf32>
    %133 = vector.shape_cast %132 : vector<32xf32> to vector<32x1xf32>
    %cst_43 = arith.constant 3.200000e+01 : f32
    %134 = vector.broadcast %cst_43 : f32 to vector<32x1xf32>
    %135 = arith.divf %133, %134 : vector<32x1xf32>
    %136 = vector.broadcast %135 : vector<32x1xf32> to vector<32x32xf32>
    %137 = arith.subf %127, %136 : vector<32x32xf32>
    %138 = arith.mulf %137, %137 : vector<32x32xf32>
    %cst_44 = arith.constant dense<0.000000e+00> : vector<32xf32>
    %139 = vector.multi_reduction <add>, %138, %cst_44 [1] : vector<32x32xf32> to vector<32xf32>
    %140 = vector.shape_cast %139 : vector<32xf32> to vector<32x1xf32>
    %cst_45 = arith.constant 3.200000e+01 : f32
    %141 = vector.broadcast %cst_45 : f32 to vector<32x1xf32>
    %142 = arith.divf %140, %141 : vector<32x1xf32>
    %143 = vector.broadcast %135 : vector<32x1xf32> to vector<32x32xf32>
    %144 = arith.subf %127, %143 : vector<32x32xf32>
    %cst_46 = arith.constant 9.99999974E-6 : f32
    %145 = vector.broadcast %cst_46 : f32 to vector<32x1xf32>
    %146 = arith.addf %142, %145 : vector<32x1xf32>
    %147 = math.rsqrt %146 : vector<32x1xf32>
    %148 = vector.broadcast %147 : vector<32x1xf32> to vector<32x32xf32>
    %149 = arith.mulf %144, %148 : vector<32x32xf32>
    %150 = vector.broadcast %129 : vector<1x32xf32> to vector<32x32xf32>
    %151 = arith.mulf %149, %150 : vector<32x32xf32>
    %152 = vector.broadcast %131 : vector<1x32xf32> to vector<32x32xf32>
    %153 = arith.addf %151, %152 : vector<32x32xf32>
    %154 = arith.truncf %153 : vector<32x32xf32> to vector<32x32xbf16>
    %c0_47 = arith.constant 0 : index
    %c0_48 = arith.constant 0 : index
    %c0_49 = arith.constant 0 : index
    %155 = vector.load %arg9[%c0_47, %c0_48, %c0_49] : memref<2x32x32xbf16, #tpu.memory_space<vmem>>, vector<1x32x32xbf16>
    %156 = vector.shape_cast %155 : vector<1x32x32xbf16> to vector<32x32xbf16>
    %cst_50 = arith.constant dense<0.000000e+00> : vector<32x32xf32>
    %157 = tpu.matmul %154, %156, %cst_50 {dimension_numbers = #tpu.dot_dimension_numbers<[1], [0], [0], [1], [0, 0, 1, 1], [], []>} : vector<32x32xbf16>, vector<32x32xbf16>, vector<32x32xf32> -> vector<32x32xf32>
    %c0_51 = arith.constant 0 : index
    %c0_52 = arith.constant 0 : index
    %c0_53 = arith.constant 0 : index
    %158 = vector.load %arg10[%c0_51, %c0_52, %c0_53] : memref<2x1x32xf32, #tpu.memory_space<vmem>>, vector<1x1x32xf32>
    %159 = vector.shape_cast %158 : vector<1x1x32xf32> to vector<1x32xf32>
    %160 = vector.broadcast %159 : vector<1x32xf32> to vector<32x32xf32>
    %161 = arith.addf %157, %160 : vector<32x32xf32>
    %cst_54 = arith.constant 0.000000e+00 : f32
    %162 = vector.broadcast %cst_54 : f32 to vector<32x32xf32>
    %163 = arith.maximumf %161, %162 : vector<32x32xf32>
    %164 = arith.truncf %163 : vector<32x32xf32> to vector<32x32xbf16>
    %c0_55 = arith.constant 0 : index
    %c0_56 = arith.constant 0 : index
    %c0_57 = arith.constant 0 : index
    %165 = vector.load %arg11[%c0_55, %c0_56, %c0_57] : memref<2x32x32xbf16, #tpu.memory_space<vmem>>, vector<1x32x32xbf16>
    %166 = vector.shape_cast %165 : vector<1x32x32xbf16> to vector<32x32xbf16>
    %cst_58 = arith.constant dense<0.000000e+00> : vector<32x32xf32>
    %167 = tpu.matmul %164, %166, %cst_58 {dimension_numbers = #tpu.dot_dimension_numbers<[1], [0], [0], [1], [0, 0, 1, 1], [], []>} : vector<32x32xbf16>, vector<32x32xbf16>, vector<32x32xf32> -> vector<32x32xf32>
    %c0_59 = arith.constant 0 : index
    %c0_60 = arith.constant 0 : index
    %c0_61 = arith.constant 0 : index
    %168 = vector.load %arg12[%c0_59, %c0_60, %c0_61] : memref<2x1x32xf32, #tpu.memory_space<vmem>>, vector<1x1x32xf32>
    %169 = vector.shape_cast %168 : vector<1x1x32xf32> to vector<1x32xf32>
    %170 = vector.broadcast %169 : vector<1x32xf32> to vector<32x32xf32>
    %171 = arith.addf %167, %170 : vector<32x32xf32>
    %172 = arith.addf %153, %171 : vector<32x32xf32>
    %c0_62 = arith.constant 0 : index
    %c0_63 = arith.constant 0 : index
    %c0_64 = arith.constant 0 : index
    %173 = vector.load %arg13[%c0_62, %c0_63, %c0_64] : memref<2x1x32xf32, #tpu.memory_space<vmem>>, vector<1x1x32xf32>
    %174 = vector.shape_cast %173 : vector<1x1x32xf32> to vector<1x32xf32>
    %c0_65 = arith.constant 0 : index
    %c0_66 = arith.constant 0 : index
    %c0_67 = arith.constant 0 : index
    %175 = vector.load %arg14[%c0_65, %c0_66, %c0_67] : memref<2x1x32xf32, #tpu.memory_space<vmem>>, vector<1x1x32xf32>
    %176 = vector.shape_cast %175 : vector<1x1x32xf32> to vector<1x32xf32>
    %cst_68 = arith.constant dense<0.000000e+00> : vector<32xf32>
    %177 = vector.multi_reduction <add>, %172, %cst_68 [1] : vector<32x32xf32> to vector<32xf32>
    %178 = vector.shape_cast %177 : vector<32xf32> to vector<32x1xf32>
    %cst_69 = arith.constant 3.200000e+01 : f32
    %179 = vector.broadcast %cst_69 : f32 to vector<32x1xf32>
    %180 = arith.divf %178, %179 : vector<32x1xf32>
    %181 = vector.broadcast %180 : vector<32x1xf32> to vector<32x32xf32>
    %182 = arith.subf %172, %181 : vector<32x32xf32>
    %183 = arith.mulf %182, %182 : vector<32x32xf32>
    %cst_70 = arith.constant dense<0.000000e+00> : vector<32xf32>
    %184 = vector.multi_reduction <add>, %183, %cst_70 [1] : vector<32x32xf32> to vector<32xf32>
    %185 = vector.shape_cast %184 : vector<32xf32> to vector<32x1xf32>
    %cst_71 = arith.constant 3.200000e+01 : f32
    %186 = vector.broadcast %cst_71 : f32 to vector<32x1xf32>
    %187 = arith.divf %185, %186 : vector<32x1xf32>
    %188 = vector.broadcast %180 : vector<32x1xf32> to vector<32x32xf32>
    %189 = arith.subf %172, %188 : vector<32x32xf32>
    %cst_72 = arith.constant 9.99999974E-6 : f32
    %190 = vector.broadcast %cst_72 : f32 to vector<32x1xf32>
    %191 = arith.addf %187, %190 : vector<32x1xf32>
    %192 = math.rsqrt %191 : vector<32x1xf32>
    %193 = vector.broadcast %192 : vector<32x1xf32> to vector<32x32xf32>
    %194 = arith.mulf %189, %193 : vector<32x32xf32>
    %195 = vector.broadcast %174 : vector<1x32xf32> to vector<32x32xf32>
    %196 = arith.mulf %194, %195 : vector<32x32xf32>
    %197 = vector.broadcast %176 : vector<1x32xf32> to vector<32x32xf32>
    %198 = arith.addf %196, %197 : vector<32x32xf32>
    %199 = arith.truncf %198 : vector<32x32xf32> to vector<32x32xbf16>
    %c1 = arith.constant 1 : index
    %c0_73 = arith.constant 0 : index
    %c0_74 = arith.constant 0 : index
    %200 = vector.load %arg3[%c1, %c0_73, %c0_74] : memref<2x32x96xbf16, #tpu.memory_space<vmem>>, vector<1x32x96xbf16>
    %201 = vector.shape_cast %200 : vector<1x32x96xbf16> to vector<32x96xbf16>
    %cst_75 = arith.constant dense<0.000000e+00> : vector<32x96xf32>
    %202 = tpu.matmul %199, %201, %cst_75 {dimension_numbers = #tpu.dot_dimension_numbers<[1], [0], [0], [1], [0, 0, 1, 1], [], []>} : vector<32x32xbf16>, vector<32x96xbf16>, vector<32x96xf32> -> vector<32x96xf32>
    %c1_76 = arith.constant 1 : index
    %c0_77 = arith.constant 0 : index
    %c0_78 = arith.constant 0 : index
    %203 = vector.load %arg4[%c1_76, %c0_77, %c0_78] : memref<2x1x96xf32, #tpu.memory_space<vmem>>, vector<1x1x96xf32>
    %204 = vector.shape_cast %203 : vector<1x1x96xf32> to vector<1x96xf32>
    %205 = vector.broadcast %204 : vector<1x96xf32> to vector<32x96xf32>
    %206 = arith.addf %202, %205 : vector<32x96xf32>
    %207 = vector.extract_strided_slice %206 {offsets = [0, 0], sizes = [32, 32], strides = [1, 1]} : vector<32x96xf32> to vector<32x32xf32>
    %208 = vector.shape_cast %207 : vector<32x32xf32> to vector<2x16x32xf32>
    %209 = vector.extract_strided_slice %206 {offsets = [0, 32], sizes = [32, 32], strides = [1, 1]} : vector<32x96xf32> to vector<32x32xf32>
    %210 = vector.shape_cast %209 : vector<32x32xf32> to vector<2x16x32xf32>
    %211 = vector.extract_strided_slice %206 {offsets = [0, 64], sizes = [32, 32], strides = [1, 1]} : vector<32x96xf32> to vector<32x32xf32>
    %212 = vector.shape_cast %211 : vector<32x32xf32> to vector<2x16x32xf32>
    %213 = vector.extract_strided_slice %208 {offsets = [0, 0, 0], sizes = [2, 16, 8], strides = [1, 1, 1]} : vector<2x16x32xf32> to vector<2x16x8xf32>
    %214 = arith.truncf %213 : vector<2x16x8xf32> to vector<2x16x8xbf16>
    %215 = vector.extract_strided_slice %210 {offsets = [0, 0, 0], sizes = [2, 16, 8], strides = [1, 1, 1]} : vector<2x16x32xf32> to vector<2x16x8xf32>
    %216 = arith.truncf %215 : vector<2x16x8xf32> to vector<2x16x8xbf16>
    %217 = vector.extract_strided_slice %212 {offsets = [0, 0, 0], sizes = [2, 16, 8], strides = [1, 1, 1]} : vector<2x16x32xf32> to vector<2x16x8xf32>
    %218 = arith.truncf %217 : vector<2x16x8xf32> to vector<2x16x8xbf16>
    "tpu.trace_start"() <{level = 10 : i32, message = "bqd,bkd->bqk"}> : () -> ()
    %cst_79 = arith.constant dense<0.000000e+00> : vector<2x16x16xf32>
    %219 = tpu.matmul %214, %216, %cst_79 {dimension_numbers = #tpu.dot_dimension_numbers<[2], [2], [1], [1], [0, 0, 0, 1, 1, 1], [0], [0]>} : vector<2x16x8xbf16>, vector<2x16x8xbf16>, vector<2x16x16xf32> -> vector<2x16x16xf32>
    "tpu.trace_stop"() : () -> ()
    %cst_80 = arith.constant 0.353553385 : f32
    %220 = vector.broadcast %cst_80 : f32 to vector<2x16x16xf32>
    %221 = arith.mulf %219, %220 : vector<2x16x16xf32>
    %222 = vector.shape_cast %5 : vector<1x16xf32> to vector<1x1x16xf32>
    %223 = vector.broadcast %222 : vector<1x1x16xf32> to vector<2x16x16xf32>
    %224 = arith.addf %221, %223 : vector<2x16x16xf32>
    %cst_81 = arith.constant dense<0xFF800000> : vector<2x16xf32>
    %225 = vector.multi_reduction <maximumf>, %224, %cst_81 [2] : vector<2x16x16xf32> to vector<2x16xf32>
    %226 = vector.shape_cast %225 : vector<2x16xf32> to vector<2x16x1xf32>
    %227 = vector.broadcast %226 : vector<2x16x1xf32> to vector<2x16x16xf32>
    %228 = arith.subf %224, %227 : vector<2x16x16xf32>
    %229 = math.exp %228 : vector<2x16x16xf32>
    %cst_82 = arith.constant dense<0.000000e+00> : vector<2x16xf32>
    %230 = vector.multi_reduction <add>, %229, %cst_82 [2] : vector<2x16x16xf32> to vector<2x16xf32>
    %231 = vector.shape_cast %230 : vector<2x16xf32> to vector<2x16x1xf32>
    %232 = tpu.reciprocal %231 {approx = true} : vector<2x16x1xf32> -> vector<2x16x1xf32>
    %233 = vector.broadcast %232 : vector<2x16x1xf32> to vector<2x16x16xf32>
    %234 = arith.mulf %229, %233 : vector<2x16x16xf32>
    %235 = arith.truncf %234 : vector<2x16x16xf32> to vector<2x16x16xbf16>
    "tpu.trace_start"() <{level = 10 : i32, message = "bqk,bkd->bqd"}> : () -> ()
    %cst_83 = arith.constant dense<0.000000e+00> : vector<2x16x8xf32>
    %236 = tpu.matmul %235, %218, %cst_83 {dimension_numbers = #tpu.dot_dimension_numbers<[2], [1], [1], [2], [0, 0, 0, 1, 1, 2], [0], [0]>} : vector<2x16x16xbf16>, vector<2x16x8xbf16>, vector<2x16x8xf32> -> vector<2x16x8xf32>
    "tpu.trace_stop"() : () -> ()
    %237 = vector.extract_strided_slice %208 {offsets = [0, 0, 8], sizes = [2, 16, 8], strides = [1, 1, 1]} : vector<2x16x32xf32> to vector<2x16x8xf32>
    %238 = arith.truncf %237 : vector<2x16x8xf32> to vector<2x16x8xbf16>
    %239 = vector.extract_strided_slice %210 {offsets = [0, 0, 8], sizes = [2, 16, 8], strides = [1, 1, 1]} : vector<2x16x32xf32> to vector<2x16x8xf32>
    %240 = arith.truncf %239 : vector<2x16x8xf32> to vector<2x16x8xbf16>
    %241 = vector.extract_strided_slice %212 {offsets = [0, 0, 8], sizes = [2, 16, 8], strides = [1, 1, 1]} : vector<2x16x32xf32> to vector<2x16x8xf32>
    %242 = arith.truncf %241 : vector<2x16x8xf32> to vector<2x16x8xbf16>
    "tpu.trace_start"() <{level = 10 : i32, message = "bqd,bkd->bqk"}> : () -> ()
    %cst_84 = arith.constant dense<0.000000e+00> : vector<2x16x16xf32>
    %243 = tpu.matmul %238, %240, %cst_84 {dimension_numbers = #tpu.dot_dimension_numbers<[2], [2], [1], [1], [0, 0, 0, 1, 1, 1], [0], [0]>} : vector<2x16x8xbf16>, vector<2x16x8xbf16>, vector<2x16x16xf32> -> vector<2x16x16xf32>
    "tpu.trace_stop"() : () -> ()
    %cst_85 = arith.constant 0.353553385 : f32
    %244 = vector.broadcast %cst_85 : f32 to vector<2x16x16xf32>
    %245 = arith.mulf %243, %244 : vector<2x16x16xf32>
    %246 = vector.shape_cast %5 : vector<1x16xf32> to vector<1x1x16xf32>
    %247 = vector.broadcast %246 : vector<1x1x16xf32> to vector<2x16x16xf32>
    %248 = arith.addf %245, %247 : vector<2x16x16xf32>
    %cst_86 = arith.constant dense<0xFF800000> : vector<2x16xf32>
    %249 = vector.multi_reduction <maximumf>, %248, %cst_86 [2] : vector<2x16x16xf32> to vector<2x16xf32>
    %250 = vector.shape_cast %249 : vector<2x16xf32> to vector<2x16x1xf32>
    %251 = vector.broadcast %250 : vector<2x16x1xf32> to vector<2x16x16xf32>
    %252 = arith.subf %248, %251 : vector<2x16x16xf32>
    %253 = math.exp %252 : vector<2x16x16xf32>
    %cst_87 = arith.constant dense<0.000000e+00> : vector<2x16xf32>
    %254 = vector.multi_reduction <add>, %253, %cst_87 [2] : vector<2x16x16xf32> to vector<2x16xf32>
    %255 = vector.shape_cast %254 : vector<2x16xf32> to vector<2x16x1xf32>
    %256 = tpu.reciprocal %255 {approx = true} : vector<2x16x1xf32> -> vector<2x16x1xf32>
    %257 = vector.broadcast %256 : vector<2x16x1xf32> to vector<2x16x16xf32>
    %258 = arith.mulf %253, %257 : vector<2x16x16xf32>
    %259 = arith.truncf %258 : vector<2x16x16xf32> to vector<2x16x16xbf16>
    "tpu.trace_start"() <{level = 10 : i32, message = "bqk,bkd->bqd"}> : () -> ()
    %cst_88 = arith.constant dense<0.000000e+00> : vector<2x16x8xf32>
    %260 = tpu.matmul %259, %242, %cst_88 {dimension_numbers = #tpu.dot_dimension_numbers<[2], [1], [1], [2], [0, 0, 0, 1, 1, 2], [0], [0]>} : vector<2x16x16xbf16>, vector<2x16x8xbf16>, vector<2x16x8xf32> -> vector<2x16x8xf32>
    "tpu.trace_stop"() : () -> ()
    %261 = vector.extract_strided_slice %208 {offsets = [0, 0, 16], sizes = [2, 16, 8], strides = [1, 1, 1]} : vector<2x16x32xf32> to vector<2x16x8xf32>
    %262 = arith.truncf %261 : vector<2x16x8xf32> to vector<2x16x8xbf16>
    %263 = vector.extract_strided_slice %210 {offsets = [0, 0, 16], sizes = [2, 16, 8], strides = [1, 1, 1]} : vector<2x16x32xf32> to vector<2x16x8xf32>
    %264 = arith.truncf %263 : vector<2x16x8xf32> to vector<2x16x8xbf16>
    %265 = vector.extract_strided_slice %212 {offsets = [0, 0, 16], sizes = [2, 16, 8], strides = [1, 1, 1]} : vector<2x16x32xf32> to vector<2x16x8xf32>
    %266 = arith.truncf %265 : vector<2x16x8xf32> to vector<2x16x8xbf16>
    "tpu.trace_start"() <{level = 10 : i32, message = "bqd,bkd->bqk"}> : () -> ()
    %cst_89 = arith.constant dense<0.000000e+00> : vector<2x16x16xf32>
    %267 = tpu.matmul %262, %264, %cst_89 {dimension_numbers = #tpu.dot_dimension_numbers<[2], [2], [1], [1], [0, 0, 0, 1, 1, 1], [0], [0]>} : vector<2x16x8xbf16>, vector<2x16x8xbf16>, vector<2x16x16xf32> -> vector<2x16x16xf32>
    "tpu.trace_stop"() : () -> ()
    %cst_90 = arith.constant 0.353553385 : f32
    %268 = vector.broadcast %cst_90 : f32 to vector<2x16x16xf32>
    %269 = arith.mulf %267, %268 : vector<2x16x16xf32>
    %270 = vector.shape_cast %5 : vector<1x16xf32> to vector<1x1x16xf32>
    %271 = vector.broadcast %270 : vector<1x1x16xf32> to vector<2x16x16xf32>
    %272 = arith.addf %269, %271 : vector<2x16x16xf32>
    %cst_91 = arith.constant dense<0xFF800000> : vector<2x16xf32>
    %273 = vector.multi_reduction <maximumf>, %272, %cst_91 [2] : vector<2x16x16xf32> to vector<2x16xf32>
    %274 = vector.shape_cast %273 : vector<2x16xf32> to vector<2x16x1xf32>
    %275 = vector.broadcast %274 : vector<2x16x1xf32> to vector<2x16x16xf32>
    %276 = arith.subf %272, %275 : vector<2x16x16xf32>
    %277 = math.exp %276 : vector<2x16x16xf32>
    %cst_92 = arith.constant dense<0.000000e+00> : vector<2x16xf32>
    %278 = vector.multi_reduction <add>, %277, %cst_92 [2] : vector<2x16x16xf32> to vector<2x16xf32>
    %279 = vector.shape_cast %278 : vector<2x16xf32> to vector<2x16x1xf32>
    %280 = tpu.reciprocal %279 {approx = true} : vector<2x16x1xf32> -> vector<2x16x1xf32>
    %281 = vector.broadcast %280 : vector<2x16x1xf32> to vector<2x16x16xf32>
    %282 = arith.mulf %277, %281 : vector<2x16x16xf32>
    %283 = arith.truncf %282 : vector<2x16x16xf32> to vector<2x16x16xbf16>
    "tpu.trace_start"() <{level = 10 : i32, message = "bqk,bkd->bqd"}> : () -> ()
    %cst_93 = arith.constant dense<0.000000e+00> : vector<2x16x8xf32>
    %284 = tpu.matmul %283, %266, %cst_93 {dimension_numbers = #tpu.dot_dimension_numbers<[2], [1], [1], [2], [0, 0, 0, 1, 1, 2], [0], [0]>} : vector<2x16x16xbf16>, vector<2x16x8xbf16>, vector<2x16x8xf32> -> vector<2x16x8xf32>
    "tpu.trace_stop"() : () -> ()
    %285 = vector.extract_strided_slice %208 {offsets = [0, 0, 24], sizes = [2, 16, 8], strides = [1, 1, 1]} : vector<2x16x32xf32> to vector<2x16x8xf32>
    %286 = arith.truncf %285 : vector<2x16x8xf32> to vector<2x16x8xbf16>
    %287 = vector.extract_strided_slice %210 {offsets = [0, 0, 24], sizes = [2, 16, 8], strides = [1, 1, 1]} : vector<2x16x32xf32> to vector<2x16x8xf32>
    %288 = arith.truncf %287 : vector<2x16x8xf32> to vector<2x16x8xbf16>
    %289 = vector.extract_strided_slice %212 {offsets = [0, 0, 24], sizes = [2, 16, 8], strides = [1, 1, 1]} : vector<2x16x32xf32> to vector<2x16x8xf32>
    %290 = arith.truncf %289 : vector<2x16x8xf32> to vector<2x16x8xbf16>
    "tpu.trace_start"() <{level = 10 : i32, message = "bqd,bkd->bqk"}> : () -> ()
    %cst_94 = arith.constant dense<0.000000e+00> : vector<2x16x16xf32>
    %291 = tpu.matmul %286, %288, %cst_94 {dimension_numbers = #tpu.dot_dimension_numbers<[2], [2], [1], [1], [0, 0, 0, 1, 1, 1], [0], [0]>} : vector<2x16x8xbf16>, vector<2x16x8xbf16>, vector<2x16x16xf32> -> vector<2x16x16xf32>
    "tpu.trace_stop"() : () -> ()
    %cst_95 = arith.constant 0.353553385 : f32
    %292 = vector.broadcast %cst_95 : f32 to vector<2x16x16xf32>
    %293 = arith.mulf %291, %292 : vector<2x16x16xf32>
    %294 = vector.shape_cast %5 : vector<1x16xf32> to vector<1x1x16xf32>
    %295 = vector.broadcast %294 : vector<1x1x16xf32> to vector<2x16x16xf32>
    %296 = arith.addf %293, %295 : vector<2x16x16xf32>
    %cst_96 = arith.constant dense<0xFF800000> : vector<2x16xf32>
    %297 = vector.multi_reduction <maximumf>, %296, %cst_96 [2] : vector<2x16x16xf32> to vector<2x16xf32>
    %298 = vector.shape_cast %297 : vector<2x16xf32> to vector<2x16x1xf32>
    %299 = vector.broadcast %298 : vector<2x16x1xf32> to vector<2x16x16xf32>
    %300 = arith.subf %296, %299 : vector<2x16x16xf32>
    %301 = math.exp %300 : vector<2x16x16xf32>
    %cst_97 = arith.constant dense<0.000000e+00> : vector<2x16xf32>
    %302 = vector.multi_reduction <add>, %301, %cst_97 [2] : vector<2x16x16xf32> to vector<2x16xf32>
    %303 = vector.shape_cast %302 : vector<2x16xf32> to vector<2x16x1xf32>
    %304 = tpu.reciprocal %303 {approx = true} : vector<2x16x1xf32> -> vector<2x16x1xf32>
    %305 = vector.broadcast %304 : vector<2x16x1xf32> to vector<2x16x16xf32>
    %306 = arith.mulf %301, %305 : vector<2x16x16xf32>
    %307 = arith.truncf %306 : vector<2x16x16xf32> to vector<2x16x16xbf16>
    "tpu.trace_start"() <{level = 10 : i32, message = "bqk,bkd->bqd"}> : () -> ()
    %cst_98 = arith.constant dense<0.000000e+00> : vector<2x16x8xf32>
    %308 = tpu.matmul %307, %290, %cst_98 {dimension_numbers = #tpu.dot_dimension_numbers<[2], [1], [1], [2], [0, 0, 0, 1, 1, 2], [0], [0]>} : vector<2x16x16xbf16>, vector<2x16x8xbf16>, vector<2x16x8xf32> -> vector<2x16x8xf32>
    "tpu.trace_stop"() : () -> ()
    %309 = tpu.concatenate %236, %260, %284, %308 in 2 : vector<2x16x8xf32>, vector<2x16x8xf32>, vector<2x16x8xf32>, vector<2x16x8xf32> -> vector<2x16x32xf32>
    %310 = vector.shape_cast %309 : vector<2x16x32xf32> to vector<32x32xf32>
    %311 = arith.truncf %310 : vector<32x32xf32> to vector<32x32xbf16>
    %c1_99 = arith.constant 1 : index
    %c0_100 = arith.constant 0 : index
    %c0_101 = arith.constant 0 : index
    %312 = vector.load %arg5[%c1_99, %c0_100, %c0_101] : memref<2x32x32xbf16, #tpu.memory_space<vmem>>, vector<1x32x32xbf16>
    %313 = vector.shape_cast %312 : vector<1x32x32xbf16> to vector<32x32xbf16>
    %cst_102 = arith.constant dense<0.000000e+00> : vector<32x32xf32>
    %314 = tpu.matmul %311, %313, %cst_102 {dimension_numbers = #tpu.dot_dimension_numbers<[1], [0], [0], [1], [0, 0, 1, 1], [], []>} : vector<32x32xbf16>, vector<32x32xbf16>, vector<32x32xf32> -> vector<32x32xf32>
    %c1_103 = arith.constant 1 : index
    %c0_104 = arith.constant 0 : index
    %c0_105 = arith.constant 0 : index
    %315 = vector.load %arg6[%c1_103, %c0_104, %c0_105] : memref<2x1x32xf32, #tpu.memory_space<vmem>>, vector<1x1x32xf32>
    %316 = vector.shape_cast %315 : vector<1x1x32xf32> to vector<1x32xf32>
    %317 = vector.broadcast %316 : vector<1x32xf32> to vector<32x32xf32>
    %318 = arith.addf %314, %317 : vector<32x32xf32>
    %319 = arith.addf %198, %318 : vector<32x32xf32>
    %c1_106 = arith.constant 1 : index
    %c0_107 = arith.constant 0 : index
    %c0_108 = arith.constant 0 : index
    %320 = vector.load %arg7[%c1_106, %c0_107, %c0_108] : memref<2x1x32xf32, #tpu.memory_space<vmem>>, vector<1x1x32xf32>
    %321 = vector.shape_cast %320 : vector<1x1x32xf32> to vector<1x32xf32>
    %c1_109 = arith.constant 1 : index
    %c0_110 = arith.constant 0 : index
    %c0_111 = arith.constant 0 : index
    %322 = vector.load %arg8[%c1_109, %c0_110, %c0_111] : memref<2x1x32xf32, #tpu.memory_space<vmem>>, vector<1x1x32xf32>
    %323 = vector.shape_cast %322 : vector<1x1x32xf32> to vector<1x32xf32>
    %cst_112 = arith.constant dense<0.000000e+00> : vector<32xf32>
    %324 = vector.multi_reduction <add>, %319, %cst_112 [1] : vector<32x32xf32> to vector<32xf32>
    %325 = vector.shape_cast %324 : vector<32xf32> to vector<32x1xf32>
    %cst_113 = arith.constant 3.200000e+01 : f32
    %326 = vector.broadcast %cst_113 : f32 to vector<32x1xf32>
    %327 = arith.divf %325, %326 : vector<32x1xf32>
    %328 = vector.broadcast %327 : vector<32x1xf32> to vector<32x32xf32>
    %329 = arith.subf %319, %328 : vector<32x32xf32>
    %330 = arith.mulf %329, %329 : vector<32x32xf32>
    %cst_114 = arith.constant dense<0.000000e+00> : vector<32xf32>
    %331 = vector.multi_reduction <add>, %330, %cst_114 [1] : vector<32x32xf32> to vector<32xf32>
    %332 = vector.shape_cast %331 : vector<32xf32> to vector<32x1xf32>
    %cst_115 = arith.constant 3.200000e+01 : f32
    %333 = vector.broadcast %cst_115 : f32 to vector<32x1xf32>
    %334 = arith.divf %332, %333 : vector<32x1xf32>
    %335 = vector.broadcast %327 : vector<32x1xf32> to vector<32x32xf32>
    %336 = arith.subf %319, %335 : vector<32x32xf32>
    %cst_116 = arith.constant 9.99999974E-6 : f32
    %337 = vector.broadcast %cst_116 : f32 to vector<32x1xf32>
    %338 = arith.addf %334, %337 : vector<32x1xf32>
    %339 = math.rsqrt %338 : vector<32x1xf32>
    %340 = vector.broadcast %339 : vector<32x1xf32> to vector<32x32xf32>
    %341 = arith.mulf %336, %340 : vector<32x32xf32>
    %342 = vector.broadcast %321 : vector<1x32xf32> to vector<32x32xf32>
    %343 = arith.mulf %341, %342 : vector<32x32xf32>
    %344 = vector.broadcast %323 : vector<1x32xf32> to vector<32x32xf32>
    %345 = arith.addf %343, %344 : vector<32x32xf32>
    %346 = arith.truncf %345 : vector<32x32xf32> to vector<32x32xbf16>
    %c1_117 = arith.constant 1 : index
    %c0_118 = arith.constant 0 : index
    %c0_119 = arith.constant 0 : index
    %347 = vector.load %arg9[%c1_117, %c0_118, %c0_119] : memref<2x32x32xbf16, #tpu.memory_space<vmem>>, vector<1x32x32xbf16>
    %348 = vector.shape_cast %347 : vector<1x32x32xbf16> to vector<32x32xbf16>
    %cst_120 = arith.constant dense<0.000000e+00> : vector<32x32xf32>
    %349 = tpu.matmul %346, %348, %cst_120 {dimension_numbers = #tpu.dot_dimension_numbers<[1], [0], [0], [1], [0, 0, 1, 1], [], []>} : vector<32x32xbf16>, vector<32x32xbf16>, vector<32x32xf32> -> vector<32x32xf32>
    %c1_121 = arith.constant 1 : index
    %c0_122 = arith.constant 0 : index
    %c0_123 = arith.constant 0 : index
    %350 = vector.load %arg10[%c1_121, %c0_122, %c0_123] : memref<2x1x32xf32, #tpu.memory_space<vmem>>, vector<1x1x32xf32>
    %351 = vector.shape_cast %350 : vector<1x1x32xf32> to vector<1x32xf32>
    %352 = vector.broadcast %351 : vector<1x32xf32> to vector<32x32xf32>
    %353 = arith.addf %349, %352 : vector<32x32xf32>
    %cst_124 = arith.constant 0.000000e+00 : f32
    %354 = vector.broadcast %cst_124 : f32 to vector<32x32xf32>
    %355 = arith.maximumf %353, %354 : vector<32x32xf32>
    %356 = arith.truncf %355 : vector<32x32xf32> to vector<32x32xbf16>
    %c1_125 = arith.constant 1 : index
    %c0_126 = arith.constant 0 : index
    %c0_127 = arith.constant 0 : index
    %357 = vector.load %arg11[%c1_125, %c0_126, %c0_127] : memref<2x32x32xbf16, #tpu.memory_space<vmem>>, vector<1x32x32xbf16>
    %358 = vector.shape_cast %357 : vector<1x32x32xbf16> to vector<32x32xbf16>
    %cst_128 = arith.constant dense<0.000000e+00> : vector<32x32xf32>
    %359 = tpu.matmul %356, %358, %cst_128 {dimension_numbers = #tpu.dot_dimension_numbers<[1], [0], [0], [1], [0, 0, 1, 1], [], []>} : vector<32x32xbf16>, vector<32x32xbf16>, vector<32x32xf32> -> vector<32x32xf32>
    %c1_129 = arith.constant 1 : index
    %c0_130 = arith.constant 0 : index
    %c0_131 = arith.constant 0 : index
    %360 = vector.load %arg12[%c1_129, %c0_130, %c0_131] : memref<2x1x32xf32, #tpu.memory_space<vmem>>, vector<1x1x32xf32>
    %361 = vector.shape_cast %360 : vector<1x1x32xf32> to vector<1x32xf32>
    %362 = vector.broadcast %361 : vector<1x32xf32> to vector<32x32xf32>
    %363 = arith.addf %359, %362 : vector<32x32xf32>
    %364 = arith.addf %345, %363 : vector<32x32xf32>
    %c1_132 = arith.constant 1 : index
    %c0_133 = arith.constant 0 : index
    %c0_134 = arith.constant 0 : index
    %365 = vector.load %arg13[%c1_132, %c0_133, %c0_134] : memref<2x1x32xf32, #tpu.memory_space<vmem>>, vector<1x1x32xf32>
    %366 = vector.shape_cast %365 : vector<1x1x32xf32> to vector<1x32xf32>
    %c1_135 = arith.constant 1 : index
    %c0_136 = arith.constant 0 : index
    %c0_137 = arith.constant 0 : index
    %367 = vector.load %arg14[%c1_135, %c0_136, %c0_137] : memref<2x1x32xf32, #tpu.memory_space<vmem>>, vector<1x1x32xf32>
    %368 = vector.shape_cast %367 : vector<1x1x32xf32> to vector<1x32xf32>
    %cst_138 = arith.constant dense<0.000000e+00> : vector<32xf32>
    %369 = vector.multi_reduction <add>, %364, %cst_138 [1] : vector<32x32xf32> to vector<32xf32>
    %370 = vector.shape_cast %369 : vector<32xf32> to vector<32x1xf32>
    %cst_139 = arith.constant 3.200000e+01 : f32
    %371 = vector.broadcast %cst_139 : f32 to vector<32x1xf32>
    %372 = arith.divf %370, %371 : vector<32x1xf32>
    %373 = vector.broadcast %372 : vector<32x1xf32> to vector<32x32xf32>
    %374 = arith.subf %364, %373 : vector<32x32xf32>
    %375 = arith.mulf %374, %374 : vector<32x32xf32>
    %cst_140 = arith.constant dense<0.000000e+00> : vector<32xf32>
    %376 = vector.multi_reduction <add>, %375, %cst_140 [1] : vector<32x32xf32> to vector<32xf32>
    %377 = vector.shape_cast %376 : vector<32xf32> to vector<32x1xf32>
    %cst_141 = arith.constant 3.200000e+01 : f32
    %378 = vector.broadcast %cst_141 : f32 to vector<32x1xf32>
    %379 = arith.divf %377, %378 : vector<32x1xf32>
    %380 = vector.broadcast %372 : vector<32x1xf32> to vector<32x32xf32>
    %381 = arith.subf %364, %380 : vector<32x32xf32>
    %cst_142 = arith.constant 9.99999974E-6 : f32
    %382 = vector.broadcast %cst_142 : f32 to vector<32x1xf32>
    %383 = arith.addf %379, %382 : vector<32x1xf32>
    %384 = math.rsqrt %383 : vector<32x1xf32>
    %385 = vector.broadcast %384 : vector<32x1xf32> to vector<32x32xf32>
    %386 = arith.mulf %381, %385 : vector<32x32xf32>
    %387 = vector.broadcast %366 : vector<1x32xf32> to vector<32x32xf32>
    %388 = arith.mulf %386, %387 : vector<32x32xf32>
    %389 = vector.broadcast %368 : vector<1x32xf32> to vector<32x32xf32>
    %390 = arith.addf %388, %389 : vector<32x32xf32>
    %391 = vector.shape_cast %390 : vector<32x32xf32> to vector<2x16x32xf32>
    %392 = vector.extract_strided_slice %391 {offsets = [0, 0, 0], sizes = [2, 1, 32], strides = [1, 1, 1]} : vector<2x16x32xf32> to vector<2x1x32xf32>
    %393 = vector.shape_cast %392 : vector<2x1x32xf32> to vector<2x32xf32>
    %c0_143 = arith.constant 0 : index
    %c0_144 = arith.constant 0 : index
    %394 = vector.load %arg2[%c0_143, %c0_144] : memref<2x4xf32, #tpu.memory_space<vmem>>, vector<2x4xf32>
    %395 = arith.truncf %394 : vector<2x4xf32> to vector<2x4xbf16>
    %c0_145 = arith.constant 0 : index
    %c0_146 = arith.constant 0 : index
    %396 = vector.load %arg15[%c0_145, %c0_146] : memref<4x8xbf16, #tpu.memory_space<vmem>>, vector<4x8xbf16>
    %cst_147 = arith.constant dense<0.000000e+00> : vector<2x8xf32>
    %397 = tpu.matmul %395, %396, %cst_147 {dimension_numbers = #tpu.dot_dimension_numbers<[1], [0], [0], [1], [0, 0, 1, 1], [], []>} : vector<2x4xbf16>, vector<4x8xbf16>, vector<2x8xf32> -> vector<2x8xf32>
    %c0_148 = arith.constant 0 : index
    %c0_149 = arith.constant 0 : index
    %398 = vector.load %arg16[%c0_148, %c0_149] : memref<1x8xf32, #tpu.memory_space<vmem>>, vector<1x8xf32>
    %399 = vector.broadcast %398 : vector<1x8xf32> to vector<2x8xf32>
    %400 = arith.addf %397, %399 : vector<2x8xf32>
    %cst_150 = arith.constant 0.000000e+00 : f32
    %401 = vector.broadcast %cst_150 : f32 to vector<2x8xf32>
    %402 = arith.maximumf %400, %401 : vector<2x8xf32>
    %403 = tpu.concatenate %393, %402 in 1 : vector<2x32xf32>, vector<2x8xf32> -> vector<2x40xf32>
    %404 = arith.truncf %403 : vector<2x40xf32> to vector<2x40xbf16>
    %c0_151 = arith.constant 0 : index
    %c0_152 = arith.constant 0 : index
    %405 = vector.load %arg17[%c0_151, %c0_152] : memref<40x64xbf16, #tpu.memory_space<vmem>>, vector<40x64xbf16>
    %cst_153 = arith.constant dense<0.000000e+00> : vector<2x64xf32>
    %406 = tpu.matmul %404, %405, %cst_153 {dimension_numbers = #tpu.dot_dimension_numbers<[1], [0], [0], [1], [0, 0, 1, 1], [], []>} : vector<2x40xbf16>, vector<40x64xbf16>, vector<2x64xf32> -> vector<2x64xf32>
    %c0_154 = arith.constant 0 : index
    %c0_155 = arith.constant 0 : index
    %407 = vector.load %arg18[%c0_154, %c0_155] : memref<1x64xf32, #tpu.memory_space<vmem>>, vector<1x64xf32>
    %408 = vector.broadcast %407 : vector<1x64xf32> to vector<2x64xf32>
    %409 = arith.addf %406, %408 : vector<2x64xf32>
    %cst_156 = arith.constant 0.000000e+00 : f32
    %410 = vector.broadcast %cst_156 : f32 to vector<2x64xf32>
    %411 = arith.maximumf %409, %410 : vector<2x64xf32>
    %412 = arith.truncf %411 : vector<2x64xf32> to vector<2x64xbf16>
    %c0_157 = arith.constant 0 : index
    %c0_158 = arith.constant 0 : index
    %413 = vector.load %arg19[%c0_157, %c0_158] : memref<64x10xbf16, #tpu.memory_space<vmem>>, vector<64x10xbf16>
    %cst_159 = arith.constant dense<0.000000e+00> : vector<2x10xf32>
    %414 = tpu.matmul %412, %413, %cst_159 {dimension_numbers = #tpu.dot_dimension_numbers<[1], [0], [0], [1], [0, 0, 1, 1], [], []>} : vector<2x64xbf16>, vector<64x10xbf16>, vector<2x10xf32> -> vector<2x10xf32>
    %c0_160 = arith.constant 0 : index
    %c0_161 = arith.constant 0 : index
    %415 = vector.load %arg20[%c0_160, %c0_161] : memref<1x10xf32, #tpu.memory_space<vmem>>, vector<1x10xf32>
    %416 = vector.broadcast %415 : vector<1x10xf32> to vector<2x10xf32>
    %417 = arith.addf %414, %416 : vector<2x10xf32>
    %cst_162 = arith.constant 0.000000e+00 : f32
    %418 = vector.broadcast %cst_162 : f32 to vector<2x118xf32>
    %419 = tpu.concatenate %417, %418 in 1 : vector<2x10xf32>, vector<2x118xf32> -> vector<2x128xf32>
    %c0_163 = arith.constant 0 : index
    %c0_164 = arith.constant 0 : index
    %420 = vector.load %arg21[%c0_163, %c0_164] : memref<2x128xf32, #tpu.memory_space<vmem>>, vector<2x128xf32>
    tpu.vector_store %arg21[%c0_163, %c0_164], %419 {strides = array<i32>} : memref<2x128xf32, #tpu.memory_space<vmem>>, vector<2x128xf32>,
    return
  }
  func.func @transform_0(%arg0: i32) -> (i32, i32) {
    %c0_i32 = arith.constant 0 : i32
    %c0_i32_0 = arith.constant 0 : i32
    %c0_i32_1 = arith.constant 0 : i32
    return %c0_i32, %c0_i32_0 : i32, i32
  }
  func.func @transform_1(%arg0: i32) -> (i32, i32) {
    %c0_i32 = arith.constant 0 : i32
    %c0_i32_0 = arith.constant 0 : i32
    %c0_i32_1 = arith.constant 0 : i32
    return %c0_i32, %c0_i32_0 : i32, i32
  }
  func.func @transform_2(%arg0: i32) -> (i32, i32, i32) {
    %c0_i32 = arith.constant 0 : i32
    %c0_i32_0 = arith.constant 0 : i32
    %c0_i32_1 = arith.constant 0 : i32
    %c0_i32_2 = arith.constant 0 : i32
    return %c0_i32, %c0_i32_0, %c0_i32_1 : i32, i32, i32
  }
  func.func @transform_3(%arg0: i32) -> (i32, i32, i32) {
    %c0_i32 = arith.constant 0 : i32
    %c0_i32_0 = arith.constant 0 : i32
    %c0_i32_1 = arith.constant 0 : i32
    %c0_i32_2 = arith.constant 0 : i32
    return %c0_i32, %c0_i32_0, %c0_i32_1 : i32, i32, i32
  }
  func.func @transform_4(%arg0: i32) -> (i32, i32, i32) {
    %c0_i32 = arith.constant 0 : i32
    %c0_i32_0 = arith.constant 0 : i32
    %c0_i32_1 = arith.constant 0 : i32
    %c0_i32_2 = arith.constant 0 : i32
    return %c0_i32, %c0_i32_0, %c0_i32_1 : i32, i32, i32
  }
  func.func @transform_5(%arg0: i32) -> (i32, i32, i32) {
    %c0_i32 = arith.constant 0 : i32
    %c0_i32_0 = arith.constant 0 : i32
    %c0_i32_1 = arith.constant 0 : i32
    %c0_i32_2 = arith.constant 0 : i32
    return %c0_i32, %c0_i32_0, %c0_i32_1 : i32, i32, i32
  }
  func.func @transform_6(%arg0: i32) -> (i32, i32, i32) {
    %c0_i32 = arith.constant 0 : i32
    %c0_i32_0 = arith.constant 0 : i32
    %c0_i32_1 = arith.constant 0 : i32
    %c0_i32_2 = arith.constant 0 : i32
    return %c0_i32, %c0_i32_0, %c0_i32_1 : i32, i32, i32
  }
  func.func @transform_7(%arg0: i32) -> (i32, i32, i32) {
    %c0_i32 = arith.constant 0 : i32
    %c0_i32_0 = arith.constant 0 : i32
    %c0_i32_1 = arith.constant 0 : i32
    %c0_i32_2 = arith.constant 0 : i32
    return %c0_i32, %c0_i32_0, %c0_i32_1 : i32, i32, i32
  }
  func.func @transform_8(%arg0: i32) -> (i32, i32, i32) {
    %c0_i32 = arith.constant 0 : i32
    %c0_i32_0 = arith.constant 0 : i32
    %c0_i32_1 = arith.constant 0 : i32
    %c0_i32_2 = arith.constant 0 : i32
    return %c0_i32, %c0_i32_0, %c0_i32_1 : i32, i32, i32
  }
  func.func @transform_9(%arg0: i32) -> (i32, i32, i32) {
    %c0_i32 = arith.constant 0 : i32
    %c0_i32_0 = arith.constant 0 : i32
    %c0_i32_1 = arith.constant 0 : i32
    %c0_i32_2 = arith.constant 0 : i32
    return %c0_i32, %c0_i32_0, %c0_i32_1 : i32, i32, i32
  }
  func.func @transform_10(%arg0: i32) -> (i32, i32, i32) {
    %c0_i32 = arith.constant 0 : i32
    %c0_i32_0 = arith.constant 0 : i32
    %c0_i32_1 = arith.constant 0 : i32
    %c0_i32_2 = arith.constant 0 : i32
    return %c0_i32, %c0_i32_0, %c0_i32_1 : i32, i32, i32
  }
  func.func @transform_11(%arg0: i32) -> (i32, i32, i32) {
    %c0_i32 = arith.constant 0 : i32
    %c0_i32_0 = arith.constant 0 : i32
    %c0_i32_1 = arith.constant 0 : i32
    %c0_i32_2 = arith.constant 0 : i32
    return %c0_i32, %c0_i32_0, %c0_i32_1 : i32, i32, i32
  }
  func.func @transform_12(%arg0: i32) -> (i32, i32, i32) {
    %c0_i32 = arith.constant 0 : i32
    %c0_i32_0 = arith.constant 0 : i32
    %c0_i32_1 = arith.constant 0 : i32
    %c0_i32_2 = arith.constant 0 : i32
    return %c0_i32, %c0_i32_0, %c0_i32_1 : i32, i32, i32
  }
  func.func @transform_13(%arg0: i32) -> (i32, i32, i32) {
    %c0_i32 = arith.constant 0 : i32
    %c0_i32_0 = arith.constant 0 : i32
    %c0_i32_1 = arith.constant 0 : i32
    %c0_i32_2 = arith.constant 0 : i32
    return %c0_i32, %c0_i32_0, %c0_i32_1 : i32, i32, i32
  }
  func.func @transform_14(%arg0: i32) -> (i32, i32) {
    %c0_i32 = arith.constant 0 : i32
    %c0_i32_0 = arith.constant 0 : i32
    %c0_i32_1 = arith.constant 0 : i32
    return %c0_i32, %c0_i32_0 : i32, i32
  }
  func.func @transform_15(%arg0: i32) -> (i32, i32) {
    %c0_i32 = arith.constant 0 : i32
    %c0_i32_0 = arith.constant 0 : i32
    %c0_i32_1 = arith.constant 0 : i32
    return %c0_i32, %c0_i32_0 : i32, i32
  }
  func.func @transform_16(%arg0: i32) -> (i32, i32) {
    %c0_i32 = arith.constant 0 : i32
    %c0_i32_0 = arith.constant 0 : i32
    %c0_i32_1 = arith.constant 0 : i32
    return %c0_i32, %c0_i32_0 : i32, i32
  }
  func.func @transform_17(%arg0: i32) -> (i32, i32) {
    %c0_i32 = arith.constant 0 : i32
    %c0_i32_0 = arith.constant 0 : i32
    %c0_i32_1 = arith.constant 0 : i32
    return %c0_i32, %c0_i32_0 : i32, i32
  }
  func.func @transform_18(%arg0: i32) -> (i32, i32) {
    %c0_i32 = arith.constant 0 : i32
    %c0_i32_0 = arith.constant 0 : i32
    %c0_i32_1 = arith.constant 0 : i32
    return %c0_i32, %c0_i32_0 : i32, i32
  }
  func.func @transform_19(%arg0: i32) -> (i32, i32) {
    %c0_i32 = arith.constant 0 : i32
    %c0_i32_0 = arith.constant 0 : i32
    %c0_i32_1 = arith.constant 0 : i32
    return %c0_i32, %c0_i32_0 : i32, i32
  }
  func.func @transform_20(%arg0: i32) -> (i32, i32) {
    %c0_i32 = arith.constant 0 : i32
    %c0_i32_0 = arith.constant 0 : i32
    %c0_i32_1 = arith.constant 0 : i32
    return %c0_i32, %c0_i32_0 : i32, i32
  }
}

</mosaic_0001>

<bundles_post_ra>
// kernel: transformer_net_forward.1
= control target key start
LH: loop header
LB: loop body
LE: loop exit
PB: predicated region body
PF: predicated region fallthrough
CT: control target
= control target key end

     0   :  { %vm96_vm0 = vcmask 261120   ;;  %s2821_s24 = smov 88   ;;  %s2823_s25 = smov 120   ;;  %vm133_vm1 = vcmask 64512   ;;  %v66_v52 = vlaneseq  ;;  %v2830_v55 = vmov -1e+09   ;;  %s3780_s2 = inlined_call_operand.vmem [shape: bf16[2,32,96], index: 2, kind: input, shape index: {}]   ;;  %s3781_s0 = inlined_call_operand.vmem [shape: f32[32,32], index: 0, kind: input, shape index: {}]   ;;  %s3782_s3 = inlined_call_operand.vmem [shape: f32[2,1,96], index: 3, kind: input, shape index: {}]   ;;  %s3783_s5 = inlined_call_operand.vmem [shape: f32[2,1,32], index: 5, kind: input, shape index: {}]   ;;  %s3784_s4 = inlined_call_operand.vmem [shape: bf16[2,32,32], index: 4, kind: input, shape index: {}]   ;;  %s3785_s6 = inlined_call_operand.vmem [shape: f32[2,1,32], index: 6, kind: input, shape index: {}]   ;;  %s3786_s7 = inlined_call_operand.vmem [shape: f32[2,1,32], index: 7, kind: input, shape index: {}]   ;;  %s3787_s9 = inlined_call_operand.vmem [shape: f32[2,1,32], index: 9, kind: input, shape index: {}]   ;;  %s3788_s8 = inlined_call_operand.vmem [shape: bf16[2,32,32], index: 8, kind: input, shape index: {}]   ;;  %s3789_s11 = inlined_call_operand.vmem [shape: f32[2,1,32], index: 11, kind: input, shape index: {}]   ;;  %s3790_s10 = inlined_call_operand.vmem [shape: bf16[2,32,32], index: 10, kind: input, shape index: {}]   ;;  %s3791_s12 = inlined_call_operand.vmem [shape: f32[2,1,32], index: 12, kind: input, shape index: {}]   ;;  %s3792_s13 = inlined_call_operand.vmem [shape: f32[2,1,32], index: 13, kind: input, shape index: {}]   ;;  %s3793_s14 = inlined_call_operand.vmem [shape: bf16[4,8], index: 14, kind: input, shape index: {}]   ;;  %s3794_s1 = inlined_call_operand.vmem [shape: f32[2,4], index: 1, kind: input, shape index: {}]   ;;  %s3795_s15 = inlined_call_operand.vmem [shape: f32[1,8], index: 15, kind: input, shape index: {}]   ;;  %s3796_s17 = inlined_call_operand.vmem [shape: f32[1,64], index: 17, kind: input, shape index: {}]   ;;  %s3797_s16 = inlined_call_operand.vmem [shape: bf16[40,64], index: 16, kind: input, shape index: {}]   ;;  %s3798_s18 = inlined_call_operand.vmem [shape: bf16[64,10], index: 18, kind: input, shape index: {}]   ;;  %s3799_s19 = inlined_call_operand.vmem [shape: f32[1,10], index: 19, kind: input, shape index: {}]   ;;  %s3800_s20 = inlined_call_operand.vmem [shape: f32[2,128], index: 20, kind: output, shape index: {}]  }
   0x1   :  { %3824 = sst [smem:[#allocation2_spill]] %s3780_s2  ;;  %s3818_s27 = smov 80   ;;  %vm189_vm3 = vcmask 130048   ;;  %vm806_vm4 = vcmask 195584  }
   0x2   :  { %3825 = sst [smem:[#allocation3_spill]] %s3781_s0  ;;  %s2826_s28 = smov 104   ;;  %v67_v53 = vand.u32 127, %v66_v52 }
   0x3   :  { %3826 = sst [smem:[#allocation4_spill]] %s3782_s3  ;;  %s2822_s3 = smov 96  }
   0x4   :  { %3827 = sst [smem:[#allocation5_spill]] %s3783_s5  ;;  %s2824_s5 = smov 112   ;;  %vm68_vm2 = vcmp.lt.s32.totalorder %v67_v53, 9 }
   0x5   :  { %3828 = sst [smem:[#allocation6_spill]] %s3784_s4  ;;  %s3814_s4 = smov 72   ;;  %v3033_v56 = vsel %vm68_vm2, 0.0, %v2830_v55 }
   0x6   :  { %s3829_s23 = sld [smem:[#allocation2_spill]]  ;;  %s3810_s29 = smov 56  }
   0x7   :  { %s3830_s26 = sld [smem:[#allocation3_spill]]  ;;  %s3812_s30 = smov 64  }
   0x8   :  { %s3831_s22 = sld [smem:[#allocation4_spill]]  ;;  %s3808_s2 = smov 48  }
   0x9   :  { %s3806_s21 = smov 40   ;;  %s3816_s0 = smov 8  }
   0xc   :  { %v2545_v0 = vld [vmem:[%s3829_s23 + $0x8] sm:$0xff]  ;;  %v2544_v1 = vld [vmem:[%s3829_s23] sm:$0xff] }
   0xd   :  { %v2952_v2 = vld [vmem:[%s3830_s26] sm:$0xff]  ;;  %109 = vmatpush.bf16.msra.mxu0 %v2545_v0  ;;  %v2957_v3 = vld [vmem:[%s3830_s26 + $0x8] sm:$0xff]  ;;  %v2965_v5 = vld [vmem:[%s3830_s26 + $0x10] sm:$0xff] }
   0xe   :  { %v74_v4 = vpack.c.bf16 %v2957_v3, %v2952_v2  ;;  %v73_v6 = vld [vmem:[%s3830_s26 + $0x18] sm:$0xff]  ;;  %v2643_v9 = vld [vmem:[%s3831_s22] ss:$0 sm:$0xff] }
   0xf   :  { %v75_v7 = vpack.c.bf16 %v73_v6, %v2965_v5 }
  0x11   :  { %110 = vmatpush.bf16.msra.mxu0 %v2544_v1 }
  0x14   :  { %2389 = vmatmul.msk.bf16.vlgmr.msra.gmra.mxu0 %vm96_vm0, %v74_v4 }
  0x24   :  { %2390 = vmatmul.msk.bf16.gmra.mxu0 %vm96_vm0, %v75_v7 }
  0x91   :  { %v112_v8 = vpop.f32.mrf.mxu0 }
  0x92   :  { %v113_v10 = vadd.f32 %v2643_v9, %v112_v8 }
  0x94   :  { %v122_v12 = vpack.c.bf16 %v113_v10, %v113_v10 }
  0x96   :  { %v128_v15 = vunpack.c.l.b16 %v122_v12 }
  0x99   :  { %v114_v11 = vpop.f32.mrf.mxu0 }
  0x9a   :  { %v115_v13 = vadd.f32 %v2643_v9, %v114_v11 }
  0x9c   :  { %v123_v14 = vpack.c.bf16 %v115_v13, %v115_v13 }
  0x9e   :  { %v129_v16 = vunpack.c.l.b16 %v123_v14 }
  0xa0   :  { %v2975_v17 = vpack.c.b16 %v129_v16, %v128_v15 }
  0xa1   :  { %v117_v18 = vpop.f32.mrf.mxu0 }
  0xa2   :  { %290 = vrot.lane.b32.xlu1 %v2975_v17, %s2821_s24  ;;  %131 = vrot.lane.b32.xlu0 %v2975_v17, %s2822_s3  ;;  %v118_v19 = vadd.f32 %v2643_v9, %v117_v18 }
  0xa4   :  { %v124_v20 = vpack.c.bf16 %v118_v19, %v118_v19 }
  0xa6   :  { %v156_v23 = vunpack.c.l.b16 %v124_v20 }
  0xa9   :  { %v119_v21 = vpop.f32.mrf.mxu0 }
  0xaa   :  { %v120_v22 = vadd.f32 %v2643_v9, %v119_v21  ;;  %288 = vrot.lane.b32.xlu1 %v2975_v17, %s2823_s25 }
  0xac   :  { %v125_v24 = vpack.c.bf16 %v120_v22, %v120_v22 }
  0xae   :  { %v157_v25 = vunpack.c.l.b16 %v125_v24 }
  0xb0   :  { %v2983_v26 = vpack.c.b16 %v157_v25, %v156_v23 }
  0xb2   :  { %314 = vrot.lane.b32.xlu2 %v2983_v26, %s2821_s24  ;;  %442 = vrot.lane.b32.xlu1 %v2975_v17, %s2824_s5 }
  0xb3   :  { %159 = vrot.lane.b32.xlu0 %v2983_v26, %s2822_s3 }
  0xba   :  { %444 = vrot.lane.b32.xlu2 %v2975_v17, %s3818_s27  ;;  %466 = vrot.lane.b32.xlu1 %v2983_v26, %s2824_s5 }
  0xbb   :  { %312 = vrot.lane.b32.xlu0 %v2983_v26, %s2823_s25 }
  0xc2   :  { %468 = vrot.lane.b32.xlu2 %v2983_v26, %s3818_s27  ;;  %620 = vrot.lane.b32.xlu1 %v2983_v26, %s2826_s28  ;;  %s3835_s27 = smov 72  }
  0xc3   :  { %598 = vrot.lane.b32.xlu0 %v2975_v17, %s3814_s4 }
  0xca   :  { %596 = vrot.lane.b32.xlu2 %v2975_v17, %s2826_s28  ;;  %397 = vrot.lane.b32.xlu1 %v2975_v17, %s3810_s29 }
  0xcb   :  { %622 = vrot.lane.b32.xlu0 %v2983_v26, %s3814_s4  ;;  %s3832_s4 = sld [smem:[#allocation6_spill]] }
  0xd2   :  { %268 = vrot.lane.b32.xlu1 %v2983_v26, %s3812_s30 }
  0xd3   :  { %243 = vrot.lane.b32.xlu0 %v2975_v17, %s3812_s30  ;;  %s3833_s30 = sld [smem:[#allocation5_spill]] }
 0x10c   :  { %v315_v27 = vpop.permute.xlu2 %314 }
 0x10d   :  { %v320_v38 = vsel %vm133_vm1, %v315_v27, 0 }
 0x114   :  { %v291_v28 = vpop.permute.xlu1 %290  ;;  %v132_v29 = vpop.permute.xlu0 %131 }
 0x115   :  { %v296_v30 = vsel %vm133_vm1, %v291_v28, 0  ;;  %v138_v31 = vsel %vm133_vm1, %v132_v29, 0  ;;  %v445_v32 = vpop.permute.xlu2 %444 }
 0x116   :  { %147 = vmatpush.bf16.xpose.msra.mxu1 %v138_v31  ;;  %v450_v34 = vsel %vm133_vm1, %v445_v32, 0 }
 0x11c   :  { %v289_v33 = vpop.permute.xlu1 %288 }
 0x11d   :  { %2391 = vmatmul.msk.bf16.vlgmr.msra.gmra.mxu1 %vm133_vm1, %v2975_v17  ;;  %v469_v39 = vpop.permute.xlu2 %468 }
 0x11e   :  { %305 = vmatpush.bf16.xpose.msrb.mxu1 %v296_v30  ;;  %v474_v42 = vsel %vm133_vm1, %v469_v39, 0 }
 0x124   :  { %v443_v35 = vpop.permute.xlu1 %442 }
 0x125   :  { %v160_v36 = vpop.permute.xlu0 %159  ;;  %v597_v51 = vpop.permute.xlu2 %596 }
 0x126   :  { %459 = vmatpush.bf16.xpose.msra.mxu1 %v450_v34  ;;  %v165_v37 = vsel %vm133_vm1, %v160_v36, 0 }
 0x127   :  { %174 = vmatpush.bf16.xpose.msra.mxu2 %v165_v37 }
 0x12c   :  { %v467_v40 = vpop.permute.xlu1 %466 }
 0x12d   :  { %v313_v41 = vpop.permute.xlu0 %312  ;;  %2395 = vmatmul.msk.bf16.vlgmr.msrb.gmra.mxu1 %vm133_vm1, %v289_v33 }
 0x12e   :  { %2392 = vmatmul.msk.bf16.vlgmr.msra.gmra.mxu2 %vm133_vm1, %v2983_v26 }
 0x12f   :  { %329 = vmatpush.bf16.xpose.msrb.mxu2 %v320_v38 }
 0x134   :  { %v621_v43 = vpop.permute.xlu1 %620 }
 0x135   :  { %v599_v44 = vpop.permute.xlu0 %598 }
 0x136   :  { %v604_v45 = vsel %vm133_vm1, %v599_v44, 0 }
 0x137   :  { %483 = vmatpush.bf16.xpose.msra.mxu2 %v474_v42  ;;  %613 = vmatpush.bf16.xpose.msrb.mxu1 %v604_v45 }
 0x13c   :  { %v3025_v46 = vpop.permute.xlu1 %397 }
 0x13d   :  { %v623_v47 = vpop.permute.xlu0 %622  ;;  %2399 = vmatmul.msk.bf16.vlgmr.msra.gmra.mxu1 %vm133_vm1, %v443_v35 }
 0x13e   :  { %v628_v48 = vsel %vm133_vm1, %v623_v47, 0  ;;  %2396 = vmatmul.msk.bf16.vlgmr.msrb.gmra.mxu2 %vm133_vm1, %v313_v41 }
 0x13f   :  { %637 = vmatpush.bf16.xpose.msrb.mxu2 %v628_v48 }
 0x144   :  { %v269_v49 = vpop.permute.xlu1 %268 }
 0x145   :  { %v244_v50 = vpop.permute.xlu0 %243 }
 0x146   :  { %256 = vmatpush.bf16.msra.mxu3 %v244_v50 }
 0x14a   :  { %281 = vmatpush.bf16.msrb.mxu3 %v269_v49 }
 0x14d   :  { %2403 = vmatmul.msk.bf16.vlgmr.msrb.gmra.mxu1 %vm133_vm1, %v597_v51 }
 0x14e   :  { %2400 = vmatmul.msk.bf16.vlgmr.msra.gmra.mxu2 %vm133_vm1, %v467_v40 }
 0x15e   :  { %2404 = vmatmul.msk.bf16.vlgmr.msrb.gmra.mxu2 %vm133_vm1, %v621_v43 }
 0x19a   :  { %v149_v54 = vpop.f32.mrf.mxu1 }
 0x19b   :  { %v181_v57 = vmul.f32 0.35355338, %v149_v54 }
 0x19d   :  { %v3036_v58 = vadd.f32 %v181_v57, %v3033_v56 }
 0x19f   :  { %v190_v59 = vsel %vm189_vm3, %v3036_v58, -inf }
 0x1a0   :  { %191 = vmax.xlane.f32.xlu2 %v190_v59 }
 0x1a2   :  { %v151_v60 = vpop.f32.mrf.mxu1 }
 0x1a3   :  { %v182_v61 = vmul.f32 0.35355338, %v151_v60 }
 0x1a5   :  { %v3041_v62 = vadd.f32 %v182_v61, %v3033_v56 }
 0x1a7   :  { %v193_v63 = vsel %vm189_vm3, %v3041_v62, -inf }
 0x1a8   :  { %194 = vmax.xlane.f32.xlu0 %v193_v63 }
 0x1aa   :  { %v307_v0 = vpop.f32.mrf.mxu1 }
 0x1ab   :  { %v336_v1 = vmul.f32 0.35355338, %v307_v0 }
 0x1ad   :  { %v3046_v4 = vadd.f32 %v336_v1, %v3033_v56 }
 0x1af   :  { %v344_v6 = vsel %vm189_vm3, %v3046_v4, -inf }
 0x1b0   :  { %345 = vmax.xlane.f32.xlu2 %v344_v6 }
 0x1b1   :  { %v176_v7 = vpop.f32.mrf.mxu2 }
 0x1b2   :  { %v183_v8 = vmul.f32 0.35355338, %v176_v7  ;;  %v309_v9 = vpop.f32.mrf.mxu1 }
 0x1b3   :  { %v337_v10 = vmul.f32 0.35355338, %v309_v9 }
 0x1b4   :  { %v3051_v11 = vadd.f32 %v183_v8, %v3033_v56 }
 0x1b5   :  { %v3056_v13 = vadd.f32 %v337_v10, %v3033_v56 }
 0x1b6   :  { %v196_v12 = vsel %vm189_vm3, %v3051_v11, -inf }
 0x1b7   :  { %197 = vmax.xlane.f32.xlu1 %v196_v12  ;;  %v347_v14 = vsel %vm189_vm3, %v3056_v13, -inf }
 0x1b8   :  { %348 = vmax.xlane.f32.xlu0 %v347_v14 }
 0x1b9   :  { %v178_v15 = vpop.f32.mrf.mxu2 }
 0x1ba   :  { %v184_v16 = vmul.f32 0.35355338, %v178_v15  ;;  %v461_v18 = vpop.f32.mrf.mxu1 }
 0x1bb   :  { %v490_v19 = vmul.f32 0.35355338, %v461_v18 }
 0x1bc   :  { %v3061_v20 = vadd.f32 %v184_v16, %v3033_v56 }
 0x1bd   :  { %v3066_v22 = vadd.f32 %v490_v19, %v3033_v56 }
 0x1be   :  { %v199_v21 = vsel %vm189_vm3, %v3061_v20, -inf }
 0x1bf   :  { %200 = vmax.xlane.f32.xlu2 %v199_v21  ;;  %v498_v23 = vsel %vm189_vm3, %v3066_v22, -inf }
 0x1c0   :  { %499 = vmax.xlane.f32.xlu1 %v498_v23 }
 0x1c1   :  { %v331_v24 = vpop.f32.mrf.mxu2 }
 0x1c2   :  { %v338_v25 = vmul.f32 0.35355338, %v331_v24  ;;  %v463_v27 = vpop.f32.mrf.mxu1 }
 0x1c3   :  { %v491_v29 = vmul.f32 0.35355338, %v463_v27 }
 0x1c4   :  { %v3071_v28 = vadd.f32 %v338_v25, %v3033_v56 }
 0x1c5   :  { %v3076_v33 = vadd.f32 %v491_v29, %v3033_v56 }
 0x1c6   :  { %v350_v30 = vsel %vm189_vm3, %v3071_v28, -inf }
 0x1c7   :  { %351 = vmax.xlane.f32.xlu2 %v350_v30  ;;  %v501_v37 = vsel %vm189_vm3, %v3076_v33, -inf }
 0x1c9   :  { %v333_v31 = vpop.f32.mrf.mxu2 }
 0x1ca   :  { %v339_v32 = vmul.f32 0.35355338, %v333_v31  ;;  %v615_v34 = vpop.f32.mrf.mxu1 }
 0x1cb   :  { %v644_v35 = vmul.f32 0.35355338, %v615_v34 }
 0x1cc   :  { %v3079_v36 = vadd.f32 %v339_v32, %v3033_v56 }
 0x1cd   :  { %v3086_v39 = vadd.f32 %v644_v35, %v3033_v56 }
 0x1ce   :  { %v353_v38 = vsel %vm189_vm3, %v3079_v36, -inf }
 0x1cf   :  { %502 = vmax.xlane.f32.xlu2 %v501_v37  ;;  %354 = vmax.xlane.f32.xlu0 %v353_v38  ;;  %v652_v40 = vsel %vm189_vm3, %v3086_v39, -inf }
 0x1d0   :  { %653 = vmax.xlane.f32.xlu1 %v652_v40 }
 0x1d1   :  { %v485_v41 = vpop.f32.mrf.mxu2 }
 0x1d2   :  { %v492_v42 = vmul.f32 0.35355338, %v485_v41  ;;  %v617_v43 = vpop.f32.mrf.mxu1 }
 0x1d3   :  { %v645_v44 = vmul.f32 0.35355338, %v617_v43 }
 0x1d4   :  { %v3091_v45 = vadd.f32 %v492_v42, %v3033_v56 }
 0x1d5   :  { %v3094_v47 = vadd.f32 %v645_v44, %v3033_v56 }
 0x1d6   :  { %v504_v48 = vsel %vm189_vm3, %v3091_v45, -inf }
 0x1d7   :  { %v655_v49 = vsel %vm189_vm3, %v3094_v47, -inf }
 0x1d8   :  { %505 = vmax.xlane.f32.xlu1 %v504_v48  ;;  %656 = vmax.xlane.f32.xlu2 %v655_v49 }
 0x1d9   :  { %v487_v50 = vpop.f32.mrf.mxu2 }
 0x1da   :  { %v493_v51 = vmul.f32 0.35355338, %v487_v50 }
 0x1dc   :  { %v3101_v52 = vadd.f32 %v493_v51, %v3033_v56 }
 0x1de   :  { %v507_v53 = vsel %vm189_vm3, %v3101_v52, -inf }
 0x1e0   :  { %508 = vmax.xlane.f32.xlu2 %v507_v53 }
 0x1e1   :  { %v639_v54 = vpop.f32.mrf.mxu2 }
 0x1e2   :  { %v646_v55 = vmul.f32 0.35355338, %v639_v54 }
 0x1e4   :  { %v3106_v57 = vadd.f32 %v646_v55, %v3033_v56 }
 0x1e6   :  { %v658_v59 = vsel %vm189_vm3, %v3106_v57, -inf }
 0x1e8   :  { %659 = vmax.xlane.f32.xlu2 %v658_v59 }
 0x1e9   :  { %v641_v60 = vpop.f32.mrf.mxu2 }
 0x1ea   :  { %v647_v61 = vmul.f32 0.35355338, %v641_v60 }
 0x1ec   :  { %v3111_v63 = vadd.f32 %v647_v61, %v3033_v56 }
 0x1ee   :  { %v661_v0 = vsel %vm189_vm3, %v3111_v63, -inf }
 0x1f0   :  { %662 = vmax.xlane.f32.xlu2 %v661_v0 }
 0x213   :  { %v192_v1 = vpop.xlane.xlu2 %191 }
 0x214   :  { %v202_v6 = vsub.f32 %v3036_v58, %v192_v1 }
 0x216   :  { %v206_v7 = vmul.f32 1.442695, %v202_v6 }
 0x218   :  { %2662 = vpow2.f32 %v206_v7 }
 0x21b   :  { %v195_v8 = vpop.xlane.xlu0 %194 }
 0x21c   :  { %v203_v9 = vsub.f32 %v3041_v62, %v195_v8 }
 0x21e   :  { %v3117_v10 = vpop.eup %2662  ;;  %v208_v12 = vmul.f32 1.442695, %v203_v9 }
 0x21f   :  { %v214_v14 = vsel %vm189_vm3, %v3117_v10, 0.0 }
 0x220   :  { %2664 = vpow2.f32 %v208_v12  ;;  %215 = vadd.xlane.f32.xlu0 %v214_v14 }
 0x223   :  { %v346_v15 = vpop.xlane.xlu2 %345 }
 0x224   :  { %v356_v16 = vsub.f32 %v3046_v4, %v346_v15 }
 0x226   :  { %v3122_v18 = vpop.eup %2664  ;;  %v360_v19 = vmul.f32 1.442695, %v356_v16 }
 0x227   :  { %v217_v58 = vsel %vm189_vm3, %v3122_v18, 0.0 }
 0x228   :  { %2666 = vpow2.f32 %v360_v19  ;;  %218 = vadd.xlane.f32.xlu1 %v217_v58 }
 0x22a   :  { %v198_v62 = vpop.xlane.xlu1 %197 }
 0x22b   :  { %v204_v21 = vsub.f32 %v3051_v11, %v198_v62  ;;  %v349_v23 = vpop.xlane.xlu0 %348 }
 0x22c   :  { %v357_v25 = vsub.f32 %v3056_v13, %v349_v23 }
 0x22d   :  { %v210_v24 = vmul.f32 1.442695, %v204_v21 }
 0x22e   :  { %v3128_v27 = vpop.eup %2666  ;;  %v362_v29 = vmul.f32 1.442695, %v357_v25 }
 0x22f   :  { %2668 = vpow2.f32 %v210_v24  ;;  %v368_v4 = vsel %vm189_vm3, %v3128_v27, 0.0 }
 0x230   :  { %2670 = vpow2.f32 %v362_v29  ;;  %369 = vadd.xlane.f32.xlu0 %v368_v4 }
 0x232   :  { %v201_v30 = vpop.xlane.xlu2 %200 }
 0x233   :  { %v205_v31 = vsub.f32 %v3061_v20, %v201_v30 }
 0x235   :  { %v3133_v32 = vpop.eup %2668  ;;  %v212_v34 = vmul.f32 1.442695, %v205_v31 }
 0x236   :  { %v220_v11 = vsel %vm189_vm3, %v3133_v32, 0.0  ;;  %v3137_v35 = vpop.eup %2670 }
 0x237   :  { %2672 = vpow2.f32 %v212_v34  ;;  %221 = vadd.xlane.f32.xlu1 %v220_v11  ;;  %v371_v13 = vsel %vm189_vm3, %v3137_v35, 0.0 }
 0x238   :  { %372 = vadd.xlane.f32.xlu2 %v371_v13 }
 0x23a   :  { %v352_v37 = vpop.xlane.xlu2 %351 }
 0x23b   :  { %v358_v14 = vsub.f32 %v3071_v28, %v352_v37 }
 0x23d   :  { %v3141_v38 = vpop.eup %2672  ;;  %v364_v15 = vmul.f32 1.442695, %v358_v14 }
 0x23e   :  { %v223_v20 = vsel %vm189_vm3, %v3141_v38, 0.0 }
 0x240   :  { %224 = vadd.xlane.f32.xlu2 %v223_v20 }
 0x242   :  { %v503_v40 = vpop.xlane.xlu2 %502  ;;  %v355_v53 = vpop.xlane.xlu0 %354 }
 0x243   :  { %v511_v41 = vsub.f32 %v3076_v33, %v503_v40  ;;  %v500_v33 = vpop.xlane.xlu1 %499  ;;  %v359_v54 = vsub.f32 %v3079_v36, %v355_v53 }
 0x244   :  { %422 = vrot.lane.b32.xlu0 %v2983_v26, %s3810_s29  ;;  %v510_v7 = vsub.f32 %v3066_v22, %v500_v33 }
 0x245   :  { %v516_v42 = vmul.f32 1.442695, %v511_v41  ;;  %v366_v60 = vmul.f32 1.442695, %v359_v54 }
 0x246   :  { %v514_v12 = vmul.f32 1.442695, %v510_v7 }
 0x247   :  { %2674 = vpow2.f32 %v516_v42 }
 0x24b   :  { %v657_v43 = vpop.xlane.xlu2 %656  ;;  %v654_v61 = vpop.xlane.xlu1 %653 }
 0x24c   :  { %v665_v6 = vsub.f32 %v3094_v47, %v657_v43 }
 0x24d   :  { %v3148_v44 = vpop.eup %2674 }
 0x24e   :  { %v525_v48 = vsel %vm189_vm3, %v3148_v44, 0.0  ;;  %v670_v8 = vmul.f32 1.442695, %v665_v6 }
 0x24f   :  { %526 = vadd.xlane.f32.xlu1 %v525_v48 }
 0x253   :  { %v509_v49 = vpop.xlane.xlu2 %508  ;;  %v506_v22 = vpop.xlane.xlu1 %505 }
 0x254   :  { %v513_v50 = vsub.f32 %v3101_v52, %v509_v49  ;;  %v664_v52 = vsub.f32 %v3086_v39, %v654_v61  ;;  %v512_v58 = vsub.f32 %v3091_v45, %v506_v22 }
 0x256   :  { %v520_v51 = vmul.f32 1.442695, %v513_v50  ;;  %v668_v0 = vmul.f32 1.442695, %v664_v52  ;;  %v518_v62 = vmul.f32 1.442695, %v512_v58 }
 0x258   :  { %2676 = vpow2.f32 %v520_v51  ;;  %551 = vrot.lane.b32.xlu2 %v2975_v17, %s3808_s2 }
 0x259   :  { %2678 = vpow2.f32 %v366_v60 }
 0x25a   :  { %2680 = vpow2.f32 %v668_v0 }
 0x25b   :  { %2682 = vpow2.f32 %v670_v8  ;;  %v660_v21 = vpop.xlane.xlu2 %659 }
 0x25c   :  { %2684 = vpow2.f32 %v514_v12  ;;  %v666_v49 = vsub.f32 %v3106_v57, %v660_v21 }
 0x25d   :  { %2686 = vpow2.f32 %v364_v15 }
 0x25e   :  { %v3156_v55 = vpop.eup %2676  ;;  %2688 = vpow2.f32 %v518_v62 }
 0x25f   :  { %v531_v59 = vsel %vm189_vm3, %v3156_v55, 0.0  ;;  %v3161_v1 = vpop.eup %2678 }
 0x260   :  { %532 = vadd.xlane.f32.xlu1 %v531_v59  ;;  %v377_v36 = vsel %vm189_vm3, %v3161_v1, 0.0  ;;  %v3167_v9 = vpop.eup %2680 }
 0x261   :  { %v676_v39 = vsel %vm189_vm3, %v3167_v9, 0.0  ;;  %v3174_v47 = vpop.eup %2682 }
 0x262   :  { %v3176_v16 = vpop.eup %2684  ;;  %v679_v19 = vsel %vm189_vm3, %v3174_v47, 0.0 }
 0x263   :  { %v522_v28 = vsel %vm189_vm3, %v3176_v16, 0.0  ;;  %v663_v25 = vpop.xlane.xlu2 %662 }
 0x264   :  { %v667_v45 = vsub.f32 %v3111_v63, %v663_v25 }
 0x266   :  { %v674_v30 = vmul.f32 1.442695, %v667_v45 }
 0x26e   :  { %378 = vadd.xlane.f32.xlu0 %v377_v36 }
 0x276   :  { %677 = vadd.xlane.f32.xlu0 %v676_v39 }
 0x279   :  { %705 = vrot.lane.b32.xlu1 %v2975_v17, %s3806_s21  ;;  %v3183_v17 = vpop.eup %2686 }
 0x27a   :  { %v374_v23 = vsel %vm189_vm3, %v3183_v17, 0.0  ;;  %v3187_v24 = vpop.eup %2688 }
 0x27b   :  { %v528_v29 = vsel %vm189_vm3, %v3187_v24, 0.0 }
 0x27e   :  { %680 = vadd.xlane.f32.xlu0 %v679_v19 }
 0x281   :  { %523 = vadd.xlane.f32.xlu2 %v522_v28 }
 0x289   :  { %375 = vadd.xlane.f32.xlu2 %v374_v23 }
 0x291   :  { %529 = vadd.xlane.f32.xlu2 %v528_v29 }
 0x292   :  { %576 = vrot.lane.b32.xlu0 %v2983_v26, %s3808_s2  ;;  %s3820_s2 = smov 24  }
 0x293   :  { %v216_v4 = vpop.xlane.xlu0 %215 }
 0x294   :  { %2690 = vrcp.f32 %v216_v4 }
 0x295   :  { %2692 = vpow2.f32 %v674_v30 }
 0x29a   :  { %v2691_v34 = vpop.eup %2690 }
 0x29b   :  { %v219_v31 = vpop.xlane.xlu1 %218  ;;  %v3194_v11 = vpop.eup %2692  ;;  %v230_v13 = vmul.f32 %v2691_v34, %v3117_v10  ;;  %v672_v10 = vmul.f32 1.442695, %v666_v49 }
 0x29c   :  { %2694 = vrcp.f32 %v219_v31  ;;  %v685_v20 = vsel %vm189_vm3, %v3194_v11, 0.0 }
 0x29d   :  { %v234_v40 = vpack.c.bf16 %v230_v13, %v230_v13 }
 0x29f   :  { %v240_v42 = vunpack.c.l.b16 %v234_v40 }
 0x2a2   :  { %v2695_v37 = vpop.eup %2694 }
 0x2a3   :  { %686 = vadd.xlane.f32.xlu1 %v685_v20  ;;  %v231_v63 = vmul.f32 %v2695_v37, %v3122_v18  ;;  %v370_v33 = vpop.xlane.xlu0 %369 }
 0x2a5   :  { %v235_v41 = vpack.c.bf16 %v231_v63, %v231_v63 }
 0x2a7   :  { %v241_v43 = vunpack.c.l.b16 %v235_v41 }
 0x2a9   :  { %730 = vrot.lane.b32.xlu2 %v2983_v26, %s3806_s21  ;;  %v242_v48 = vpack.c.b16 %v241_v43, %v240_v42  ;;  %s3822_s21 = smov 16  }
 0x2aa   :  { %v222_v50 = vpop.xlane.xlu1 %221 }
 0x2ab   :  { %v373_v51 = vpop.xlane.xlu2 %372  ;;  %2393 = vmatmul.msk.bf16.vlgmr.msra.gmra.mxu3 %vm189_vm3, %v242_v48  ;;  %2696 = vrcp.f32 %v222_v50 }
 0x2ac   :  { %410 = vmatpush.bf16.msra.mxu3 %v3025_v46  ;;  %2698 = vpow2.f32 %v672_v10 }
 0x2b1   :  { %v2697_v53 = vpop.eup %2696 }
 0x2b2   :  { %v232_v59 = vmul.f32 %v2697_v53, %v3133_v32  ;;  %v3206_v26 = vpop.eup %2698 }
 0x2b3   :  { %v225_v18 = vpop.xlane.xlu2 %224  ;;  %v682_v46 = vsel %vm189_vm3, %v3206_v26, 0.0 }
 0x2b4   :  { %2700 = vrcp.f32 %v225_v18  ;;  %v236_v60 = vpack.c.bf16 %v232_v59, %v232_v59 }
 0x2b5   :  { %2702 = vrcp.f32 %v373_v51 }
 0x2b6   :  { %v423_v54 = vpop.permute.xlu0 %422  ;;  %2704 = vrcp.f32 %v370_v33  ;;  %v265_v0 = vunpack.c.l.b16 %v236_v60 }
 0x2b7   :  { %435 = vmatpush.bf16.msrb.mxu0 %v423_v54 }
 0x2ba   :  { %v2701_v57 = vpop.eup %2700 }
 0x2bb   :  { %v233_v61 = vmul.f32 %v2701_v57, %v3141_v38  ;;  %v2703_v7 = vpop.eup %2702  ;;  %v552_v8 = vpop.permute.xlu2 %551 }
 0x2bc   :  { %683 = vadd.xlane.f32.xlu0 %v682_v46  ;;  %v2705_v32 = vpop.eup %2704  ;;  %v385_v12 = vmul.f32 %v2703_v7, %v3137_v35 }
 0x2bd   :  { %v237_v52 = vpack.c.bf16 %v233_v61, %v233_v61  ;;  %v384_v38 = vmul.f32 %v2705_v32, %v3128_v27 }
 0x2be   :  { %v389_v39 = vpack.c.bf16 %v385_v12, %v385_v12 }
 0x2bf   :  { %v266_v6 = vunpack.c.l.b16 %v237_v52  ;;  %v388_v14 = vpack.c.bf16 %v384_v38, %v384_v38 }
 0x2c0   :  { %v395_v15 = vunpack.c.l.b16 %v389_v39 }
 0x2c1   :  { %v267_v36 = vpack.c.b16 %v266_v6, %v265_v0  ;;  %v394_v22 = vunpack.c.l.b16 %v388_v14 }
 0x2c2   :  { %v527_v58 = vpop.xlane.xlu1 %526 }
 0x2c3   :  { %2394 = vmatmul.msk.bf16.vlgmr.msrb.gmra.mxu3 %vm189_vm3, %v267_v36  ;;  %v396_v19 = vpack.c.b16 %v395_v15, %v394_v22  ;;  %2706 = vrcp.f32 %v527_v58 }
 0x2c4   :  { %564 = vmatpush.bf16.msrb.mxu3 %v552_v8 }
 0x2c9   :  { %v2707_v29 = vpop.eup %2706 }
 0x2ca   :  { %v539_v27 = vmul.f32 %v2707_v29, %v3148_v44 }
 0x2cc   :  { %v543_v4 = vpack.c.bf16 %v539_v27, %v539_v27 }
 0x2ce   :  { %v549_v37 = vunpack.c.l.b16 %v543_v4 }
 0x2d3   :  { %2397 = vmatmul.msk.bf16.vlgmr.msra.gmra.mxu3 %vm189_vm3, %v396_v19  ;;  %v533_v28 = vpop.xlane.xlu1 %532 }
 0x2e1   :  { %v379_v62 = vpop.xlane.xlu0 %378 }
 0x2e9   :  { %v678_v23 = vpop.xlane.xlu0 %677 }
 0x2eb   :  { %v706_v21 = vpop.permute.xlu1 %705 }
 0x2ec   :  { %718 = vmatpush.bf16.msra.mxu3 %v706_v21 }
 0x2f1   :  { %v681_v35 = vpop.xlane.xlu0 %680 }
 0x2f4   :  { %v524_v25 = vpop.xlane.xlu2 %523 }
 0x2f5   :  { %2708 = vrcp.f32 %v524_v25 }
 0x2f6   :  { %2710 = vrcp.f32 %v379_v62 }
 0x2f7   :  { %2712 = vrcp.f32 %v681_v35 }
 0x2fb   :  { %v2709_v45 = vpop.eup %2708 }
 0x2fc   :  { %v538_v30 = vmul.f32 %v2709_v45, %v3176_v16  ;;  %v376_v31 = vpop.xlane.xlu2 %375  ;;  %v2711_v34 = vpop.eup %2710 }
 0x2fd   :  { %2714 = vrcp.f32 %v376_v31  ;;  %v387_v20 = vmul.f32 %v2711_v34, %v3161_v1  ;;  %v2713_v40 = vpop.eup %2712 }
 0x2fe   :  { %v542_v13 = vpack.c.bf16 %v538_v30, %v538_v30  ;;  %2716 = vrcp.f32 %v678_v23  ;;  %v693_v50 = vmul.f32 %v2713_v40, %v3174_v47 }
 0x2ff   :  { %v391_v43 = vpack.c.bf16 %v387_v20, %v387_v20 }
 0x300   :  { %v548_v63 = vunpack.c.l.b16 %v542_v13  ;;  %v697_v18 = vpack.c.bf16 %v693_v50, %v693_v50 }
 0x301   :  { %v420_v10 = vunpack.c.l.b16 %v391_v43  ;;  %v2546_v43 = vld [vmem:[%s3832_s4] sm:$0xff] }
 0x302   :  { %v550_v41 = vpack.c.b16 %v549_v37, %v548_v63  ;;  %v703_v60 = vunpack.c.l.b16 %v697_v18 }
 0x303   :  { %v2715_v42 = vpop.eup %2714 }
 0x304   :  { %v386_v44 = vmul.f32 %v2715_v42, %v3183_v17  ;;  %v530_v48 = vpop.xlane.xlu2 %529  ;;  %2401 = vmatmul.msk.bf16.vlgmr.msrb.gmra.mxu3 %vm189_vm3, %v550_v41  ;;  %v577_v49 = vpop.permute.xlu0 %576  ;;  %v2547_v42 = vld [vmem:[%s3832_s4 + $0x8] sm:$0xff] }
 0x305   :  { %v2717_v16 = vpop.eup %2716  ;;  %2718 = vrcp.f32 %v530_v48  ;;  %589 = vmatpush.bf16.msra.mxu0 %v577_v49  ;;  %845 = vmatpush.bf16.msra.mxu1 %v2547_v42 }
 0x306   :  { %v390_v51 = vpack.c.bf16 %v386_v44, %v386_v44  ;;  %2720 = vrcp.f32 %v533_v28  ;;  %v692_v1 = vmul.f32 %v2717_v16, %v3167_v9 }
 0x308   :  { %v419_v33 = vunpack.c.l.b16 %v390_v51  ;;  %v696_v59 = vpack.c.bf16 %v692_v1, %v692_v1 }
 0x309   :  { %846 = vmatpush.bf16.msra.mxu1 %v2546_v43 }
 0x30a   :  { %v421_v53 = vpack.c.b16 %v420_v10, %v419_v33  ;;  %v702_v46 = vunpack.c.l.b16 %v696_v59 }
 0x30b   :  { %v2719_v54 = vpop.eup %2718 }
 0x30c   :  { %v731_v17 = vpop.permute.xlu2 %730  ;;  %2398 = vmatmul.msk.bf16.vlgmr.msrb.gmra.mxu0 %vm189_vm3, %v421_v53  ;;  %v2721_v57 = vpop.eup %2720  ;;  %v540_v61 = vmul.f32 %v2719_v54, %v3187_v24  ;;  %v704_v52 = vpack.c.b16 %v703_v60, %v702_v46 }
 0x30d   :  { %743 = vmatpush.bf16.msrb.mxu0 %v731_v17  ;;  %v541_v47 = vmul.f32 %v2721_v57, %v3156_v55 }
 0x30e   :  { %v544_v0 = vpack.c.bf16 %v540_v61, %v540_v61 }
 0x30f   :  { %v545_v6 = vpack.c.bf16 %v541_v47, %v541_v47 }
 0x310   :  { %v573_v9 = vunpack.c.l.b16 %v544_v0 }
 0x311   :  { %v574_v36 = vunpack.c.l.b16 %v545_v6 }
 0x313   :  { %v575_v7 = vpack.c.b16 %v574_v36, %v573_v9 }
 0x314   :  { %2405 = vmatmul.msk.bf16.vlgmr.msra.gmra.mxu3 %vm189_vm3, %v704_v52 }
 0x316   :  { %v687_v8 = vpop.xlane.xlu1 %686 }
 0x317   :  { %2722 = vrcp.f32 %v687_v8 }
 0x31c   :  { %2402 = vmatmul.msk.bf16.vlgmr.msra.gmra.mxu0 %vm189_vm3, %v575_v7 }
 0x31d   :  { %v2723_v12 = vpop.eup %2722 }
 0x31e   :  { %v695_v24 = vmul.f32 %v2723_v12, %v3194_v11 }
 0x320   :  { %v699_v39 = vpack.c.bf16 %v695_v24, %v695_v24 }
 0x322   :  { %v728_v22 = vunpack.c.l.b16 %v699_v39 }
 0x32e   :  { %v258_v38 = vpop.f32.mrf.mxu3 }
 0x32f   :  { %v684_v32 = vpop.xlane.xlu0 %683 }
 0x330   :  { %2724 = vrcp.f32 %v684_v32 }
 0x336   :  { %v2725_v55 = vpop.eup %2724  ;;  %v260_v28 = vpop.f32.mrf.mxu3 }
 0x337   :  { %v694_v14 = vmul.f32 %v2725_v55, %v3206_v26 }
 0x339   :  { %v698_v15 = vpack.c.bf16 %v694_v14, %v694_v14  ;;  %v2644_v14 = vld [vmem:[%s3833_s30] ss:$0 sm:$0xff] }
 0x33b   :  { %v727_v19 = vunpack.c.l.b16 %v698_v15 }
 0x33d   :  { %v729_v58 = vpack.c.b16 %v728_v22, %v727_v19 }
 0x33f   :  { %2406 = vmatmul.msk.bf16.vlgmr.msrb.gmra.mxu0 %vm189_vm3, %v729_v58 }
 0x346   :  { %v283_v62 = vpop.f32.mrf.mxu3 }
 0x34e   :  { %v285_v21 = vpop.f32.mrf.mxu3 }
 0x356   :  { %v412_v23 = vpop.f32.mrf.mxu3 }
 0x35e   :  { %v414_v25 = vpop.f32.mrf.mxu3 }
 0x35f   :  { %v2583_v29 = vpack.i.bf16 %v414_v25, %v412_v23 }
 0x361   :  { %2584 = vrot.lane.b32.xlu2 %v2583_v29, %s3816_s0 }
 0x387   :  { %v566_v11 = vpop.f32.mrf.mxu3 }
 0x389   :  { %v437_v27 = vpop.f32.mrf.mxu0 }
 0x38f   :  { %v568_v35 = vpop.f32.mrf.mxu3 }
 0x390   :  { %v2588_v45 = vpack.i.bf16 %v568_v35, %v566_v11 }
 0x391   :  { %v439_v26 = vpop.f32.mrf.mxu0 }
 0x392   :  { %v2598_v4 = vpack.i.bf16 %v439_v26, %v437_v27  ;;  %2589 = vrot.lane.b32.xlu0 %v2588_v45, %s3822_s21 }
 0x394   :  { %2599 = vrot.lane.b32.xlu1 %v2598_v4, %s3816_s0 }
 0x397   :  { %v720_v30 = vpop.f32.mrf.mxu3 }
 0x399   :  { %v591_v31 = vpop.f32.mrf.mxu0 }
 0x39f   :  { %v722_v34 = vpop.f32.mrf.mxu3 }
 0x3a0   :  { %v2593_v13 = vpack.i.bf16 %v722_v34, %v720_v30 }
 0x3a1   :  { %v593_v37 = vpop.f32.mrf.mxu0 }
 0x3a2   :  { %2594 = vrot.lane.b32.xlu2 %v2593_v13, %s3820_s2  ;;  %v2603_v20 = vpack.i.bf16 %v593_v37, %v591_v31 }
 0x3aa   :  { %2604 = vrot.lane.b32.xlu2 %v2603_v20, %s3822_s21 }
 0x3bb   :  { %v2585_v44 = vpop.permute.xlu2 %2584 }
 0x3bc   :  { %v745_v63 = vpop.f32.mrf.mxu0  ;;  %v2587_v48 = vunpack.i.h.bf16 %v2585_v44  ;;  %v2586_v49 = vunpack.i.l.bf16 %v2585_v44 }
 0x3be   :  { %v799_v1 = vsel %vm133_vm1, %v260_v28, %v2587_v48  ;;  %v798_v33 = vsel %vm133_vm1, %v258_v38, %v2586_v49 }
 0x3c4   :  { %v747_v40 = vpop.f32.mrf.mxu0 }
 0x3c5   :  { %v2608_v41 = vpack.i.bf16 %v747_v40, %v745_v63 }
 0x3c7   :  { %2609 = vrot.lane.b32.xlu0 %v2608_v41, %s3820_s2 }
 0x3fc   :  { %v2595_v16 = vpop.permute.xlu2 %2594 }
 0x3fd   :  { %v2597_v18 = vunpack.i.h.bf16 %v2595_v16  ;;  %v2596_v53 = vunpack.i.l.bf16 %v2595_v16 }
 0x404   :  { %v2590_v50 = vpop.permute.xlu0 %2589  ;;  %v2605_v52 = vpop.permute.xlu2 %2604 }
 0x405   :  { %v2592_v51 = vunpack.i.h.bf16 %v2590_v50  ;;  %v2591_v10 = vunpack.i.l.bf16 %v2590_v50  ;;  %v2607_v9 = vunpack.i.h.bf16 %v2605_v52  ;;  %v2606_v36 = vunpack.i.l.bf16 %v2605_v52 }
 0x406   :  { %v2600_v61 = vpop.permute.xlu1 %2599 }
 0x407   :  { %v803_v54 = vsel %vm189_vm3, %v799_v1, %v2592_v51  ;;  %v802_v59 = vsel %vm189_vm3, %v798_v33, %v2591_v10  ;;  %v2602_v47 = vunpack.i.h.bf16 %v2600_v61  ;;  %v2601_v46 = vunpack.i.l.bf16 %v2600_v61 }
 0x408   :  { %v808_v17 = vsel %vm806_vm4, %v803_v54, %v2597_v18  ;;  %v807_v57 = vsel %vm806_vm4, %v802_v59, %v2596_v53 }
 0x409   :  { %v811_v60 = vpack.c.bf16 %v808_v17, %v807_v57  ;;  %v801_v0 = vsel %vm133_vm1, %v285_v21, %v2602_v47  ;;  %v800_v6 = vsel %vm133_vm1, %v283_v62, %v2601_v46  ;;  %v2549_v57 = vld [vmem:[%s3788_s8 + $0x8] sm:$0xff]  ;;  %v2548_v46 = vld [vmem:[%s3788_s8] sm:$0xff] }
 0x40a   :  { %v804_v12 = vsel %vm189_vm3, %v800_v6, %v2606_v36  ;;  %v805_v24 = vsel %vm189_vm3, %v801_v0, %v2607_v9  ;;  %1007 = vmatpush.bf16.msra.mxu2 %v2549_v57 }
 0x40b   :  { %2415 = vmatmul.msk.bf16.vlgmr.msra.gmra.mxu1 %vm96_vm0, %v811_v60 }
 0x40e   :  { %1008 = vmatpush.bf16.msra.mxu2 %v2548_v46 }
 0x439   :  { %v2610_v7 = vpop.permute.xlu0 %2609 }
 0x43a   :  { %v2612_v8 = vunpack.i.h.bf16 %v2610_v7  ;;  %v2611_v32 = vunpack.i.l.bf16 %v2610_v7 }
 0x43c   :  { %v809_v38 = vsel %vm806_vm4, %v804_v12, %v2611_v32  ;;  %v810_v55 = vsel %vm806_vm4, %v805_v24, %v2612_v8 }
 0x43d   :  { %v812_v39 = vpack.c.bf16 %v810_v55, %v809_v38 }
 0x43f   :  { %2416 = vmatmul.msk.bf16.gmra.mxu1 %vm96_vm0, %v812_v39 }
 0x488   :  { %v848_v15 = vpop.f32.mrf.mxu1 }
 0x489   :  { %v849_v22 = vadd.f32 %v2644_v14, %v848_v15 }
 0x48b   :  { %v858_v19 = vadd.f32 %v849_v22, %v2952_v2  ;;  %v2820_v2 = vld [vmem:[%s3830_s26 + $0x18] sm:$0xff]  ;;  %v2645_v22 = vld [vmem:[%s3785_s6] ss:$0 sm:$0xff]  ;;  %s3842_s26 = smov 24  }
 0x48d   :  { %v864_v58 = vsel %vm96_vm0, %v858_v19, 0.0 }
 0x48e   :  { %865 = vadd.xlane.f32.xlu2 %v864_v58 }
 0x490   :  { %v850_v28 = vpop.f32.mrf.mxu1 }
 0x491   :  { %v851_v62 = vadd.f32 %v2644_v14, %v850_v28 }
 0x493   :  { %v859_v21 = vadd.f32 %v851_v62, %v2957_v3  ;;  %v2836_v3 = vmov 32.0   ;;  %v2646_v62 = vld [vmem:[%s3786_s7] ss:$0 sm:$0xff] }
 0x494   :  { %2726 = vrcp.f32 %v2836_v3 }
 0x495   :  { %v867_v23 = vsel %vm96_vm0, %v859_v21, 0.0 }
 0x496   :  { %868 = vadd.xlane.f32.xlu0 %v867_v23 }
 0x49a   :  { %v2727_v30 = vpop.eup %2726 }
 0x49b   :  { %v877_v31 = vmul.f32 32.0, %v2727_v30  ;;  %vm881_vm5 = vweird.f32 %v2727_v30 }
 0x49d   :  { %v878_v34 = vsub.f32 1.0, %v877_v31 }
 0x49f   :  { %v879_v13 = vmul.f32 %v2727_v30, %v878_v34 }
 0x4bc   :  { %v853_v25 = vpop.f32.mrf.mxu1 }
 0x4bd   :  { %v854_v29 = vadd.f32 %v2644_v14, %v853_v25 }
 0x4bf   :  { %v860_v11 = vadd.f32 %v854_v29, %v2965_v5  ;;  %v880_v5 = vadd.f32 %v2727_v30, %v879_v13 }
 0x4c1   :  { %v870_v27 = vsel %vm96_vm0, %v860_v11, 0.0  ;;  %v3269_v37 = vsel %vm881_vm5, %v2727_v30, %v880_v5 }
 0x4c2   :  { %871 = vadd.xlane.f32.xlu1 %v870_v27 }
 0x4c4   :  { %v855_v35 = vpop.f32.mrf.mxu1 }
 0x4c5   :  { %v856_v45 = vadd.f32 %v2644_v14, %v855_v35 }
 0x4c7   :  { %v861_v26 = vadd.f32 %v2820_v2, %v856_v45 }
 0x4c9   :  { %v873_v4 = vsel %vm96_vm0, %v861_v26, 0.0 }
 0x4ca   :  { %874 = vadd.xlane.f32.xlu2 %v873_v4 }
 0x501   :  { %v866_v20 = vpop.xlane.xlu2 %865 }
 0x502   :  { %v883_v63 = vmul.f32 %v3269_v37, %v866_v20 }
 0x504   :  { %v887_v40 = vsub.f32 %v858_v19, %v883_v63 }
 0x506   :  { %v891_v41 = vmul.f32 %v887_v40, %v887_v40 }
 0x508   :  { %v895_v42 = vsel %vm96_vm0, %v891_v41, 0.0 }
 0x509   :  { %v869_v43 = vpop.xlane.xlu0 %868  ;;  %896 = vadd.xlane.f32.xlu2 %v895_v42 }
 0x50a   :  { %v884_v44 = vmul.f32 %v3269_v37, %v869_v43 }
 0x50c   :  { %v888_v48 = vsub.f32 %v859_v21, %v884_v44 }
 0x50e   :  { %v892_v49 = vmul.f32 %v888_v48, %v888_v48 }
 0x510   :  { %v898_v16 = vsel %vm96_vm0, %v892_v49, 0.0 }
 0x511   :  { %899 = vadd.xlane.f32.xlu0 %v898_v16 }
 0x535   :  { %v872_v50 = vpop.xlane.xlu1 %871 }
 0x536   :  { %v885_v51 = vmul.f32 %v3269_v37, %v872_v50 }
 0x538   :  { %v3276_v10 = vsub.f32 %v860_v11, %v885_v51 }
 0x53a   :  { %v893_v1 = vmul.f32 %v3276_v10, %v3276_v10 }
 0x53c   :  { %v901_v33 = vsel %vm96_vm0, %v893_v1, 0.0 }
 0x53d   :  { %902 = vadd.xlane.f32.xlu1 %v901_v33  ;;  %v875_v18 = vpop.xlane.xlu2 %874 }
 0x53e   :  { %v886_v53 = vmul.f32 %v3269_v37, %v875_v18 }
 0x540   :  { %v3282_v54 = vsub.f32 %v861_v26, %v886_v53 }
 0x542   :  { %v894_v59 = vmul.f32 %v3282_v54, %v3282_v54 }
 0x544   :  { %v904_v17 = vsel %vm96_vm0, %v894_v59, 0.0  ;;  %v2551_v59 = vld [vmem:[%s3790_s10 + $0x8] sm:$0xff] }
 0x545   :  { %905 = vadd.xlane.f32.xlu2 %v904_v17  ;;  %1058 = vmatpush.bf16.msrb.mxu3 %v2551_v59 }
 0x57c   :  { %v897_v60 = vpop.xlane.xlu2 %896 }
 0x57d   :  { %v907_v61 = vmul.f32 %v897_v60, %v3269_v37 }
 0x57f   :  { %v911_v47 = vadd.f32 1e-05, %v907_v61 }
 0x581   :  { %2728 = vrsqrt.f32 %v911_v47  ;;  %vm921_vm7 = vweird.f32 %v911_v47 }
 0x584   :  { %v900_v52 = vpop.xlane.xlu0 %899 }
 0x585   :  { %v908_v0 = vmul.f32 %v900_v52, %v3269_v37 }
 0x587   :  { %v2729_v6 = vpop.eup %2728  ;;  %v912_v9 = vadd.f32 1e-05, %v908_v0 }
 0x588   :  { %v916_v36 = vmul.f32 %v2729_v6, %v911_v47  ;;  %vm922_vm6 = vweird.f32 %v2729_v6 }
 0x589   :  { %2730 = vrsqrt.f32 %v912_v9  ;;  %vm923_vm8 = vmor %vm921_vm7, %vm922_vm6  ;;  %vm931_vm10 = vweird.f32 %v912_v9 }
 0x58a   :  { %v917_v7 = vmul.f32 %v2729_v6, %v916_v36 }
 0x58c   :  { %v918_v8 = vmul.f32 0.5, %v917_v7 }
 0x58e   :  { %v919_v32 = vsub.f32 1.5, %v918_v8 }
 0x58f   :  { %v2731_v12 = vpop.eup %2730 }
 0x590   :  { %v920_v24 = vmul.f32 %v2729_v6, %v919_v32  ;;  %v926_v38 = vmul.f32 %v2731_v12, %v912_v9  ;;  %vm932_vm9 = vweird.f32 %v2731_v12 }
 0x591   :  { %vm933_vm11 = vmor %vm931_vm10, %vm932_vm9 }
 0x592   :  { %v927_v55 = vmul.f32 %v2731_v12, %v926_v38  ;;  %v924_v39 = vsel %vm923_vm8, %v2729_v6, %v920_v24 }
 0x593   :  { %v955_v19 = vmul.f32 %v924_v39, %v887_v40 }
 0x594   :  { %v928_v14 = vmul.f32 0.5, %v927_v55 }
 0x595   :  { %v962_v21 = vmul.f32 %v2645_v22, %v955_v19 }
 0x596   :  { %v929_v15 = vsub.f32 1.5, %v928_v14 }
 0x597   :  { %v3301_v29 = vadd.f32 %v2646_v62, %v962_v21 }
 0x598   :  { %v930_v58 = vmul.f32 %v2731_v12, %v929_v15 }
 0x59a   :  { %v934_v28 = vsel %vm933_vm11, %v2731_v12, %v930_v58  ;;  %v2648_v12 = vld [vmem:[%s3789_s11] ss:$0 sm:$0xff] }
 0x59b   :  { %v956_v23 = vmul.f32 %v934_v28, %v888_v48 }
 0x59d   :  { %v963_v25 = vmul.f32 %v2645_v22, %v956_v23 }
 0x59f   :  { %v3303_v11 = vadd.f32 %v2646_v62, %v963_v25 }
 0x5a1   :  { %v973_v27 = vpack.c.bf16 %v3303_v11, %v3301_v29 }
 0x5a3   :  { %2425 = vmatmul.msk.bf16.vlgmr.msra.gmra.mxu2 %vm96_vm0, %v973_v27 }
 0x5b0   :  { %v903_v35 = vpop.xlane.xlu1 %902 }
 0x5b1   :  { %v909_v45 = vmul.f32 %v903_v35, %v3269_v37 }
 0x5b3   :  { %v913_v2 = vadd.f32 1e-05, %v909_v45 }
 0x5b5   :  { %2732 = vrsqrt.f32 %v913_v2  ;;  %vm941_vm13 = vweird.f32 %v913_v2 }
 0x5b8   :  { %v906_v26 = vpop.xlane.xlu2 %905 }
 0x5b9   :  { %v910_v4 = vmul.f32 %v906_v26, %v3269_v37 }
 0x5bb   :  { %v2733_v3 = vpop.eup %2732  ;;  %v914_v30 = vadd.f32 1e-05, %v910_v4 }
 0x5bc   :  { %v936_v31 = vmul.f32 %v2733_v3, %v913_v2  ;;  %vm942_vm12 = vweird.f32 %v2733_v3 }
 0x5bd   :  { %2734 = vrsqrt.f32 %v914_v30  ;;  %vm943_vm14 = vmor %vm941_vm13, %vm942_vm12  ;;  %vm951_vm2 = vweird.f32 %v914_v30 }
 0x5be   :  { %v937_v34 = vmul.f32 %v2733_v3, %v936_v31 }
 0x5c0   :  { %v938_v13 = vmul.f32 0.5, %v937_v34 }
 0x5c2   :  { %v939_v5 = vsub.f32 1.5, %v938_v13 }
 0x5c3   :  { %v2735_v20 = vpop.eup %2734 }
 0x5c4   :  { %v940_v63 = vmul.f32 %v2733_v3, %v939_v5  ;;  %v946_v40 = vmul.f32 %v2735_v20, %v914_v30  ;;  %vm952_vm15 = vweird.f32 %v2735_v20 }
 0x5c5   :  { %vm953_vm5 = vmor %vm951_vm2, %vm952_vm15 }
 0x5c6   :  { %v947_v41 = vmul.f32 %v2735_v20, %v946_v40  ;;  %v944_v42 = vsel %vm943_vm14, %v2733_v3, %v940_v63 }
 0x5c7   :  { %v957_v48 = vmul.f32 %v944_v42, %v3276_v10  ;;  %v2550_v10 = vld [vmem:[%s3790_s10] sm:$0xff] }
 0x5c8   :  { %v948_v43 = vmul.f32 0.5, %v947_v41  ;;  %1059 = vmatpush.bf16.msrb.mxu3 %v2550_v10 }
 0x5c9   :  { %v964_v51 = vmul.f32 %v2645_v22, %v957_v48 }
 0x5ca   :  { %v949_v44 = vsub.f32 1.5, %v948_v43 }
 0x5cb   :  { %v971_v33 = vadd.f32 %v2646_v62, %v964_v51 }
 0x5cc   :  { %v950_v49 = vmul.f32 %v2735_v20, %v949_v44 }
 0x5ce   :  { %v954_v16 = vsel %vm953_vm5, %v2735_v20, %v950_v49  ;;  %v2553_v49 = vld [vmem:[%s3829_s23 + $0x18] sm:$0xff] }
 0x5cf   :  { %v958_v50 = vmul.f32 %v954_v16, %v3282_v54  ;;  %v2647_v54 = vld [vmem:[%s3787_s9] ss:$0 sm:$0xff]  ;;  %1215 = vmatpush.bf16.msra.mxu0 %v2553_v49 }
 0x5d1   :  { %v965_v1 = vmul.f32 %v2645_v22, %v958_v50 }
 0x5d3   :  { %v972_v18 = vadd.f32 %v2646_v62, %v965_v1  ;;  %v2552_v1 = vld [vmem:[%s3829_s23 + $0x10] sm:$0xff]  ;;  %s3841_s23 = smov 16  }
 0x5d4   :  { %1216 = vmatpush.bf16.msra.mxu0 %v2552_v1 }
 0x5d5   :  { %v974_v53 = vpack.c.bf16 %v972_v18, %v971_v33 }
 0x5d7   :  { %2426 = vmatmul.msk.bf16.gmra.mxu2 %vm96_vm0, %v974_v53 }
 0x626   :  { %v1010_v17 = vpop.f32.mrf.mxu2 }
 0x627   :  { %v1011_v57 = vadd.f32 %v2647_v54, %v1010_v17 }
 0x629   :  { %v1020_v47 = vmax.f32 %v1011_v57, 0.0 }
 0x62e   :  { %v1012_v60 = vpop.f32.mrf.mxu2 }
 0x62f   :  { %v1013_v61 = vadd.f32 %v2647_v54, %v1012_v60 }
 0x631   :  { %v1021_v46 = vmax.f32 %v1013_v61, 0.0 }
 0x633   :  { %v1024_v52 = vpack.c.bf16 %v1021_v46, %v1020_v47 }
 0x635   :  { %2435 = vmatmul.msk.bf16.vlgmr.msrb.gmra.mxu3 %vm96_vm0, %v1024_v52 }
 0x65a   :  { %v1015_v0 = vpop.f32.mrf.mxu2 }
 0x65b   :  { %v1016_v6 = vadd.f32 %v2647_v54, %v1015_v0 }
 0x65d   :  { %v1022_v7 = vmax.f32 %v1016_v6, 0.0 }
 0x662   :  { %v1017_v9 = vpop.f32.mrf.mxu2 }
 0x663   :  { %v1018_v36 = vadd.f32 %v2647_v54, %v1017_v9  ;;  %v2649_v9 = vld [vmem:[%s3791_s12] ss:$0 sm:$0xff] }
 0x665   :  { %v1023_v8 = vmax.f32 %v1018_v36, 0.0 }
 0x667   :  { %v1025_v32 = vpack.c.bf16 %v1023_v8, %v1022_v7 }
 0x669   :  { %2436 = vmatmul.msk.bf16.gmra.mxu3 %vm96_vm0, %v1025_v32  ;;  %v2650_v32 = vld [vmem:[%s3792_s13] ss:$0 sm:$0xff] }
 0x6b8   :  { %v1061_v24 = vpop.f32.mrf.mxu3 }
 0x6b9   :  { %v1062_v38 = vadd.f32 %v2648_v12, %v1061_v24 }
 0x6bb   :  { %v1071_v55 = vadd.f32 %v1062_v38, %v3301_v29 }
 0x6bd   :  { %v1077_v39 = vsel %vm96_vm0, %v1071_v55, 0.0 }
 0x6be   :  { %1078 = vadd.xlane.f32.xlu0 %v1077_v39 }
 0x6c0   :  { %v1063_v14 = vpop.f32.mrf.mxu3 }
 0x6c1   :  { %v1064_v15 = vadd.f32 %v2648_v12, %v1063_v14 }
 0x6c3   :  { %v1072_v22 = vadd.f32 %v1064_v15, %v3303_v11 }
 0x6c5   :  { %v1080_v19 = vsel %vm96_vm0, %v1072_v22, 0.0 }
 0x6c6   :  { %1081 = vadd.xlane.f32.xlu1 %v1080_v19 }
 0x6ec   :  { %v1066_v58 = vpop.f32.mrf.mxu3 }
 0x6ed   :  { %v1067_v28 = vadd.f32 %v2648_v12, %v1066_v58 }
 0x6ef   :  { %v1073_v62 = vadd.f32 %v1067_v28, %v971_v33 }
 0x6f1   :  { %v1083_v21 = vsel %vm96_vm0, %v1073_v62, 0.0 }
 0x6f2   :  { %1084 = vadd.xlane.f32.xlu2 %v1083_v21 }
 0x6f4   :  { %v1068_v23 = vpop.f32.mrf.mxu3 }
 0x6f5   :  { %v1069_v25 = vadd.f32 %v2648_v12, %v1068_v23 }
 0x6f7   :  { %v1074_v27 = vadd.f32 %v1069_v25, %v972_v18 }
 0x6f9   :  { %v1086_v29 = vsel %vm96_vm0, %v1074_v27, 0.0 }
 0x6fa   :  { %1087 = vadd.xlane.f32.xlu0 %v1086_v29 }
 0x731   :  { %v1079_v35 = vpop.xlane.xlu0 %1078 }
 0x732   :  { %v1089_v45 = vmul.f32 %v1079_v35, %v3269_v37 }
 0x734   :  { %v1093_v2 = vsub.f32 %v1071_v55, %v1089_v45 }
 0x736   :  { %v1097_v11 = vmul.f32 %v1093_v2, %v1093_v2 }
 0x738   :  { %v1101_v26 = vsel %vm96_vm0, %v1097_v11, 0.0 }
 0x739   :  { %v1082_v4 = vpop.xlane.xlu1 %1081  ;;  %1102 = vadd.xlane.f32.xlu1 %v1101_v26 }
 0x73a   :  { %v1090_v3 = vmul.f32 %v1082_v4, %v3269_v37 }
 0x73c   :  { %v1094_v30 = vsub.f32 %v1072_v22, %v1090_v3 }
 0x73e   :  { %v1098_v31 = vmul.f32 %v1094_v30, %v1094_v30 }
 0x740   :  { %v1104_v34 = vsel %vm96_vm0, %v1098_v31, 0.0 }
 0x741   :  { %1105 = vadd.xlane.f32.xlu2 %v1104_v34 }
 0x765   :  { %v1085_v13 = vpop.xlane.xlu2 %1084 }
 0x766   :  { %v1091_v5 = vmul.f32 %v1085_v13, %v3269_v37 }
 0x768   :  { %v3338_v20 = vsub.f32 %v1073_v62, %v1091_v5 }
 0x76a   :  { %v1099_v63 = vmul.f32 %v3338_v20, %v3338_v20 }
 0x76c   :  { %v1107_v40 = vsel %vm96_vm0, %v1099_v63, 0.0 }
 0x76d   :  { %v1088_v41 = vpop.xlane.xlu0 %1087  ;;  %1108 = vadd.xlane.f32.xlu0 %v1107_v40 }
 0x76e   :  { %v1092_v42 = vmul.f32 %v1088_v41, %v3269_v37 }
 0x770   :  { %v3344_v43 = vsub.f32 %v1074_v27, %v1092_v42 }
 0x772   :  { %v1100_v44 = vmul.f32 %v3344_v43, %v3344_v43 }
 0x774   :  { %v1110_v48 = vsel %vm96_vm0, %v1100_v44, 0.0 }
 0x775   :  { %1111 = vadd.xlane.f32.xlu1 %v1110_v48 }
 0x7ac   :  { %v1103_v16 = vpop.xlane.xlu1 %1102 }
 0x7ad   :  { %v1113_v50 = vmul.f32 %v1103_v16, %v3269_v37 }
 0x7af   :  { %v1117_v51 = vadd.f32 1e-05, %v1113_v50 }
 0x7b1   :  { %2736 = vrsqrt.f32 %v1117_v51  ;;  %vm1127_vm7 = vweird.f32 %v1117_v51 }
 0x7b4   :  { %v1106_v33 = vpop.xlane.xlu2 %1105 }
 0x7b5   :  { %v1114_v18 = vmul.f32 %v1106_v33, %v3269_v37 }
 0x7b7   :  { %v2737_v53 = vpop.eup %2736  ;;  %v1118_v59 = vadd.f32 1e-05, %v1114_v18 }
 0x7b8   :  { %v1122_v10 = vmul.f32 %v2737_v53, %v1117_v51  ;;  %vm1128_vm6 = vweird.f32 %v2737_v53 }
 0x7b9   :  { %2738 = vrsqrt.f32 %v1118_v59  ;;  %vm1129_vm8 = vmor %vm1127_vm7, %vm1128_vm6  ;;  %vm1137_vm10 = vweird.f32 %v1118_v59 }
 0x7ba   :  { %v1123_v17 = vmul.f32 %v2737_v53, %v1122_v10 }
 0x7bc   :  { %v1124_v54 = vmul.f32 0.5, %v1123_v17 }
 0x7be   :  { %v1125_v57 = vsub.f32 1.5, %v1124_v54 }
 0x7bf   :  { %v2739_v60 = vpop.eup %2738 }
 0x7c0   :  { %v1126_v61 = vmul.f32 %v2737_v53, %v1125_v57  ;;  %v1132_v47 = vmul.f32 %v2739_v60, %v1118_v59  ;;  %vm1138_vm9 = vweird.f32 %v2739_v60 }
 0x7c1   :  { %vm1139_vm11 = vmor %vm1137_vm10, %vm1138_vm9 }
 0x7c2   :  { %v1133_v46 = vmul.f32 %v2739_v60, %v1132_v47  ;;  %v1130_v52 = vsel %vm1129_vm8, %v2737_v53, %v1126_v61 }
 0x7c3   :  { %v1161_v36 = vmul.f32 %v1130_v52, %v1093_v2 }
 0x7c4   :  { %v1134_v0 = vmul.f32 0.5, %v1133_v46 }
 0x7c5   :  { %v1168_v12 = vmul.f32 %v2649_v9, %v1161_v36 }
 0x7c6   :  { %v1135_v6 = vsub.f32 1.5, %v1134_v0 }
 0x7c7   :  { %v3363_v55 = vadd.f32 %v2650_v32, %v1168_v12 }
 0x7c8   :  { %v1136_v7 = vmul.f32 %v2739_v60, %v1135_v6 }
 0x7ca   :  { %v1140_v8 = vsel %vm1139_vm11, %v2739_v60, %v1136_v7 }
 0x7cb   :  { %v1162_v24 = vmul.f32 %v1140_v8, %v1094_v30 }
 0x7cd   :  { %v1169_v38 = vmul.f32 %v2649_v9, %v1162_v24 }
 0x7cf   :  { %v3365_v39 = vadd.f32 %v2650_v32, %v1169_v38 }
 0x7d1   :  { %v1179_v14 = vpack.c.bf16 %v3365_v39, %v3363_v55 }
 0x7d3   :  { %2450 = vmatmul.msk.bf16.vlgmr.msra.gmra.mxu0 %vm96_vm0, %v1179_v14 }
 0x7e0   :  { %v1109_v15 = vpop.xlane.xlu0 %1108 }
 0x7e1   :  { %v1115_v22 = vmul.f32 %v1109_v15, %v3269_v37 }
 0x7e3   :  { %v1119_v19 = vadd.f32 1e-05, %v1115_v22 }
 0x7e5   :  { %2740 = vrsqrt.f32 %v1119_v19  ;;  %vm1147_vm13 = vweird.f32 %v1119_v19 }
 0x7e8   :  { %v1112_v58 = vpop.xlane.xlu1 %1111 }
 0x7e9   :  { %v1116_v28 = vmul.f32 %v1112_v58, %v3269_v37 }
 0x7eb   :  { %v2741_v62 = vpop.eup %2740  ;;  %v1120_v21 = vadd.f32 1e-05, %v1116_v28 }
 0x7ec   :  { %v1142_v23 = vmul.f32 %v2741_v62, %v1119_v19  ;;  %vm1148_vm12 = vweird.f32 %v2741_v62 }
 0x7ed   :  { %2742 = vrsqrt.f32 %v1120_v21  ;;  %vm1149_vm14 = vmor %vm1147_vm13, %vm1148_vm12  ;;  %vm1157_vm2 = vweird.f32 %v1120_v21 }
 0x7ee   :  { %v1143_v25 = vmul.f32 %v2741_v62, %v1142_v23 }
 0x7f0   :  { %v1144_v27 = vmul.f32 0.5, %v1143_v25 }
 0x7f2   :  { %v1145_v29 = vsub.f32 1.5, %v1144_v27 }
 0x7f3   :  { %v2743_v35 = vpop.eup %2742 }
 0x7f4   :  { %v1146_v45 = vmul.f32 %v2741_v62, %v1145_v29  ;;  %v1152_v2 = vmul.f32 %v2743_v35, %v1120_v21  ;;  %vm1158_vm15 = vweird.f32 %v2743_v35 }
 0x7f5   :  { %vm1159_vm5 = vmor %vm1157_vm2, %vm1158_vm15  ;;  %vm2244_vm15 = vcmask 1041408   ;;  %vm2240_vm2 = vcmask 31744  }
 0x7f6   :  { %v1153_v11 = vmul.f32 %v2743_v35, %v1152_v2  ;;  %v1150_v26 = vsel %vm1149_vm14, %v2741_v62, %v1146_v45 }
 0x7f7   :  { %v1163_v30 = vmul.f32 %v1150_v26, %v3338_v20  ;;  %v2651_v20 = vld [vmem:[%s3831_s22 + $0x1] ss:$0 sm:$0xff]  ;;  %s3834_s22 = smov 80  }
 0x7f8   :  { %v1154_v4 = vmul.f32 0.5, %v1153_v11 }
 0x7f9   :  { %v1170_v5 = vmul.f32 %v2649_v9, %v1163_v30 }
 0x7fa   :  { %v1155_v3 = vsub.f32 1.5, %v1154_v4 }
 0x7fb   :  { %v3374_v40 = vadd.f32 %v2650_v32, %v1170_v5 }
 0x7fc   :  { %v1156_v31 = vmul.f32 %v2743_v35, %v1155_v3 }
 0x7fe   :  { %v1160_v34 = vsel %vm1159_vm5, %v2743_v35, %v1156_v31  ;;  %vm2302_vm5 = vcmask 1043456  }
 0x7ff   :  { %v1164_v13 = vmul.f32 %v1160_v34, %v3344_v43 }
 0x801   :  { %v1171_v63 = vmul.f32 %v2649_v9, %v1164_v13 }
 0x803   :  { %v3376_v41 = vadd.f32 %v2650_v32, %v1171_v63 }
 0x805   :  { %v1180_v42 = vpack.c.bf16 %v3376_v41, %v3374_v40 }
 0x807   :  { %2451 = vmatmul.msk.bf16.gmra.mxu0 %vm96_vm0, %v1180_v42 }
 0x850   :  { %v1218_v44 = vpop.f32.mrf.mxu0 }
 0x851   :  { %v1219_v48 = vadd.f32 %v2651_v20, %v1218_v44 }
 0x853   :  { %v1228_v16 = vpack.c.bf16 %v1219_v48, %v1219_v48 }
 0x855   :  { %v1234_v51 = vunpack.c.l.b16 %v1228_v16 }
 0x858   :  { %v1220_v49 = vpop.f32.mrf.mxu0 }
 0x859   :  { %v1221_v43 = vadd.f32 %v2651_v20, %v1220_v49 }
 0x85b   :  { %v1229_v50 = vpack.c.bf16 %v1221_v43, %v1221_v43 }
 0x85d   :  { %v1235_v1 = vunpack.c.l.b16 %v1229_v50 }
 0x85f   :  { %v3384_v33 = vpack.c.b16 %v1235_v1, %v1234_v51 }
 0x861   :  { %1394 = vrot.lane.b32.xlu1 %v3384_v33, %s2821_s24  ;;  %1237 = vrot.lane.b32.xlu2 %v3384_v33, %s2822_s3 }
 0x869   :  { %1546 = vrot.lane.b32.xlu1 %v3384_v33, %s2824_s5 }
 0x884   :  { %v1223_v18 = vpop.f32.mrf.mxu0 }
 0x885   :  { %v1224_v53 = vadd.f32 %v2651_v20, %v1223_v18 }
 0x887   :  { %v1230_v10 = vpack.c.bf16 %v1224_v53, %v1224_v53 }
 0x889   :  { %v1261_v57 = vunpack.c.l.b16 %v1230_v10 }
 0x88c   :  { %v1225_v59 = vpop.f32.mrf.mxu0 }
 0x88d   :  { %v1226_v17 = vadd.f32 %v2651_v20, %v1225_v59 }
 0x88f   :  { %v1231_v54 = vpack.c.bf16 %v1226_v17, %v1226_v17 }
 0x891   :  { %v1262_v60 = vunpack.c.l.b16 %v1231_v54 }
 0x893   :  { %v3392_v61 = vpack.c.b16 %v1262_v60, %v1261_v57 }
 0x895   :  { %1264 = vrot.lane.b32.xlu0 %v3392_v61, %s2822_s3  ;;  %1570 = vrot.lane.b32.xlu1 %v3392_v61, %s2824_s5  ;;  %s3837_s3 = smov 56   ;;  %s3839_s5 = smov 40  }
 0x896   :  { %1418 = vrot.lane.b32.xlu2 %v3392_v61, %s2821_s24  ;;  %s3836_s24 = smov 64  }
 0x89d   :  { %1392 = vrot.lane.b32.xlu0 %v3384_v33, %s2823_s25  ;;  %1724 = vrot.lane.b32.xlu1 %v3392_v61, %s2826_s28 }
 0x89e   :  { %1416 = vrot.lane.b32.xlu2 %v3392_v61, %s2823_s25  ;;  %s3838_s25 = smov 48  }
 0x8a5   :  { %1548 = vrot.lane.b32.xlu0 %v3384_v33, %s3834_s22 }
 0x8a6   :  { %1702 = vrot.lane.b32.xlu2 %v3384_v33, %s3835_s27 }
 0x8ad   :  { %1572 = vrot.lane.b32.xlu0 %v3392_v61, %s3834_s22 }
 0x8ae   :  { %1726 = vrot.lane.b32.xlu2 %v3392_v61, %s3835_s27 }
 0x8b5   :  { %1700 = vrot.lane.b32.xlu0 %v3384_v33, %s2826_s28  ;;  %s3840_s28 = smov 8  }
 0x8b6   :  { %1347 = vrot.lane.b32.xlu2 %v3384_v33, %s3836_s24 }
 0x8bb   :  { %v1238_v47 = vpop.permute.xlu2 %1237 }
 0x8bc   :  { %v1243_v46 = vsel %vm133_vm1, %v1238_v47, 0 }
 0x8bd   :  { %1252 = vmatpush.bf16.xpose.msrb.mxu1 %v1243_v46 }
 0x8be   :  { %1501 = vrot.lane.b32.xlu2 %v3384_v33, %s3837_s3 }
 0x8c4   :  { %2452 = vmatmul.msk.bf16.vlgmr.msrb.gmra.mxu1 %vm133_vm1, %v3384_v33 }
 0x8c6   :  { %1372 = vrot.lane.b32.xlu2 %v3392_v61, %s3836_s24 }
 0x8d3   :  { %v1395_v52 = vpop.permute.xlu1 %1394 }
 0x8d4   :  { %v1400_v0 = vsel %vm133_vm1, %v1395_v52, 0 }
 0x8d5   :  { %1409 = vmatpush.bf16.xpose.msra.mxu1 %v1400_v0 }
 0x8db   :  { %v1547_v58 = vpop.permute.xlu1 %1546 }
 0x8f0   :  { %v1419_v6 = vpop.permute.xlu2 %1418 }
 0x8f1   :  { %v1424_v12 = vsel %vm133_vm1, %v1419_v6, 0 }
 0x8f8   :  { %v1417_v9 = vpop.permute.xlu2 %1416 }
 0x900   :  { %v1703_v36 = vpop.permute.xlu2 %1702 }
 0x901   :  { %v1708_v19 = vsel %vm133_vm1, %v1703_v36, 0 }
 0x907   :  { %v1265_v7 = vpop.permute.xlu0 %1264  ;;  %v1571_v25 = vpop.permute.xlu1 %1570 }
 0x908   :  { %v1270_v8 = vsel %vm133_vm1, %v1265_v7, 0  ;;  %v1727_v32 = vpop.permute.xlu2 %1726 }
 0x909   :  { %1279 = vmatpush.bf16.xpose.msrb.mxu2 %v1270_v8  ;;  %v1732_v23 = vsel %vm133_vm1, %v1727_v32, 0 }
 0x90f   :  { %v1393_v24 = vpop.permute.xlu0 %1392  ;;  %v1725_v29 = vpop.permute.xlu1 %1724 }
 0x910   :  { %v1348_v38 = vpop.permute.xlu2 %1347  ;;  %2453 = vmatmul.msk.bf16.vlgmr.msrb.gmra.mxu2 %vm133_vm1, %v3392_v61  ;;  %2456 = vmatmul.msk.bf16.vlgmr.msra.gmra.mxu1 %vm133_vm1, %v1393_v24 }
 0x911   :  { %1433 = vmatpush.bf16.xpose.msra.mxu2 %v1424_v12  ;;  %1360 = vmatpush.bf16.msra.mxu3 %v1348_v38 }
 0x917   :  { %v1549_v14 = vpop.permute.xlu0 %1548 }
 0x918   :  { %v1554_v15 = vsel %vm133_vm1, %v1549_v14, 0  ;;  %v1502_v22 = vpop.permute.xlu2 %1501 }
 0x919   :  { %1514 = vmatpush.bf16.msrb.mxu3 %v1502_v22  ;;  %1563 = vmatpush.bf16.xpose.msrb.mxu1 %v1554_v15 }
 0x91f   :  { %v1573_v28 = vpop.permute.xlu0 %1572 }
 0x920   :  { %v1578_v62 = vsel %vm133_vm1, %v1573_v28, 0  ;;  %v1373_v21 = vpop.permute.xlu2 %1372  ;;  %2457 = vmatmul.msk.bf16.vlgmr.msra.gmra.mxu2 %vm133_vm1, %v1417_v9  ;;  %2460 = vmatmul.msk.bf16.vlgmr.msrb.gmra.mxu1 %vm133_vm1, %v1547_v58 }
 0x921   :  { %1717 = vmatpush.bf16.xpose.msra.mxu1 %v1708_v19  ;;  %1385 = vmatpush.bf16.msrb.mxu0 %v1373_v21 }
 0x922   :  { %1587 = vmatpush.bf16.xpose.msrb.mxu2 %v1578_v62 }
 0x927   :  { %v1701_v27 = vpop.permute.xlu0 %1700 }
 0x92a   :  { %1741 = vmatpush.bf16.xpose.msra.mxu2 %v1732_v23 }
 0x930   :  { %2461 = vmatmul.msk.bf16.vlgmr.msrb.gmra.mxu2 %vm133_vm1, %v1571_v25  ;;  %2464 = vmatmul.msk.bf16.vlgmr.msra.gmra.mxu1 %vm133_vm1, %v1701_v27 }
 0x940   :  { %2465 = vmatmul.msk.bf16.vlgmr.msra.gmra.mxu2 %vm133_vm1, %v1725_v29 }
 0x941   :  { %v1254_v35 = vpop.f32.mrf.mxu1 }
 0x942   :  { %v1286_v45 = vmul.f32 0.35355338, %v1254_v35 }
 0x944   :  { %v3441_v2 = vadd.f32 %v1286_v45, %v3033_v56 }
 0x946   :  { %v1294_v11 = vsel %vm189_vm3, %v3441_v2, -inf }
 0x947   :  { %1295 = vmax.xlane.f32.xlu0 %v1294_v11 }
 0x949   :  { %v1256_v26 = vpop.f32.mrf.mxu1 }
 0x94a   :  { %v1287_v4 = vmul.f32 0.35355338, %v1256_v26 }
 0x94c   :  { %v3446_v3 = vadd.f32 %v1287_v4, %v3033_v56 }
 0x94e   :  { %v1297_v30 = vsel %vm189_vm3, %v3446_v3, -inf }
 0x94f   :  { %1298 = vmax.xlane.f32.xlu2 %v1297_v30 }
 0x98d   :  { %v1411_v31 = vpop.f32.mrf.mxu1 }
 0x98e   :  { %v1440_v34 = vmul.f32 0.35355338, %v1411_v31 }
 0x990   :  { %v3451_v13 = vadd.f32 %v1440_v34, %v3033_v56 }
 0x992   :  { %v1448_v5 = vsel %vm189_vm3, %v3451_v13, -inf }
 0x993   :  { %v1281_v63 = vpop.f32.mrf.mxu2  ;;  %1449 = vmax.xlane.f32.xlu1 %v1448_v5 }
 0x994   :  { %v1288_v42 = vmul.f32 0.35355338, %v1281_v63 }
 0x995   :  { %v1413_v44 = vpop.f32.mrf.mxu1 }
 0x996   :  { %v1441_v20 = vmul.f32 0.35355338, %v1413_v44  ;;  %v3456_v48 = vadd.f32 %v1288_v42, %v3033_v56 }
 0x998   :  { %v1300_v49 = vsel %vm189_vm3, %v3456_v48, -inf  ;;  %v3461_v16 = vadd.f32 %v1441_v20, %v3033_v56 }
 0x999   :  { %1301 = vmax.xlane.f32.xlu2 %v1300_v49 }
 0x99a   :  { %v1451_v43 = vsel %vm189_vm3, %v3461_v16, -inf }
 0x99b   :  { %v1283_v50 = vpop.f32.mrf.mxu2  ;;  %1452 = vmax.xlane.f32.xlu0 %v1451_v43 }
 0x99c   :  { %v1289_v51 = vmul.f32 0.35355338, %v1283_v50 }
 0x99d   :  { %v1565_v1 = vpop.f32.mrf.mxu1 }
 0x99e   :  { %v1594_v18 = vmul.f32 0.35355338, %v1565_v1  ;;  %v3466_v53 = vadd.f32 %v1289_v51, %v3033_v56 }
 0x9a0   :  { %v1303_v59 = vsel %vm189_vm3, %v3466_v53, -inf  ;;  %v3471_v10 = vadd.f32 %v1594_v18, %v3033_v56 }
 0x9a1   :  { %1304 = vmax.xlane.f32.xlu1 %v1303_v59 }
 0x9a2   :  { %v1602_v17 = vsel %vm189_vm3, %v3471_v10, -inf }
 0x9a3   :  { %1603 = vmax.xlane.f32.xlu0 %v1602_v17  ;;  %v1435_v54 = vpop.f32.mrf.mxu2 }
 0x9a4   :  { %v1442_v57 = vmul.f32 0.35355338, %v1435_v54 }
 0x9a5   :  { %v1567_v60 = vpop.f32.mrf.mxu1 }
 0x9a6   :  { %v1595_v47 = vmul.f32 0.35355338, %v1567_v60  ;;  %v3476_v46 = vadd.f32 %v1442_v57, %v3033_v56 }
 0x9a8   :  { %v1454_v52 = vsel %vm189_vm3, %v3476_v46, -inf  ;;  %v3481_v0 = vadd.f32 %v1595_v47, %v3033_v56 }
 0x9a9   :  { %1455 = vmax.xlane.f32.xlu1 %v1454_v52 }
 0x9aa   :  { %v1605_v6 = vsel %vm189_vm3, %v3481_v0, -inf }
 0x9ab   :  { %1606 = vmax.xlane.f32.xlu2 %v1605_v6  ;;  %v1437_v9 = vpop.f32.mrf.mxu2 }
 0x9ac   :  { %v1443_v36 = vmul.f32 0.35355338, %v1437_v9 }
 0x9ad   :  { %v1719_v7 = vpop.f32.mrf.mxu1 }
 0x9ae   :  { %v3486_v8 = vadd.f32 %v1443_v36, %v3033_v56  ;;  %v1748_v44 = vmul.f32 0.35355338, %v1719_v7 }
 0x9b0   :  { %v1457_v32 = vsel %vm189_vm3, %v3486_v8, -inf  ;;  %v3524_v49 = vadd.f32 %v1748_v44, %v3033_v56 }
 0x9b1   :  { %1458 = vmax.xlane.f32.xlu0 %v1457_v32 }
 0x9b2   :  { %v1756_v43 = vsel %vm189_vm3, %v3524_v49, -inf }
 0x9b3   :  { %v1589_v12 = vpop.f32.mrf.mxu2 }
 0x9b4   :  { %v1596_v24 = vmul.f32 0.35355338, %v1589_v12 }
 0x9b5   :  { %v1721_v38 = vpop.f32.mrf.mxu1 }
 0x9b6   :  { %v3491_v14 = vadd.f32 %v1596_v24, %v3033_v56  ;;  %v1749_v15 = vmul.f32 0.35355338, %v1721_v38 }
 0x9b8   :  { %v1608_v22 = vsel %vm189_vm3, %v3491_v14, -inf  ;;  %v3496_v28 = vadd.f32 %v1749_v15, %v3033_v56 }
 0x9b9   :  { %1609 = vmax.xlane.f32.xlu1 %v1608_v22 }
 0x9ba   :  { %v1759_v23 = vsel %vm189_vm3, %v3496_v28, -inf  ;;  %v1296_v27 = vpop.xlane.xlu0 %1295 }
 0x9bb   :  { %v1591_v19 = vpop.f32.mrf.mxu2  ;;  %v1306_v45 = vsub.f32 %v3441_v2, %v1296_v27 }
 0x9bc   :  { %v1597_v58 = vmul.f32 0.35355338, %v1591_v19 }
 0x9bd   :  { %v1310_v26 = vmul.f32 1.442695, %v1306_v45 }
 0x9be   :  { %v3499_v62 = vadd.f32 %v1597_v58, %v3033_v56 }
 0x9bf   :  { %2744 = vpow2.f32 %v1310_v26 }
 0x9c0   :  { %v1611_v21 = vsel %vm189_vm3, %v3499_v62, -inf }
 0x9c1   :  { %1612 = vmax.xlane.f32.xlu0 %v1611_v21  ;;  %1760 = vmax.xlane.f32.xlu1 %v1759_v23 }
 0x9c2   :  { %v1299_v63 = vpop.xlane.xlu2 %1298 }
 0x9c3   :  { %1655 = vrot.lane.b32.xlu2 %v3384_v33, %s3838_s25  ;;  %v1743_v25 = vpop.f32.mrf.mxu2  ;;  %v1307_v42 = vsub.f32 %v3446_v3, %v1299_v63 }
 0x9c4   :  { %v1750_v29 = vmul.f32 0.35355338, %v1743_v25 }
 0x9c5   :  { %v3518_v5 = vpop.eup %2744  ;;  %v1312_v20 = vmul.f32 1.442695, %v1307_v42 }
 0x9c6   :  { %v3508_v35 = vadd.f32 %v1750_v29, %v3033_v56  ;;  %v1318_v2 = vsel %vm189_vm3, %v3518_v5, 0.0 }
 0x9c7   :  { %2746 = vpow2.f32 %v1312_v20 }
 0x9c8   :  { %v1762_v11 = vsel %vm189_vm3, %v3508_v35, -inf }
 0x9c9   :  { %1763 = vmax.xlane.f32.xlu1 %v1762_v11 }
 0x9cb   :  { %v1745_v4 = vpop.f32.mrf.mxu2 }
 0x9cc   :  { %v1751_v30 = vmul.f32 0.35355338, %v1745_v4 }
 0x9cd   :  { %v3528_v50 = vpop.eup %2746 }
 0x9ce   :  { %v3514_v31 = vadd.f32 %v1751_v30, %v3033_v56  ;;  %v1321_v51 = vsel %vm189_vm3, %v3528_v50, 0.0 }
 0x9d0   :  { %v1765_v34 = vsel %vm189_vm3, %v3514_v31, -inf }
 0x9d1   :  { %1766 = vmax.xlane.f32.xlu0 %v1765_v34 }
 0x9d9   :  { %1319 = vadd.xlane.f32.xlu0 %v1318_v2 }
 0x9ec   :  { %1757 = vmax.xlane.f32.xlu2 %v1756_v43 }
 0x9f4   :  { %1322 = vadd.xlane.f32.xlu2 %v1321_v51 }
 0xa06   :  { %v1450_v1 = vpop.xlane.xlu1 %1449 }
 0xa07   :  { %v1460_v18 = vsub.f32 %v3451_v13, %v1450_v1 }
 0xa09   :  { %v1464_v3 = vmul.f32 1.442695, %v1460_v18 }
 0xa0b   :  { %2748 = vpow2.f32 %v1464_v3 }
 0xa0c   :  { %1526 = vrot.lane.b32.xlu2 %v3392_v61, %s3837_s3  ;;  %v1302_v56 = vpop.xlane.xlu2 %1301 }
 0xa0d   :  { %v1308_v59 = vsub.f32 %v3456_v48, %v1302_v56 }
 0xa0e   :  { %v1453_v17 = vpop.xlane.xlu0 %1452 }
 0xa0f   :  { %v1314_v54 = vmul.f32 1.442695, %v1308_v59  ;;  %v1461_v57 = vsub.f32 %v3461_v16, %v1453_v17 }
 0xa11   :  { %v3537_v60 = vpop.eup %2748  ;;  %2750 = vpow2.f32 %v1314_v54  ;;  %v1466_v47 = vmul.f32 1.442695, %v1461_v57 }
 0xa12   :  { %v1472_v52 = vsel %vm189_vm3, %v3537_v60, 0.0 }
 0xa13   :  { %2752 = vpow2.f32 %v1466_v47  ;;  %1473 = vadd.xlane.f32.xlu1 %v1472_v52 }
 0xa14   :  { %v1305_v13 = vpop.xlane.xlu1 %1304  ;;  %1809 = vrot.lane.b32.xlu2 %v3384_v33, %s3839_s5 }
 0xa15   :  { %v1309_v6 = vsub.f32 %v3466_v53, %v1305_v13 }
 0xa16   :  { %v1604_v48 = vpop.xlane.xlu0 %1603 }
 0xa17   :  { %v3544_v9 = vpop.eup %2750  ;;  %v1316_v36 = vmul.f32 1.442695, %v1309_v6  ;;  %v1614_v16 = vsub.f32 %v3471_v10, %v1604_v48 }
 0xa18   :  { %v1324_v24 = vsel %vm189_vm3, %v3544_v9, 0.0 }
 0xa19   :  { %v3547_v7 = vpop.eup %2752  ;;  %2754 = vpow2.f32 %v1316_v36  ;;  %v1618_v32 = vmul.f32 1.442695, %v1614_v16 }
 0xa1a   :  { %v1475_v12 = vsel %vm189_vm3, %v3547_v7, 0.0 }
 0xa1b   :  { %2756 = vpow2.f32 %v1618_v32  ;;  %1476 = vadd.xlane.f32.xlu0 %v1475_v12  ;;  %1325 = vadd.xlane.f32.xlu1 %v1324_v24 }
 0xa1c   :  { %v1456_v33 = vpop.xlane.xlu1 %1455 }
 0xa1d   :  { %v1462_v53 = vsub.f32 %v3476_v46, %v1456_v33 }
 0xa1e   :  { %v1607_v38 = vpop.xlane.xlu2 %1606 }
 0xa1f   :  { %v3554_v15 = vpop.eup %2754  ;;  %v1468_v10 = vmul.f32 1.442695, %v1462_v53  ;;  %v1615_v22 = vsub.f32 %v3481_v0, %v1607_v38 }
 0xa20   :  { %v1327_v21 = vsel %vm189_vm3, %v3554_v15, 0.0 }
 0xa21   :  { %v3557_v19 = vpop.eup %2756  ;;  %2758 = vpow2.f32 %v1468_v10  ;;  %v1620_v58 = vmul.f32 1.442695, %v1615_v22 }
 0xa22   :  { %v1626_v23 = vsel %vm189_vm3, %v3557_v19, 0.0 }
 0xa23   :  { %2760 = vpow2.f32 %v1620_v58  ;;  %1328 = vadd.xlane.f32.xlu0 %v1327_v21  ;;  %1627 = vadd.xlane.f32.xlu1 %v1626_v23 }
 0xa24   :  { %v1459_v46 = vpop.xlane.xlu0 %1458 }
 0xa25   :  { %v1463_v25 = vsub.f32 %v3486_v8, %v1459_v46 }
 0xa26   :  { %v1656_v57 = vpop.permute.xlu2 %1655 }
 0xa27   :  { %v3564_v27 = vpop.eup %2758  ;;  %v1470_v29 = vmul.f32 1.442695, %v1463_v25 }
 0xa28   :  { %v1478_v45 = vsel %vm189_vm3, %v3564_v27, 0.0 }
 0xa29   :  { %v3566_v0 = vpop.eup %2760  ;;  %2762 = vpow2.f32 %v1470_v29 }
 0xa2a   :  { %v1629_v11 = vsel %vm189_vm3, %v3566_v0, 0.0 }
 0xa2b   :  { %1479 = vadd.xlane.f32.xlu1 %v1478_v45  ;;  %1630 = vadd.xlane.f32.xlu0 %v1629_v11 }
 0xa2c   :  { %v1610_v26 = vpop.xlane.xlu1 %1609 }
 0xa2d   :  { %v1616_v6 = vsub.f32 %v3491_v14, %v1610_v26 }
 0xa2f   :  { %v3572_v4 = vpop.eup %2762  ;;  %v1622_v36 = vmul.f32 1.442695, %v1616_v6 }
 0xa30   :  { %v1481_v8 = vsel %vm189_vm3, %v3572_v4, 0.0 }
 0xa33   :  { %1482 = vadd.xlane.f32.xlu0 %v1481_v8 }
 0xa34   :  { %v1761_v30 = vpop.xlane.xlu1 %1760  ;;  %v1613_v34 = vpop.xlane.xlu0 %1612 }
 0xa35   :  { %v1769_v2 = vsub.f32 %v3496_v28, %v1761_v30  ;;  %v1617_v42 = vsub.f32 %v3499_v62, %v1613_v34 }
 0xa37   :  { %v1774_v63 = vmul.f32 1.442695, %v1769_v2  ;;  %v1624_v44 = vmul.f32 1.442695, %v1617_v42 }
 0xa39   :  { %2764 = vpow2.f32 %v1774_v63 }
 0xa3a   :  { %2766 = vpow2.f32 %v1624_v44 }
 0xa3c   :  { %v1764_v20 = vpop.xlane.xlu1 %1763 }
 0xa3d   :  { %v1770_v51 = vsub.f32 %v3508_v35, %v1764_v20 }
 0xa3f   :  { %v3578_v43 = vpop.eup %2764  ;;  %v1776_v18 = vmul.f32 1.442695, %v1770_v51 }
 0xa40   :  { %v1783_v1 = vsel %vm189_vm3, %v3578_v43, 0.0  ;;  %v3584_v28 = vpop.eup %2766 }
 0xa41   :  { %1784 = vadd.xlane.f32.xlu0 %v1783_v1  ;;  %2768 = vpow2.f32 %v1776_v18  ;;  %v1635_v62 = vsel %vm189_vm3, %v3584_v28, 0.0 }
 0xa44   :  { %v1767_v3 = vpop.xlane.xlu0 %1766 }
 0xa45   :  { %v1771_v56 = vsub.f32 %v3514_v31, %v1767_v3 }
 0xa47   :  { %v1778_v59 = vmul.f32 1.442695, %v1771_v56  ;;  %v3588_v17 = vpop.eup %2768 }
 0xa48   :  { %v1786_v31 = vsel %vm189_vm3, %v3588_v17, 0.0 }
 0xa49   :  { %2770 = vpow2.f32 %v1778_v59  ;;  %1636 = vadd.xlane.f32.xlu0 %v1635_v62 }
 0xa4c   :  { %v1320_v47 = vpop.xlane.xlu0 %1319 }
 0xa4d   :  { %2772 = vrcp.f32 %v1320_v47 }
 0xa4f   :  { %v3590_v35 = vpop.eup %2770 }
 0xa50   :  { %v1789_v54 = vsel %vm189_vm3, %v3590_v35, 0.0 }
 0xa51   :  { %1790 = vadd.xlane.f32.xlu2 %v1789_v54  ;;  %1787 = vadd.xlane.f32.xlu0 %v1786_v31 }
 0xa53   :  { %v2773_v32 = vpop.eup %2772 }
 0xa54   :  { %v1334_v24 = vmul.f32 %v2773_v32, %v3518_v5 }
 0xa56   :  { %v1338_v33 = vpack.c.bf16 %v1334_v24, %v1334_v24 }
 0xa58   :  { %v1344_v58 = vunpack.c.l.b16 %v1338_v33 }
 0xa5f   :  { %v1758_v52 = vpop.xlane.xlu2 %1757 }
 0xa60   :  { %v1768_v13 = vsub.f32 %v3524_v49, %v1758_v52 }
 0xa62   :  { %v1772_v48 = vmul.f32 1.442695, %v1768_v13 }
 0xa64   :  { %2774 = vpow2.f32 %v1772_v48 }
 0xa65   :  { %1834 = vrot.lane.b32.xlu0 %v3392_v61, %s3839_s5 }
 0xa67   :  { %v1323_v16 = vpop.xlane.xlu2 %1322 }
 0xa68   :  { %2776 = vrcp.f32 %v1323_v16 }
 0xa69   :  { %2778 = vpow2.f32 %v1622_v36 }
 0xa6a   :  { %v3600_v12 = vpop.eup %2774 }
 0xa6b   :  { %v1780_v49 = vsel %vm189_vm3, %v3600_v12, 0.0 }
 0xa6c   :  { %1781 = vadd.xlane.f32.xlu1 %v1780_v49 }
 0xa6e   :  { %v2777_v14 = vpop.eup %2776 }
 0xa6f   :  { %v1335_v53 = vmul.f32 %v2777_v14, %v3528_v50  ;;  %v1527_v38 = vpop.permute.xlu2 %1526  ;;  %v3606_v10 = vpop.eup %2778 }
 0xa70   :  { %1539 = vmatpush.bf16.msra.mxu0 %v1527_v38  ;;  %v1632_v23 = vsel %vm189_vm3, %v3606_v10, 0.0 }
 0xa71   :  { %v1339_v22 = vpack.c.bf16 %v1335_v53, %v1335_v53 }
 0xa73   :  { %v1345_v21 = vunpack.c.l.b16 %v1339_v22 }
 0xa74   :  { %1633 = vadd.xlane.f32.xlu1 %v1632_v23 }
 0xa75   :  { %v1346_v5 = vpack.c.b16 %v1345_v21, %v1344_v58 }
 0xa77   :  { %2454 = vmatmul.msk.bf16.vlgmr.msra.gmra.mxu3 %vm189_vm3, %v1346_v5  ;;  %v1810_v1 = vpop.permute.xlu2 %1809 }
 0xa78   :  { %1668 = vmatpush.bf16.msra.mxu3 %v1656_v57 }
 0xa86   :  { %v1474_v46 = vpop.xlane.xlu1 %1473 }
 0xa87   :  { %2780 = vrcp.f32 %v1474_v46 }
 0xa8d   :  { %1680 = vrot.lane.b32.xlu1 %v3392_v61, %s3838_s25  ;;  %v2781_v29 = vpop.eup %2780 }
 0xa8e   :  { %v1477_v50 = vpop.xlane.xlu0 %1476  ;;  %v1326_v25 = vpop.xlane.xlu1 %1325  ;;  %v1488_v45 = vmul.f32 %v2781_v29, %v3537_v60 }
 0xa8f   :  { %2782 = vrcp.f32 %v1477_v50 }
 0xa90   :  { %2784 = vrcp.f32 %v1326_v25  ;;  %v1492_v26 = vpack.c.bf16 %v1488_v45, %v1488_v45 }
 0xa92   :  { %v1498_v42 = vunpack.c.l.b16 %v1492_v26 }
 0xa95   :  { %v2783_v11 = vpop.eup %2782 }
 0xa96   :  { %v1489_v8 = vmul.f32 %v2783_v11, %v3547_v7  ;;  %v1329_v30 = vpop.xlane.xlu0 %1328  ;;  %v1628_v34 = vpop.xlane.xlu1 %1627 }
 0xa97   :  { %v2785_v2 = vpop.eup %2784  ;;  %2786 = vrcp.f32 %v1329_v30 }
 0xa98   :  { %v1493_v63 = vpack.c.bf16 %v1489_v8, %v1489_v8  ;;  %v1336_v61 = vmul.f32 %v2785_v2, %v3544_v9  ;;  %2788 = vrcp.f32 %v1628_v34 }
 0xa9a   :  { %v1499_v44 = vunpack.c.l.b16 %v1493_v63  ;;  %v1340_v18 = vpack.c.bf16 %v1336_v61, %v1336_v61 }
 0xa9c   :  { %v1500_v20 = vpack.c.b16 %v1499_v44, %v1498_v42  ;;  %v1369_v62 = vunpack.c.l.b16 %v1340_v18 }
 0xa9d   :  { %v2787_v51 = vpop.eup %2786 }
 0xa9e   :  { %v1337_v60 = vmul.f32 %v2787_v51, %v3554_v15  ;;  %v1480_v3 = vpop.xlane.xlu1 %1479  ;;  %v1631_v56 = vpop.xlane.xlu0 %1630  ;;  %2458 = vmatmul.msk.bf16.vlgmr.msrb.gmra.mxu3 %vm189_vm3, %v1500_v20 }
 0xa9f   :  { %1822 = vmatpush.bf16.msrb.mxu3 %v1810_v1  ;;  %v2789_v7 = vpop.eup %2788  ;;  %2790 = vrcp.f32 %v1631_v56 }
 0xaa0   :  { %v1341_v59 = vpack.c.bf16 %v1337_v60, %v1337_v60  ;;  %2792 = vrcp.f32 %v1480_v3  ;;  %v1642_v9 = vmul.f32 %v2789_v7, %v3557_v19 }
 0xaa2   :  { %v1370_v54 = vunpack.c.l.b16 %v1341_v59  ;;  %v1646_v15 = vpack.c.bf16 %v1642_v9, %v1642_v9 }
 0xaa4   :  { %v1371_v31 = vpack.c.b16 %v1370_v54, %v1369_v62  ;;  %v1652_v36 = vunpack.c.l.b16 %v1646_v15 }
 0xaa5   :  { %v2791_v57 = vpop.eup %2790 }
 0xaa6   :  { %2455 = vmatmul.msk.bf16.vlgmr.msrb.gmra.mxu0 %vm189_vm3, %v1371_v31  ;;  %v1483_v47 = vpop.xlane.xlu0 %1482  ;;  %v2793_v52 = vpop.eup %2792  ;;  %v1643_v13 = vmul.f32 %v2791_v57, %v3566_v0 }
 0xaa7   :  { %2794 = vrcp.f32 %v1483_v47  ;;  %v1490_v48 = vmul.f32 %v2793_v52, %v3564_v27 }
 0xaa8   :  { %v1647_v6 = vpack.c.bf16 %v1643_v13, %v1643_v13 }
 0xaa9   :  { %v1494_v49 = vpack.c.bf16 %v1490_v48, %v1490_v48 }
 0xaaa   :  { %v1653_v16 = vunpack.c.l.b16 %v1647_v6 }
 0xaab   :  { %v1523_v33 = vunpack.c.l.b16 %v1494_v49 }
 0xaac   :  { %v1654_v24 = vpack.c.b16 %v1653_v16, %v1652_v36 }
 0xaad   :  { %v2795_v32 = vpop.eup %2794 }
 0xaae   :  { %v1491_v19 = vmul.f32 %v2795_v32, %v3572_v4  ;;  %2462 = vmatmul.msk.bf16.vlgmr.msra.gmra.mxu3 %vm189_vm3, %v1654_v24 }
 0xab0   :  { %v1495_v14 = vpack.c.bf16 %v1491_v19, %v1491_v19 }
 0xab2   :  { %v1524_v53 = vunpack.c.l.b16 %v1495_v14 }
 0xab4   :  { %v1525_v38 = vpack.c.b16 %v1524_v53, %v1523_v33  ;;  %v1785_v0 = vpop.xlane.xlu0 %1784  ;;  %v2555_v53 = vld [vmem:[%s3832_s4 + $0x18] sm:$0xff] }
 0xab5   :  { %2796 = vrcp.f32 %v1785_v0  ;;  %1950 = vmatpush.bf16.msrb.mxu1 %v2555_v53 }
 0xab6   :  { %2459 = vmatmul.msk.bf16.vlgmr.msra.gmra.mxu0 %vm189_vm3, %v1525_v38  ;;  %v2554_v38 = vld [vmem:[%s3832_s4 + $0x10] sm:$0xff] }
 0xab9   :  { %1951 = vmatpush.bf16.msrb.mxu1 %v2554_v38 }
 0xabb   :  { %v2797_v58 = vpop.eup %2796 }
 0xabc   :  { %v1797_v27 = vmul.f32 %v2797_v58, %v3578_v43  ;;  %v1637_v25 = vpop.xlane.xlu0 %1636 }
 0xabe   :  { %v1801_v23 = vpack.c.bf16 %v1797_v27, %v1797_v27 }
 0xac0   :  { %v1807_v50 = vunpack.c.l.b16 %v1801_v23 }
 0xac4   :  { %v1788_v30 = vpop.xlane.xlu0 %1787  ;;  %v1791_v34 = vpop.xlane.xlu2 %1790 }
 0xad7   :  { %v1835_v61 = vpop.permute.xlu0 %1834 }
 0xadf   :  { %v1782_v22 = vpop.xlane.xlu1 %1781 }
 0xae0   :  { %2798 = vrcp.f32 %v1782_v22 }
 0xae6   :  { %v2799_v21 = vpop.eup %2798 }
 0xae7   :  { %v1796_v5 = vmul.f32 %v2799_v21, %v3600_v12  ;;  %v1634_v46 = vpop.xlane.xlu1 %1633 }
 0xae8   :  { %2800 = vrcp.f32 %v1634_v46 }
 0xae9   :  { %v1800_v4 = vpack.c.bf16 %v1796_v5, %v1796_v5  ;;  %2802 = vrcp.f32 %v1637_v25 }
 0xaea   :  { %2804 = vrcp.f32 %v1791_v34 }
 0xaeb   :  { %v1806_v29 = vunpack.c.l.b16 %v1800_v4  ;;  %2806 = vrcp.f32 %v1788_v30 }
 0xaed   :  { %v1808_v45 = vpack.c.b16 %v1807_v50, %v1806_v29 }
 0xaee   :  { %v2801_v11 = vpop.eup %2800 }
 0xaef   :  { %2466 = vmatmul.msk.bf16.vlgmr.msrb.gmra.mxu3 %vm189_vm3, %v1808_v45  ;;  %v2803_v26 = vpop.eup %2802  ;;  %v1644_v8 = vmul.f32 %v2801_v11, %v3606_v10 }
 0xaf0   :  { %v1645_v43 = vmul.f32 %v2803_v26, %v3584_v28  ;;  %v2805_v20 = vpop.eup %2804 }
 0xaf1   :  { %v1648_v2 = vpack.c.bf16 %v1644_v8, %v1644_v8  ;;  %v2807_v1 = vpop.eup %2806  ;;  %v1799_v28 = vmul.f32 %v2805_v20, %v3590_v35 }
 0xaf2   :  { %v1649_v12 = vpack.c.bf16 %v1645_v43, %v1645_v43  ;;  %v1798_v10 = vmul.f32 %v2807_v1, %v3588_v17 }
 0xaf3   :  { %v1677_v63 = vunpack.c.l.b16 %v1648_v2  ;;  %v1803_v60 = vpack.c.bf16 %v1799_v28, %v1799_v28 }
 0xaf4   :  { %v1678_v42 = vunpack.c.l.b16 %v1649_v12  ;;  %v1802_v18 = vpack.c.bf16 %v1798_v10, %v1798_v10 }
 0xaf5   :  { %v1832_v56 = vunpack.c.l.b16 %v1803_v60 }
 0xaf6   :  { %v1679_v51 = vpack.c.b16 %v1678_v42, %v1677_v63  ;;  %v1831_v3 = vunpack.c.l.b16 %v1802_v18 }
 0xaf8   :  { %v1833_v59 = vpack.c.b16 %v1832_v56, %v1831_v3  ;;  %v2652_v3 = vld [vmem:[%s3833_s30 + $0x1] ss:$0 sm:$0xff] }
 0xafa   :  { %v1362_v7 = vpop.f32.mrf.mxu3 }
 0xaff   :  { %v1681_v44 = vpop.permute.xlu1 %1680 }
 0xb00   :  { %1693 = vmatpush.bf16.msrb.mxu0 %v1681_v44 }
 0xb02   :  { %v1364_v62 = vpop.f32.mrf.mxu3 }
 0xb03   :  { %2463 = vmatmul.msk.bf16.vlgmr.msrb.gmra.mxu0 %vm189_vm3, %v1679_v51 }
 0xb04   :  { %1847 = vmatpush.bf16.msra.mxu0 %v1835_v61 }
 0xb13   :  { %2467 = vmatmul.msk.bf16.vlgmr.msra.gmra.mxu0 %vm189_vm3, %v1833_v59 }
 0xb21   :  { %v1516_v54 = vpop.f32.mrf.mxu3 }
 0xb23   :  { %v1387_v9 = vpop.f32.mrf.mxu0 }
 0xb29   :  { %v1518_v31 = vpop.f32.mrf.mxu3 }
 0xb2a   :  { %v2613_v57 = vpack.i.bf16 %v1518_v31, %v1516_v54 }
 0xb2b   :  { %v1389_v47 = vpop.f32.mrf.mxu0 }
 0xb2c   :  { %2614 = vrot.lane.b32.xlu1 %v2613_v57, %s3840_s28 }
 0xb31   :  { %v1670_v52 = vpop.f32.mrf.mxu3 }
 0xb33   :  { %v1541_v17 = vpop.f32.mrf.mxu0 }
 0xb39   :  { %v1672_v15 = vpop.f32.mrf.mxu3 }
 0xb3a   :  { %v2618_v35 = vpack.i.bf16 %v1672_v15, %v1670_v52 }
 0xb3b   :  { %v1543_v13 = vpop.f32.mrf.mxu0 }
 0xb3c   :  { %2619 = vrot.lane.b32.xlu0 %v2618_v35, %s3841_s23  ;;  %v2628_v6 = vpack.i.bf16 %v1543_v13, %v1541_v17 }
 0xb44   :  { %2629 = vrot.lane.b32.xlu0 %v2628_v6, %s3840_s28 }
 0xb72   :  { %v1824_v48 = vpop.f32.mrf.mxu3 }
 0xb7a   :  { %v1826_v36 = vpop.f32.mrf.mxu3 }
 0xb7b   :  { %v2623_v16 = vpack.i.bf16 %v1826_v36, %v1824_v48 }
 0xb7d   :  { %2624 = vrot.lane.b32.xlu1 %v2623_v16, %s3842_s26 }
 0xb80   :  { %v1695_v32 = vpop.f32.mrf.mxu0 }
 0xb88   :  { %v1697_v24 = vpop.f32.mrf.mxu0 }
 0xb89   :  { %v2633_v49 = vpack.i.bf16 %v1697_v24, %v1695_v32 }
 0xb8b   :  { %2634 = vrot.lane.b32.xlu1 %v2633_v49, %s3841_s23 }
 0xb90   :  { %v1849_v19 = vpop.f32.mrf.mxu0 }
 0xb98   :  { %v1851_v14 = vpop.f32.mrf.mxu0 }
 0xb99   :  { %v2638_v33 = vpack.i.bf16 %v1851_v14, %v1849_v19 }
 0xb9b   :  { %2639 = vrot.lane.b32.xlu2 %v2638_v33, %s3842_s26 }
 0xb9e   :  { %v2615_v0 = vpop.permute.xlu1 %2614 }
 0xb9f   :  { %v2617_v58 = vunpack.i.h.bf16 %v2615_v0  ;;  %v2616_v27 = vunpack.i.l.bf16 %v2615_v0 }
 0xba1   :  { %v1903_v4 = vsel %vm133_vm1, %v1364_v62, %v2617_v58  ;;  %v1902_v46 = vsel %vm133_vm1, %v1362_v7, %v2616_v27 }
 0xbae   :  { %v2620_v22 = vpop.permute.xlu0 %2619 }
 0xbaf   :  { %v2622_v21 = vunpack.i.h.bf16 %v2620_v22  ;;  %v2621_v23 = vunpack.i.l.bf16 %v2620_v22 }
 0xbb1   :  { %v1907_v29 = vsel %vm189_vm3, %v1903_v4, %v2622_v21  ;;  %v1906_v45 = vsel %vm189_vm3, %v1902_v46, %v2621_v23 }
 0xbb6   :  { %v2630_v43 = vpop.permute.xlu0 %2629 }
 0xbb7   :  { %v2632_v30 = vunpack.i.h.bf16 %v2630_v43  ;;  %v2631_v34 = vunpack.i.l.bf16 %v2630_v43 }
 0xbb9   :  { %v1905_v44 = vsel %vm133_vm1, %v1389_v47, %v2632_v30  ;;  %v1904_v61 = vsel %vm133_vm1, %v1387_v9, %v2631_v34 }
 0xbef   :  { %v2625_v5 = vpop.permute.xlu1 %2624 }
 0xbf0   :  { %v2627_v50 = vunpack.i.h.bf16 %v2625_v5  ;;  %v2626_v25 = vunpack.i.l.bf16 %v2625_v5  ;;  %v2557_v5 = vld [vmem:[%s3788_s8 + $0x18] sm:$0xff] }
 0xbf1   :  { %2109 = vmatpush.bf16.msrb.mxu2 %v2557_v5 }
 0xbf2   :  { %v1911_v11 = vsel %vm806_vm4, %v1907_v29, %v2627_v50  ;;  %v1910_v26 = vsel %vm806_vm4, %v1906_v45, %v2626_v25  ;;  %v2556_v25 = vld [vmem:[%s3788_s8 + $0x10] sm:$0xff] }
 0xbf3   :  { %v1914_v8 = vpack.c.bf16 %v1911_v11, %v1910_v26 }
 0xbf5   :  { %2481 = vmatmul.msk.bf16.vlgmr.msrb.gmra.mxu1 %vm96_vm0, %v1914_v8  ;;  %v2640_v2 = vpop.permute.xlu2 %2639  ;;  %2110 = vmatpush.bf16.msrb.mxu2 %v2556_v25 }
 0xbf6   :  { %v2642_v20 = vunpack.i.h.bf16 %v2640_v2  ;;  %v2641_v51 = vunpack.i.l.bf16 %v2640_v2 }
 0xbfd   :  { %v2635_v12 = vpop.permute.xlu1 %2634 }
 0xbfe   :  { %v2637_v63 = vunpack.i.h.bf16 %v2635_v12  ;;  %v2636_v42 = vunpack.i.l.bf16 %v2635_v12 }
 0xc00   :  { %v1909_v1 = vsel %vm189_vm3, %v1905_v44, %v2637_v63  ;;  %v1908_v10 = vsel %vm189_vm3, %v1904_v61, %v2636_v42 }
 0xc01   :  { %v1912_v28 = vsel %vm806_vm4, %v1908_v10, %v2641_v51  ;;  %v1913_v18 = vsel %vm806_vm4, %v1909_v1, %v2642_v20 }
 0xc02   :  { %v1915_v60 = vpack.c.bf16 %v1913_v18, %v1912_v28 }
 0xc05   :  { %2482 = vmatmul.msk.bf16.gmra.mxu1 %vm96_vm0, %v1915_v60 }
 0xc72   :  { %v1953_v56 = vpop.f32.mrf.mxu1 }
 0xc73   :  { %v1954_v7 = vadd.f32 %v2652_v3, %v1953_v56 }
 0xc75   :  { %v1963_v59 = vadd.f32 %v1954_v7, %v3363_v55 }
 0xc77   :  { %v1971_v62 = vsel %vm96_vm0, %v1963_v59, 0.0 }
 0xc78   :  { %1972 = vadd.xlane.f32.xlu0 %v1971_v62 }
 0xc7a   :  { %v1955_v54 = vpop.f32.mrf.mxu1 }
 0xc7b   :  { %v1956_v9 = vadd.f32 %v2652_v3, %v1955_v54 }
 0xc7d   :  { %v1964_v31 = vadd.f32 %v1956_v9, %v3365_v39 }
 0xc7f   :  { %v1974_v57 = vsel %vm96_vm0, %v1964_v31, 0.0 }
 0xc80   :  { %1975 = vadd.xlane.f32.xlu1 %v1974_v57 }
 0xc82   :  { %v1958_v47 = vpop.f32.mrf.mxu1 }
 0xc83   :  { %v1959_v52 = vadd.f32 %v2652_v3, %v1958_v47 }
 0xc85   :  { %v1965_v17 = vadd.f32 %v1959_v52, %v3374_v40 }
 0xc87   :  { %v1977_v15 = vsel %vm96_vm0, %v1965_v17, 0.0 }
 0xc88   :  { %1978 = vadd.xlane.f32.xlu2 %v1977_v15 }
 0xc8a   :  { %v1960_v35 = vpop.f32.mrf.mxu1 }
 0xc8b   :  { %v1961_v13 = vadd.f32 %v2652_v3, %v1960_v35  ;;  %v2653_v3 = vld [vmem:[%s3785_s6 + $0x1] ss:$0 sm:$0xff] }
 0xc8d   :  { %v1966_v55 = vadd.f32 %v1961_v13, %v3376_v41 }
 0xc8f   :  { %v1980_v6 = vsel %vm96_vm0, %v1966_v55, 0.0 }
 0xc90   :  { %1981 = vadd.xlane.f32.xlu0 %v1980_v6 }
 0xceb   :  { %v1973_v48 = vpop.xlane.xlu0 %1972 }
 0xcec   :  { %v1983_v39 = vmul.f32 %v1973_v48, %v3269_v37 }
 0xcee   :  { %v1987_v36 = vsub.f32 %v1963_v59, %v1983_v39 }
 0xcf0   :  { %v1991_v16 = vmul.f32 %v1987_v36, %v1987_v36 }
 0xcf2   :  { %v1995_v32 = vsel %vm96_vm0, %v1991_v16, 0.0 }
 0xcf3   :  { %v1976_v24 = vpop.xlane.xlu1 %1975  ;;  %1996 = vadd.xlane.f32.xlu1 %v1995_v32 }
 0xcf4   :  { %v1984_v40 = vmul.f32 %v1976_v24, %v3269_v37 }
 0xcf6   :  { %v3674_v49 = vsub.f32 %v1964_v31, %v1984_v40  ;;  %v2654_v31 = vld [vmem:[%s3786_s7 + $0x1] ss:$0 sm:$0xff] }
 0xcf8   :  { %v1992_v19 = vmul.f32 %v3674_v49, %v3674_v49 }
 0xcfa   :  { %v1998_v41 = vsel %vm96_vm0, %v1992_v19, 0.0 }
 0xcfb   :  { %1999 = vadd.xlane.f32.xlu0 %v1998_v41  ;;  %v1979_v14 = vpop.xlane.xlu2 %1978 }
 0xcfc   :  { %v1985_v33 = vmul.f32 %v1979_v14, %v3269_v37 }
 0xcfe   :  { %v3680_v53 = vsub.f32 %v1965_v17, %v1985_v33 }
 0xd00   :  { %v1993_v38 = vmul.f32 %v3680_v53, %v3680_v53 }
 0xd02   :  { %v2001_v0 = vsel %vm96_vm0, %v1993_v38, 0.0 }
 0xd03   :  { %v1982_v22 = vpop.xlane.xlu0 %1981  ;;  %2002 = vadd.xlane.f32.xlu1 %v2001_v0 }
 0xd04   :  { %v1986_v58 = vmul.f32 %v1982_v22, %v3269_v37 }
 0xd06   :  { %v3686_v27 = vsub.f32 %v1966_v55, %v1986_v58  ;;  %v2559_v58 = vld [vmem:[%s3790_s10 + $0x18] sm:$0xff] }
 0xd07   :  { %2162 = vmatpush.bf16.msra.mxu3 %v2559_v58  ;;  %v2564_v58 = vld [vmem:[%s3798_s18 + $0x10] sm:$0xff] }
 0xd08   :  { %v1994_v21 = vmul.f32 %v3686_v27, %v3686_v27 }
 0xd0a   :  { %v2004_v23 = vsel %vm96_vm0, %v1994_v21, 0.0 }
 0xd0b   :  { %2005 = vadd.xlane.f32.xlu0 %v2004_v23 }
 0xd66   :  { %v1997_v4 = vpop.xlane.xlu1 %1996 }
 0xd67   :  { %v2007_v46 = vmul.f32 %v1997_v4, %v3269_v37 }
 0xd69   :  { %v2011_v50 = vadd.f32 1e-05, %v2007_v46 }
 0xd6b   :  { %2808 = vrsqrt.f32 %v2011_v50  ;;  %vm2021_vm3 = vweird.f32 %v2011_v50 }
 0xd6e   :  { %v2000_v29 = vpop.xlane.xlu0 %1999 }
 0xd6f   :  { %v2008_v45 = vmul.f32 %v2000_v29, %v3269_v37 }
 0xd71   :  { %v2809_v11 = vpop.eup %2808  ;;  %v2012_v26 = vadd.f32 1e-05, %v2008_v45 }
 0xd72   :  { %v2016_v8 = vmul.f32 %v2809_v11, %v2011_v50  ;;  %vm2022_vm1 = vweird.f32 %v2809_v11 }
 0xd73   :  { %2810 = vrsqrt.f32 %v2012_v26  ;;  %vm2023_vm4 = vmor %vm2021_vm3, %vm2022_vm1  ;;  %vm2031_vm7 = vweird.f32 %v2012_v26 }
 0xd74   :  { %v2017_v43 = vmul.f32 %v2809_v11, %v2016_v8 }
 0xd76   :  { %v2018_v30 = vmul.f32 0.5, %v2017_v43  ;;  %v2003_v34 = vpop.xlane.xlu1 %2002 }
 0xd77   :  { %v2009_v2 = vmul.f32 %v2003_v34, %v3269_v37  ;;  %v2235_v34 = vld [vmem:[%s3793_s14] sm:$0x3] }
 0xd78   :  { %v2019_v12 = vsub.f32 1.5, %v2018_v30 }
 0xd79   :  { %v2811_v63 = vpop.eup %2810  ;;  %v2013_v42 = vadd.f32 1e-05, %v2009_v2  ;;  %v2233_v2 = vld [vmem:[%s3794_s1] sm:$0x3] }
 0xd7a   :  { %v2020_v44 = vmul.f32 %v2809_v11, %v2019_v12  ;;  %v2026_v61 = vmul.f32 %v2811_v63, %v2012_v26  ;;  %vm2032_vm6 = vweird.f32 %v2811_v63  ;;  %v2246_v12 = vsel %vm2244_vm15, %v2235_v34, 0 }
 0xd7b   :  { %2812 = vrsqrt.f32 %v2013_v42  ;;  %vm2033_vm8 = vmor %vm2031_vm7, %vm2032_vm6  ;;  %vm2041_vm10 = vweird.f32 %v2013_v42  ;;  %2255 = vmatpush.bf16.msrb.mxu0 %v2246_v12 }
 0xd7c   :  { %v2027_v20 = vmul.f32 %v2811_v63, %v2026_v61  ;;  %v2024_v51 = vsel %vm2023_vm4, %v2809_v11, %v2020_v44 }
 0xd7d   :  { %v2055_v56 = vmul.f32 %v2024_v51, %v1987_v36 }
 0xd7e   :  { %v2028_v1 = vmul.f32 0.5, %v2027_v20  ;;  %v2006_v10 = vpop.xlane.xlu0 %2005 }
 0xd7f   :  { %v2010_v28 = vmul.f32 %v2006_v10, %v3269_v37  ;;  %v2062_v57 = vmul.f32 %v2653_v3, %v2055_v56  ;;  %v2657_v56 = vld [vmem:[%s3795_s15] ss:$0 sm:$0xff] }
 0xd80   :  { %v2029_v18 = vsub.f32 1.5, %v2028_v1 }
 0xd81   :  { %v2813_v60 = vpop.eup %2812  ;;  %v2014_v7 = vadd.f32 1e-05, %v2010_v28  ;;  %v2069_v13 = vadd.f32 %v2654_v31, %v2062_v57 }
 0xd82   :  { %v2030_v59 = vmul.f32 %v2811_v63, %v2029_v18  ;;  %v2036_v62 = vmul.f32 %v2813_v60, %v2013_v42  ;;  %vm2042_vm9 = vweird.f32 %v2813_v60  ;;  %v2656_v42 = vld [vmem:[%s3789_s11 + $0x1] ss:$0 sm:$0xff]  ;;  %s2837_s11 = smov 32  }
 0xd83   :  { %2814 = vrsqrt.f32 %v2014_v7  ;;  %vm2043_vm11 = vmor %vm2041_vm10, %vm2042_vm9  ;;  %vm2051_vm13 = vweird.f32 %v2014_v7  ;;  %vm2265_vm9 = vcmask 1041409   ;;  %vm2298_vm10 = vcmask 326656  }
 0xd84   :  { %v2034_v54 = vsel %vm2033_vm8, %v2811_v63, %v2030_v59  ;;  %v2037_v9 = vmul.f32 %v2813_v60, %v2036_v62  ;;  %v2234_v63 = vpack.c.bf16 %v2233_v2, %v2233_v2 }
 0xd85   :  { %v2056_v47 = vmul.f32 %v2034_v54, %v3674_v49 }
 0xd86   :  { %v2038_v52 = vmul.f32 0.5, %v2037_v9  ;;  %2517 = vmatmul.msk.bf16.vlgmr.msrb.gmra.mxu0 %vm2240_vm2, %v2234_v63 }
 0xd87   :  { %v2063_v17 = vmul.f32 %v2653_v3, %v2056_v47 }
 0xd88   :  { %v2039_v15 = vsub.f32 1.5, %v2038_v52 }
 0xd89   :  { %v2815_v35 = vpop.eup %2814  ;;  %v2070_v55 = vadd.f32 %v2654_v31, %v2063_v17 }
 0xd8a   :  { %v2040_v6 = vmul.f32 %v2813_v60, %v2039_v15  ;;  %v2046_v48 = vmul.f32 %v2815_v35, %v2014_v7  ;;  %vm2052_vm12 = vweird.f32 %v2815_v35 }
 0xd8b   :  { %v2073_v39 = vpack.c.bf16 %v2070_v55, %v2069_v13  ;;  %vm2053_vm14 = vmor %vm2051_vm13, %vm2052_vm12 }
 0xd8c   :  { %v2047_v36 = vmul.f32 %v2815_v35, %v2046_v48  ;;  %v2044_v16 = vsel %vm2043_vm11, %v2813_v60, %v2040_v6  ;;  %vm2374_vm11 = vcmask 80896  }
 0xd8d   :  { %2498 = vmatmul.msk.bf16.vlgmr.msrb.gmra.mxu2 %vm96_vm0, %v2073_v39  ;;  %v2057_v40 = vmul.f32 %v2044_v16, %v3680_v53  ;;  %v2558_v53 = vld [vmem:[%s3790_s10 + $0x10] sm:$0xff] }
 0xd8e   :  { %v2048_v32 = vmul.f32 0.5, %v2047_v36  ;;  %2163 = vmatpush.bf16.msra.mxu3 %v2558_v53  ;;  %v2278_v36 = vld [vmem:[%s3797_s16 + $0x10] sm:$0xf] }
 0xd8f   :  { %v2064_v14 = vmul.f32 %v2653_v3, %v2057_v40  ;;  %v2292_v16 = vunpack.c.l.b16 %v2278_v36  ;;  %v2561_v40 = vld [vmem:[%s3797_s16 + $0x8] sm:$0xff] }
 0xd90   :  { %v2049_v24 = vsub.f32 1.5, %v2048_v32 }
 0xd91   :  { %v2071_v38 = vadd.f32 %v2654_v31, %v2064_v14  ;;  %v2295_v32 = vpack.c.b16 %v2292_v16, %v2292_v16 }
 0xd92   :  { %v2050_v49 = vmul.f32 %v2815_v35, %v2049_v24 }
 0xd93   :  { %v2304_v24 = vsel %vm2302_vm5, %v2295_v32, 0 }
 0xd94   :  { %v2054_v19 = vsel %vm2053_vm14, %v2815_v35, %v2050_v49  ;;  %2311 = vmatpush.bf16.msra.mxu0 %v2304_v24 }
 0xd95   :  { %v2058_v41 = vmul.f32 %v2054_v19, %v3686_v27  ;;  %v2655_v27 = vld [vmem:[%s3787_s9 + $0x1] ss:$0 sm:$0xff] }
 0xd97   :  { %v2065_v33 = vmul.f32 %v2653_v3, %v2058_v41  ;;  %v2560_v41 = vld [vmem:[%s3797_s16] sm:$0xff] }
 0xd98   :  { %2312 = vmatpush.bf16.msra.mxu0 %v2561_v40 }
 0xd99   :  { %v2072_v0 = vadd.f32 %v2654_v31, %v2065_v33 }
 0xd9b   :  { %v2074_v22 = vpack.c.bf16 %v2072_v0, %v2071_v38 }
 0xd9c   :  { %2313 = vmatpush.bf16.msra.mxu0 %v2560_v41 }
 0xd9d   :  { %2499 = vmatmul.msk.bf16.gmra.mxu2 %vm96_vm0, %v2074_v22  ;;  %v2565_v22 = vld [vmem:[%s3798_s18 + $0x18] sm:$0xff] }
 0xd9e   :  { %2365 = vmatpush.bf16.msra.mxu1 %v2565_v22 }
 0xda2   :  { %2366 = vmatpush.bf16.msra.mxu1 %v2564_v58 }
 0xe03   :  { %v2257_v62 = vpop.f32.mrf.mxu0 }
 0xe04   :  { %v2258_v54 = vadd.f32 %v2657_v56, %v2257_v62  ;;  %v2661_v56 = vld [vmem:[%s3799_s19] ss:$0 sm:$0xff] }
 0xe06   :  { %v2261_v31 = vmax.f32 %v2258_v54, 0.0 }
 0xe0b   :  { %v2259_v52 = vpop.f32.mrf.mxu0 }
 0xe10   :  { %v2112_v21 = vpop.f32.mrf.mxu2 }
 0xe11   :  { %v2113_v23 = vadd.f32 %v2655_v27, %v2112_v21 }
 0xe13   :  { %v2122_v46 = vmax.f32 %v2113_v23, 0.0 }
 0xe18   :  { %v2114_v5 = vpop.f32.mrf.mxu2 }
 0xe19   :  { %v2115_v4 = vadd.f32 %v2655_v27, %v2114_v5 }
 0xe1b   :  { %v2123_v50 = vmax.f32 %v2115_v4, 0.0 }
 0xe1d   :  { %v2126_v25 = vpack.c.bf16 %v2123_v50, %v2122_v46 }
 0xe1f   :  { %2513 = vmatmul.msk.bf16.vlgmr.msra.gmra.mxu3 %vm96_vm0, %v2126_v25 }
 0xe20   :  { %v2117_v29 = vpop.f32.mrf.mxu2 }
 0xe21   :  { %v2118_v45 = vadd.f32 %v2655_v27, %v2117_v29 }
 0xe23   :  { %v2124_v8 = vmax.f32 %v2118_v45, 0.0  ;;  %v2658_v45 = vld [vmem:[%s3791_s12 + $0x1] ss:$0 sm:$0xff] }
 0xe28   :  { %v2119_v11 = vpop.f32.mrf.mxu2 }
 0xe29   :  { %v2120_v26 = vadd.f32 %v2655_v27, %v2119_v11 }
 0xe2b   :  { %v2125_v43 = vmax.f32 %v2120_v26, 0.0 }
 0xe2d   :  { %v2127_v30 = vpack.c.bf16 %v2125_v43, %v2124_v8 }
 0xe2f   :  { %2514 = vmatmul.msk.bf16.gmra.mxu3 %vm96_vm0, %v2127_v30  ;;  %v2659_v30 = vld [vmem:[%s3792_s13 + $0x1] ss:$0 sm:$0xff] }
 0xea2   :  { %v2165_v44 = vpop.f32.mrf.mxu3 }
 0xea3   :  { %v2166_v61 = vadd.f32 %v2656_v42, %v2165_v44 }
 0xea5   :  { %v2173_v20 = vadd.f32 %v2166_v61, %v2069_v13 }
 0xea7   :  { %v2179_v51 = vsel %vm96_vm0, %v2173_v20, 0.0 }
 0xea8   :  { %2180 = vadd.xlane.f32.xlu2 %v2179_v51  ;;  %v2562_v51 = vld [vmem:[%s3798_s18] sm:$0xff] }
 0xeaa   :  { %v2167_v1 = vpop.f32.mrf.mxu3 }
 0xeab   :  { %v2660_v1 = vld [vmem:[%s3796_s17] ss:$0 sm:$0xff] }
 0xeb2   :  { %v2169_v10 = vpop.f32.mrf.mxu3 }
 0xeb3   :  { %v2170_v28 = vadd.f32 %v2656_v42, %v2169_v10 }
 0xeb5   :  { %v2174_v18 = vadd.f32 %v2170_v28, %v2071_v38 }
 0xeb7   :  { %v2182_v60 = vsel %vm96_vm0, %v2174_v18, 0.0 }
 0xeb8   :  { %2183 = vadd.xlane.f32.xlu1 %v2182_v60 }
 0xeba   :  { %v2171_v3 = vpop.f32.mrf.mxu3 }
 0xec0   :  { %2269 = vrot.lane.b32.xlu2 %v2261_v31, %s2837_s11 }
 0xf1b   :  { %v2181_v7 = vpop.xlane.xlu2 %2180 }
 0xf1c   :  { %v2185_v59 = vmul.f32 %v2181_v7, %v3269_v37 }
 0xf1e   :  { %v2187_v9 = vsub.f32 %v2173_v20, %v2185_v59  ;;  %v2563_v20 = vld [vmem:[%s3798_s18 + $0x8] sm:$0xff] }
 0xf1f   :  { %2367 = vmatpush.bf16.msra.mxu1 %v2563_v20 }
 0xf20   :  { %v2189_v57 = vmul.f32 %v2187_v9, %v2187_v9 }
 0xf22   :  { %v2191_v47 = vsel %vm96_vm0, %v2189_v57, 0.0 }
 0xf23   :  { %2192 = vadd.xlane.f32.xlu1 %v2191_v47  ;;  %v2270_v63 = vpop.permute.xlu2 %2269  ;;  %2368 = vmatpush.bf16.msra.mxu1 %v2562_v51 }
 0xf2b   :  { %v2184_v17 = vpop.xlane.xlu1 %2183 }
 0xf2c   :  { %v2186_v15 = vmul.f32 %v2184_v17, %v3269_v37 }
 0xf2e   :  { %v2188_v35 = vsub.f32 %v2174_v18, %v2186_v15 }
 0xf30   :  { %v2190_v13 = vmul.f32 %v2188_v35, %v2188_v35 }
 0xf32   :  { %v2194_v55 = vsel %vm96_vm0, %v2190_v13, 0.0 }
 0xf33   :  { %2195 = vadd.xlane.f32.xlu0 %v2194_v55 }
 0xf96   :  { %v2193_v6 = vpop.xlane.xlu1 %2192 }
 0xf97   :  { %v2197_v48 = vmul.f32 %v2193_v6, %v3269_v37 }
 0xf99   :  { %v2199_v39 = vadd.f32 1e-05, %v2197_v48 }
 0xf9b   :  { %2816 = vrsqrt.f32 %v2199_v39  ;;  %vm2207_vm3 = vweird.f32 %v2199_v39 }
 0xfa1   :  { %v2817_v49 = vpop.eup %2816 }
 0xfa2   :  { %v2202_v19 = vmul.f32 %v2817_v49, %v2199_v39  ;;  %vm2208_vm1 = vweird.f32 %v2817_v49 }
 0xfa3   :  { %vm2209_vm4 = vmor %vm2207_vm3, %vm2208_vm1 }
 0xfa4   :  { %v2203_v38 = vmul.f32 %v2817_v49, %v2202_v19 }
 0xfa6   :  { %v2196_v14 = vpop.xlane.xlu0 %2195  ;;  %v2204_v53 = vmul.f32 0.5, %v2203_v38 }
 0xfa7   :  { %v2198_v33 = vmul.f32 %v2196_v14, %v3269_v37 }
 0xfa8   :  { %v2205_v21 = vsub.f32 1.5, %v2204_v53 }
 0xfa9   :  { %v2200_v0 = vadd.f32 1e-05, %v2198_v33 }
 0xfaa   :  { %v2206_v5 = vmul.f32 %v2817_v49, %v2205_v21 }
 0xfab   :  { %2818 = vrsqrt.f32 %v2200_v0  ;;  %vm2217_vm7 = vweird.f32 %v2200_v0 }
 0xfac   :  { %v2210_v46 = vsel %vm2209_vm4, %v2817_v49, %v2206_v5 }
 0xfad   :  { %v2221_v29 = vmul.f32 %v2210_v46, %v2187_v9 }
 0xfaf   :  { %v2226_v8 = vmul.f32 %v2658_v45, %v2221_v29 }
 0xfb1   :  { %v2819_v27 = vpop.eup %2818  ;;  %v2231_v2 = vadd.f32 %v2659_v30, %v2226_v8 }
 0xfb2   :  { %v2212_v23 = vmul.f32 %v2819_v27, %v2200_v0  ;;  %vm2218_vm6 = vweird.f32 %v2819_v27 }
 0xfb3   :  { %vm2219_vm8 = vmor %vm2217_vm7, %vm2218_vm6 }
 0xfb4   :  { %v2213_v37 = vmul.f32 %v2819_v27, %v2212_v23 }
 0xfb6   :  { %v2214_v4 = vmul.f32 0.5, %v2213_v37 }
 0xfb8   :  { %v2215_v50 = vsub.f32 1.5, %v2214_v4 }
 0xfba   :  { %v2216_v25 = vmul.f32 %v2819_v27, %v2215_v50 }
 0xfbc   :  { %v2220_v11 = vsel %vm2219_vm8, %v2819_v27, %v2216_v25 }
 0xfbd   :  { %v2222_v26 = vmul.f32 %v2220_v11, %v2188_v35 }
 0xfbf   :  { %v2227_v43 = vmul.f32 %v2658_v45, %v2222_v26 }
 0xfc1   :  { %v2232_v34 = vadd.f32 %v2659_v30, %v2227_v43 }
 0xfc3   :  { %v2264_v12 = vrot.slane %v2232_v34, 7 }
 0xfc5   :  { %v2266_v42 = vsel %vm2265_vm9, %v2264_v12, %v2231_v2 }
 0xfc6   :  { %v2272_v44 = vsel %vm96_vm0, %v2266_v42, %v2270_v63  ;;  %vm2357_vm0 = vcmask 523264  }
 0xfc7   :  { %v2273_v61 = vpack.c.bf16 %v2272_v44, %v2272_v44 }
 0xfc9   :  { %2526 = vmatmul.msk.bf16.vlgmr.msra.gmra.mxu0 %vm2298_vm10, %v2273_v61 }
0x1046   :  { %v2315_v10 = vpop.f32.mrf.mxu0 }
0x1047   :  { %v2316_v28 = vadd.f32 %v2660_v1, %v2315_v10 }
0x1049   :  { %v2319_v18 = vmax.f32 %v2316_v28, 0.0 }
0x104b   :  { %v2320_v60 = vpack.c.bf16 %v2319_v18, %v2319_v18 }
0x104d   :  { %2543 = vmatmul.msk.bf16.vlgmr.msra.gmra.mxu1 %vm2357_vm0, %v2320_v60 }
0x104e   :  { %v2317_v3 = vpop.f32.mrf.mxu0 }
0x10ca   :  { %v2370_v7 = vpop.f32.mrf.mxu1 }
0x10cb   :  { %v2371_v59 = vadd.f32 %v2661_v56, %v2370_v7 }
0x10cd   :  { %v2375_v62 = vsel %vm2374_vm11, %v2371_v59, 0.0 }
0x10ce   :  { %2376 = vst [vmem:[%s3800_s20] sm:$0x3] %v2375_v62 }
0x10d2   :  { %v2372_v54 = vpop.f32.mrf.mxu1 }

</bundles_post_ra>
